<compile_context>
chip_gen: v7x
topology: tpu7x:2x2x1
jax: 0.10.0
libtpu: 0.0.40
codegen_flags: <defaults>
</compile_context>

<pallas_src>
import functools

import jax
import jax.numpy as jnp
from jax.experimental import pallas as pl
from jax.experimental.pallas import tpu as pltpu


# Point-tiles-per-batch threshold above which the FC head is fused into the
# conv kernel's last-tile epilogue; below it the head runs batched (M = B).
_FUSE_HEAD_MIN_TILES = 8


# ----------------------------------------------------------------------------
# Shared kernel helpers.
# ----------------------------------------------------------------------------
def _conv_tile(x_ref, w1_ref, b1_ref, w2_ref, b2_ref, w3_ref, gmax_ref):
    """One point-tile of the conv stack; updates the running-max accumulator.

    NOTE: correctness of gmax_ref relies on the reduction axis (grid axis 1)
    being innermost and marked "arbitrary", and on the init below firing at
    the first tile of every batch.  Do NOT reorder the grid to (nt, B).
    """
    t = pl.program_id(1)

    @pl.when(t == 0)
    def _():
        gmax_ref[...] = jnp.full_like(gmax_ref, -jnp.inf)

    # Native-layout lane-dense (k, TN) f32 block -> in-kernel transpose (small
    # XLU work) -> bf16 for the MXU.
    x = jnp.transpose(x_ref[0]).astype(jnp.bfloat16)              # (TN, k)
    h = jnp.dot(x, w1_ref[...], preferred_element_type=jnp.float32) + b1_ref[...]
    h = jnp.maximum(h, 0.0).astype(jnp.bfloat16)                  # (TN, 64)
    h = jnp.dot(h, w2_ref[...], preferred_element_type=jnp.float32) + b2_ref[...]
    h = jnp.maximum(h, 0.0).astype(jnp.bfloat16)                  # (TN, 128)
    # conv3: raw f32 MXU output only — bias + ReLU hoisted past the max-pool.
    h = jnp.dot(h, w3_ref[...], preferred_element_type=jnp.float32)  # (TN, 1024)
    gmax_ref[...] = jnp.maximum(gmax_ref[...],
                                jnp.max(h, axis=0, keepdims=True))


def _fc_head(g_bf16, w4_ref, b4_ref, w5_ref, b5_ref, w6_ref, b6_ref, iden_ref):
    """FC head 1024->512->256->k*k (BN folded) + flattened identity."""
    f = jnp.dot(g_bf16, w4_ref[...], preferred_element_type=jnp.float32) + b4_ref[...]
    f = jnp.maximum(f, 0.0).astype(jnp.bfloat16)                  # (M, 512)
    f = jnp.dot(f, w5_ref[...], preferred_element_type=jnp.float32) + b5_ref[...]
    f = jnp.maximum(f, 0.0).astype(jnp.bfloat16)                  # (M, 256)
    return (jnp.dot(f, w6_ref[...], preferred_element_type=jnp.float32)
            + b6_ref[...] + iden_ref[...])                        # (M, k*k) f32


# ----------------------------------------------------------------------------
# Kernels.
# ----------------------------------------------------------------------------
def _stnkd_fused_kernel(x_ref, w1_ref, b1_ref, w2_ref, b2_ref, w3_ref, b3_ref,
                        w4_ref, b4_ref, w5_ref, b5_ref, w6_ref, b6_ref,
                        iden_ref, o_ref, gmax_ref):
    """Conv stack + running max; FC head fused into the last-tile epilogue."""
    _conv_tile(x_ref, w1_ref, b1_ref, w2_ref, b2_ref, w3_ref, gmax_ref)

    @pl.when(pl.program_id(1) == pl.num_programs(1) - 1)
    def _():
        # Hoisted conv3 bias + ReLU, applied once on the (1, 1024) vector.
        g = jnp.maximum(gmax_ref[...] + b3_ref[...], 0.0).astype(jnp.bfloat16)
        o_ref[0] = _fc_head(g, w4_ref, b4_ref, w5_ref, b5_ref,
                            w6_ref, b6_ref, iden_ref)


def _stnkd_conv_kernel(x_ref, w1_ref, b1_ref, w2_ref, b2_ref, w3_ref, b3_ref,
                       g_ref, gmax_ref):
    """Conv stack + running max; emits the (1, 1024) global feature per batch."""
    _conv_tile(x_ref, w1_ref, b1_ref, w2_ref, b2_ref, w3_ref, gmax_ref)

    @pl.when(pl.program_id(1) == pl.num_programs(1) - 1)
    def _():
        g_ref[0] = jnp.maximum(gmax_ref[...] + b3_ref[...], 0.0)


def _stnkd_head_kernel(g_ref, w4_ref, b4_ref, w5_ref, b5_ref, w6_ref, b6_ref,
                       iden_ref, o_ref):
    """Batched FC head (M = B) for the few-point-tile regime."""
    g = g_ref[...].astype(jnp.bfloat16)                           # (B, 1024)
    o_ref[...] = _fc_head(g, w4_ref, b4_ref, w5_ref, b5_ref,
                          w6_ref, b6_ref, iden_ref)


# ----------------------------------------------------------------------------
# Parameter construction (deterministic, PyTorch __init__ shapes) + BN folding.
# ----------------------------------------------------------------------------
def init_stnkd_params(key, k):
    def normal(key, shape, scale=0.05):
        return scale * jax.random.normal(key, shape, dtype=jnp.float32)

    keys = jax.random.split(key, 32)
    it = iter(keys)
    p = {}
    p["conv1_w"] = normal(next(it), (64, k, 1));     p["conv1_b"] = normal(next(it), (64,))
    p["conv2_w"] = normal(next(it), (128, 64, 1));   p["conv2_b"] = normal(next(it), (128,))
    p["conv3_w"] = normal(next(it), (1024, 128, 1)); p["conv3_b"] = normal(next(it), (1024,))
    p["fc1_w"] = normal(next(it), (512, 1024));      p["fc1_b"] = normal(next(it), (512,))
    p["fc2_w"] = normal(next(it), (256, 512));       p["fc2_b"] = normal(next(it), (256,))
    p["fc3_w"] = normal(next(it), (k * k, 256));     p["fc3_b"] = normal(next(it), (k * k,))
    for name, c in (("bn1", 64), ("bn2", 128), ("bn3", 1024),
                    ("bn4", 512), ("bn5", 256)):
        p[f"{name}_gamma"] = 1.0 + normal(next(it), (c,), 0.1)
        p[f"{name}_beta"] = normal(next(it), (c,), 0.1)
        p[f"{name}_mean"] = normal(next(it), (c,), 0.1)
        p[f"{name}_var"] = 1.0 + jnp.abs(normal(next(it), (c,), 0.1))
    return p


def _fold_bn(w_oi, b_o, gamma, beta, mean, var, eps=1e-5):
    """Fold eval-mode BN into a bf16 (Cin, Cout) weight + f32 (1, Cout) bias."""
    scale = gamma / jnp.sqrt(var + eps)                           # (Cout,)
    w_eff = (w_oi.T * scale[None, :]).astype(jnp.bfloat16)        # (Cin, Cout)
    b_eff = ((b_o - mean) * scale + beta)[None, :].astype(jnp.float32)
    return w_eff, b_eff


def _round_up(x, m):
    return ((x + m - 1) // m) * m


# ----------------------------------------------------------------------------
# Wrapper: STNkd forward.
# ----------------------------------------------------------------------------
@functools.partial(jax.jit, static_argnames=("k",))
def stnkd_forward(x_bkn, params, *, k):
    B, kc, N = x_bkn.shape
    assert kc == k

    # ---- fold eval-mode BN into conv / fc weights (bf16 weights, f32 bias) --
    w1, b1 = _fold_bn(params["conv1_w"][:, :, 0], params["conv1_b"],
                      params["bn1_gamma"], params["bn1_beta"],
                      params["bn1_mean"], params["bn1_var"])
    w2, b2 = _fold_bn(params["conv2_w"][:, :, 0], params["conv2_b"],
                      params["bn2_gamma"], params["bn2_beta"],
                      params["bn2_mean"], params["bn2_var"])
    w3, b3 = _fold_bn(params["conv3_w"][:, :, 0], params["conv3_b"],
                      params["bn3_gamma"], params["bn3_beta"],
                      params["bn3_mean"], params["bn3_var"])
    w4, b4 = _fold_bn(params["fc1_w"], params["fc1_b"],
                      params["bn4_gamma"], params["bn4_beta"],
                      params["bn4_mean"], params["bn4_var"])
    w5, b5 = _fold_bn(params["fc2_w"], params["fc2_b"],
                      params["bn5_gamma"], params["bn5_beta"],
                      params["bn5_mean"], params["bn5_var"])
    w6 = params["fc3_w"].T.astype(jnp.bfloat16)                   # (256, k*k)
    b6 = params["fc3_b"][None, :].astype(jnp.float32)             # (1, k*k)
    iden = jnp.eye(k, dtype=jnp.float32).reshape(1, k * k)

    # ---- channel dim padded to a multiple of 8 (zero rows in w1 -> exact) ---
    x_in = x_bkn.astype(jnp.float32)
    kp = _round_up(kc, 8)
    if kp != kc:
        x_in = jnp.pad(x_in, ((0, 0), (0, kp - kc), (0, 0)))
        w1 = jnp.pad(w1, ((0, kp - kc), (0, 0)))

    # ---- point-axis tiling: lane-aligned tile, big enough to amortize the
    #      per-grid-step overhead (review: sweep 512-1024). Edge-replicated
    #      padding leaves the max-pool result unchanged.                  ----
    TN = min(1024, _round_up(N, 128))
    N_pad = _round_up(N, TN)
    if N_pad != N:
        x_in = jnp.pad(x_in, ((0, 0), (0, 0), (0, N_pad - N)), mode="edge")
    nt = N_pad // TN

    # Resident (constant-index) blocks: DMA'd once, reused across the grid.
    resident = lambda shape: pl.BlockSpec(shape, lambda b, t: (0,) * len(shape))
    x_spec = pl.BlockSpec((1, kp, TN), lambda b, t: (b, 0, t))

    conv_flops = 2 * B * N_pad * (kp * 64 + 64 * 128 + 128 * 1024)
    head_flops = 2 * B * (1024 * 512 + 512 * 256 + 256 * k * k)
    conv_w_bytes = 2 * (kp * 64 + 64 * 128 + 128 * 1024)
    head_w_bytes = 2 * (1024 * 512 + 512 * 256 + 256 * k * k)

    compiler_params = pltpu.CompilerParams(
        dimension_semantics=("parallel", "arbitrary"),
        vmem_limit_bytes=48 * 1024 * 1024)

    conv_in_specs = [
        x_spec,
        resident((kp, 64)), resident((1, 64)),
        resident((64, 128)), resident((1, 128)),
        resident((128, 1024)), resident((1, 1024)),
    ]

    if nt >= _FUSE_HEAD_MIN_TILES:
        # Many point tiles per batch: the M=1 FC head is amortized -> fuse it
        # into the last-tile epilogue and skip the HBM round-trip of g.
        out_flat = pl.pallas_call(
            _stnkd_fused_kernel,
            out_shape=jax.ShapeDtypeStruct((B, 1, k * k), jnp.float32),
            grid_spec=pltpu.PrefetchScalarGridSpec(
                num_scalar_prefetch=0,
                grid=(B, nt),
                in_specs=conv_in_specs + [
                    resident((1024, 512)), resident((1, 512)),
                    resident((512, 256)), resident((1, 256)),
                    resident((256, k * k)), resident((1, k * k)),
                    resident((1, k * k)),
                ],
                out_specs=pl.BlockSpec((1, 1, k * k), lambda b, t: (b, 0, 0)),
                scratch_shapes=[pltpu.VMEM((1, 1024), jnp.float32)],
            ),
            compiler_params=compiler_params,
            cost_estimate=pl.CostEstimate(
                flops=int(conv_flops + head_flops), transcendentals=0,
                bytes_accessed=int(B * kp * N_pad * 4 + conv_w_bytes
                                   + head_w_bytes + B * k * k * 4)),
        )(x_in, w1, b1, w2, b2, w3, b3, w4, b4, w5, b5, w6, b6, iden)
        return out_flat.reshape(B, k, k)

    # Few point tiles per batch: emit the global feature and run the FC head
    # batched with M = B (fills the MXU M dimension, no per-batch drain).
    gfeat = pl.pallas_call(
        _stnkd_conv_kernel,
        out_shape=jax.ShapeDtypeStruct((B, 1, 1024), jnp.float32),
        grid_spec=pltpu.PrefetchScalarGridSpec(
            num_scalar_prefetch=0,
            grid=(B, nt),
            in_specs=conv_in_specs,
            out_specs=pl.BlockSpec((1, 1, 1024), lambda b, t: (b, 0, 0)),
            scratch_shapes=[pltpu.VMEM((1, 1024), jnp.float32)],
        ),
        compiler_params=compiler_params,
        cost_estimate=pl.CostEstimate(
            flops=int(conv_flops), transcendentals=0,
            bytes_accessed=int(B * kp * N_pad * 4 + conv_w_bytes
                               + B * 1024 * 4)),
    )(x_in, w1, b1, w2, b2, w3, b3)

    g = gfeat.reshape(B, 1024)
    full1 = lambda shape: pl.BlockSpec(shape, lambda i: (0,) * len(shape))
    out_flat = pl.pallas_call(
        _stnkd_head_kernel,
        out_shape=jax.ShapeDtypeStruct((B, k * k), jnp.float32),
        grid_spec=pltpu.PrefetchScalarGridSpec(
            num_scalar_prefetch=0,
            grid=(1,),
            in_specs=[
                full1((B, 1024)),
                full1((1024, 512)), full1((1, 512)),
                full1((512, 256)), full1((1, 256)),
                full1((256, k * k)), full1((1, k * k)),
                full1((1, k * k)),
            ],
            out_specs=full1((B, k * k)),
        ),
        compiler_params=pltpu.CompilerParams(
            dimension_semantics=("arbitrary",)),
        cost_estimate=pl.CostEstimate(
            flops=int(head_flops), transcendentals=0,
            bytes_accessed=int(B * 1024 * 4 + head_w_bytes + B * k * k * 4)),
    )(g, w4, b4, w5, b5, w6, b6, iden)
    return out_flat.reshape(B, k, k)


# ----------------------------------------------------------------------------
# Pure-JAX f32 reference (same eval-mode BN semantics) for verification.
# ----------------------------------------------------------------------------
def stnkd_reference(x_bkn, params, k):
    def bn(y, name, eps=1e-5):
        return ((y - params[f"{name}_mean"])
                / jnp.sqrt(params[f"{name}_var"] + eps)
                * params[f"{name}_gamma"] + params[f"{name}_beta"])

    x = jnp.transpose(x_bkn, (0, 2, 1)).astype(jnp.float32)       # (B, N, k)
    h = jax.nn.relu(bn(x @ params["conv1_w"][:, :, 0].T + params["conv1_b"], "bn1"))
    h = jax.nn.relu(bn(h @ params["conv2_w"][:, :, 0].T + params["conv2_b"], "bn2"))
    h = jax.nn.relu(bn(h @ params["conv3_w"][:, :, 0].T + params["conv3_b"], "bn3"))
    g = jnp.max(h, axis=1)                                        # (B, 1024)
    g = jax.nn.relu(bn(g @ params["fc1_w"].T + params["fc1_b"], "bn4"))
    g = jax.nn.relu(bn(g @ params["fc2_w"].T + params["fc2_b"], "bn5"))
    g = g @ params["fc3_w"].T + params["fc3_b"]
    g = g + jnp.eye(k, dtype=jnp.float32).reshape(1, k * k)
    return g.reshape(-1, k, k)


if __name__ == "__main__":
    B, k, N = 2, 16, 32   # small shapes: batch=2, channels k=16, points N=32
    key = jax.random.PRNGKey(0)
    kx, kp_ = jax.random.split(key)
    x = jax.random.normal(kx, (B, k, N), dtype=jnp.float32)       # (B, k, N) NCW
    params = init_stnkd_params(kp_, k)

    out = stnkd_forward(x, params, k=k)
    out = jax.block_until_ready(out)

    ref = stnkd_reference(x, params, k)
    assert out.shape == (B, k, k), out.shape
    # bf16 weights/activations with f32 accumulation: loosened tolerance.
    assert jnp.allclose(out, ref, rtol=3e-2, atol=3e-2), \
        float(jnp.max(jnp.abs(out - ref)))

    print("KERNEL_OK")
</pallas_src>

<mosaic_0001>
module attributes {stable_mosaic.version = 11 : i64} {
  func.func @_stnkd_conv_kernel(%arg0: i32, %arg1: i32, %arg2: memref<1x16x128xf32, #tpu.memory_space<vmem>>, %arg3: memref<16x64xbf16, #tpu.memory_space<vmem>>, %arg4: memref<1x64xf32, #tpu.memory_space<vmem>>, %arg5: memref<64x128xbf16, #tpu.memory_space<vmem>>, %arg6: memref<1x128xf32, #tpu.memory_space<vmem>>, %arg7: memref<128x1024xbf16, #tpu.memory_space<vmem>>, %arg8: memref<1x1024xf32, #tpu.memory_space<vmem>>, %arg9: memref<1x1x1024xf32, #tpu.memory_space<vmem>>, %arg10: memref<1x1024xf32, #tpu.memory_space<vmem>>) attributes {dimension_semantics = [#tpu.dimension_semantics<parallel>, #tpu.dimension_semantics<arbitrary>], iteration_bounds = array<i64: 2, 1>, scalar_prefetch = 0 : i64, scratch_operands = 1 : i64, tpu.core_type = #tpu.core_type<tc>, window_params = [{transform_indices = @transform_0, window_bounds = array<i64: 1, 16, 128>}, {pipeline_mode = #tpu.pipeline_mode<synchronous>, transform_indices = @transform_1, window_bounds = array<i64: 16, 64>}, {pipeline_mode = #tpu.pipeline_mode<synchronous>, transform_indices = @transform_2, window_bounds = array<i64: 1, 64>}, {pipeline_mode = #tpu.pipeline_mode<synchronous>, transform_indices = @transform_3, window_bounds = array<i64: 64, 128>}, {pipeline_mode = #tpu.pipeline_mode<synchronous>, transform_indices = @transform_4, window_bounds = array<i64: 1, 128>}, {pipeline_mode = #tpu.pipeline_mode<synchronous>, transform_indices = @transform_5, window_bounds = array<i64: 128, 1024>}, {pipeline_mode = #tpu.pipeline_mode<synchronous>, transform_indices = @transform_6, window_bounds = array<i64: 1, 1024>}, {transform_indices = @transform_7, window_bounds = array<i64: 1, 1, 1024>}]} {
    %c0_i32 = arith.constant 0 : i32
    %0 = arith.cmpi eq, %arg1, %c0_i32 : i32
    %1 = arith.extui %0 : i1 to i32
    %c0_i32_0 = arith.constant 0 : i32
    %2 = arith.cmpi ne, %1, %c0_i32_0 : i32
    scf.if %2 {
      %cst_24 = arith.constant 0xFF800000 : f32
      %33 = vector.broadcast %cst_24 : f32 to vector<1x1024xf32>
      %c0_25 = arith.constant 0 : index
      %c0_26 = arith.constant 0 : index
      %34 = vector.load %arg10[%c0_25, %c0_26] : memref<1x1024xf32, #tpu.memory_space<vmem>>, vector<1x1024xf32>
      tpu.vector_store %arg10[%c0_25, %c0_26], %33 {strides = array<i32>} : memref<1x1024xf32, #tpu.memory_space<vmem>>, vector<1x1024xf32>,
    } else {
    }
    %c0 = arith.constant 0 : index
    %c0_1 = arith.constant 0 : index
    %c0_2 = arith.constant 0 : index
    %3 = vector.load %arg2[%c0, %c0_1, %c0_2] : memref<1x16x128xf32, #tpu.memory_space<vmem>>, vector<1x16x128xf32>
    %4 = vector.shape_cast %3 : vector<1x16x128xf32> to vector<16x128xf32>
    %5 = tpu.transpose %4, [1, 0] : vector<16x128xf32> -> vector<128x16xf32>
    %6 = arith.truncf %5 : vector<128x16xf32> to vector<128x16xbf16>
    %c0_3 = arith.constant 0 : index
    %c0_4 = arith.constant 0 : index
    %7 = vector.load %arg3[%c0_3, %c0_4] : memref<16x64xbf16, #tpu.memory_space<vmem>>, vector<16x64xbf16>
    %cst = arith.constant dense<0.000000e+00> : vector<128x64xf32>
    %8 = tpu.matmul %6, %7, %cst {dimension_numbers = #tpu.dot_dimension_numbers<[1], [0], [0], [1], [0, 0, 1, 1], [], []>} : vector<128x16xbf16>, vector<16x64xbf16>, vector<128x64xf32> -> vector<128x64xf32>
    %c0_5 = arith.constant 0 : index
    %c0_6 = arith.constant 0 : index
    %9 = vector.load %arg4[%c0_5, %c0_6] : memref<1x64xf32, #tpu.memory_space<vmem>>, vector<1x64xf32>
    %10 = vector.broadcast %9 : vector<1x64xf32> to vector<128x64xf32>
    %11 = arith.addf %8, %10 : vector<128x64xf32>
    %cst_7 = arith.constant 0.000000e+00 : f32
    %12 = vector.broadcast %cst_7 : f32 to vector<128x64xf32>
    %13 = arith.maximumf %11, %12 : vector<128x64xf32>
    %14 = arith.truncf %13 : vector<128x64xf32> to vector<128x64xbf16>
    %c0_8 = arith.constant 0 : index
    %c0_9 = arith.constant 0 : index
    %15 = vector.load %arg5[%c0_8, %c0_9] : memref<64x128xbf16, #tpu.memory_space<vmem>>, vector<64x128xbf16>
    %cst_10 = arith.constant dense<0.000000e+00> : vector<128x128xf32>
    %16 = tpu.matmul %14, %15, %cst_10 {dimension_numbers = #tpu.dot_dimension_numbers<[1], [0], [0], [1], [0, 0, 1, 1], [], []>} : vector<128x64xbf16>, vector<64x128xbf16>, vector<128x128xf32> -> vector<128x128xf32>
    %c0_11 = arith.constant 0 : index
    %c0_12 = arith.constant 0 : index
    %17 = vector.load %arg6[%c0_11, %c0_12] : memref<1x128xf32, #tpu.memory_space<vmem>>, vector<1x128xf32>
    %18 = vector.broadcast %17 : vector<1x128xf32> to vector<128x128xf32>
    %19 = arith.addf %16, %18 : vector<128x128xf32>
    %cst_13 = arith.constant 0.000000e+00 : f32
    %20 = vector.broadcast %cst_13 : f32 to vector<128x128xf32>
    %21 = arith.maximumf %19, %20 : vector<128x128xf32>
    %22 = arith.truncf %21 : vector<128x128xf32> to vector<128x128xbf16>
    %c0_14 = arith.constant 0 : index
    %c0_15 = arith.constant 0 : index
    %23 = vector.load %arg7[%c0_14, %c0_15] : memref<128x1024xbf16, #tpu.memory_space<vmem>>, vector<128x1024xbf16>
    %cst_16 = arith.constant dense<0.000000e+00> : vector<128x1024xf32>
    %24 = tpu.matmul %22, %23, %cst_16 {dimension_numbers = #tpu.dot_dimension_numbers<[1], [0], [0], [1], [0, 0, 1, 1], [], []>} : vector<128x128xbf16>, vector<128x1024xbf16>, vector<128x1024xf32> -> vector<128x1024xf32>
    %c0_17 = arith.constant 0 : index
    %c0_18 = arith.constant 0 : index
    %25 = vector.load %arg10[%c0_17, %c0_18] : memref<1x1024xf32, #tpu.memory_space<vmem>>, vector<1x1024xf32>
    %cst_19 = arith.constant dense<0xFF800000> : vector<1024xf32>
    %26 = vector.multi_reduction <maximumf>, %24, %cst_19 [0] : vector<128x1024xf32> to vector<1024xf32>
    %27 = vector.shape_cast %26 : vector<1024xf32> to vector<1x1024xf32>
    %28 = arith.maximumf %25, %27 : vector<1x1024xf32>
    %c0_20 = arith.constant 0 : index
    %c0_21 = arith.constant 0 : index
    %29 = vector.load %arg10[%c0_20, %c0_21] : memref<1x1024xf32, #tpu.memory_space<vmem>>, vector<1x1024xf32>
    tpu.vector_store %arg10[%c0_20, %c0_21], %28 {strides = array<i32>} : memref<1x1024xf32, #tpu.memory_space<vmem>>, vector<1x1024xf32>,
    %c0_i32_22 = arith.constant 0 : i32
    %30 = arith.cmpi eq, %arg1, %c0_i32_22 : i32
    %31 = arith.extui %30 : i1 to i32
    %c0_i32_23 = arith.constant 0 : i32
    %32 = arith.cmpi ne, %31, %c0_i32_23 : i32
    scf.if %32 {
      %c0_24 = arith.constant 0 : index
      %c0_25 = arith.constant 0 : index
      %33 = vector.load %arg10[%c0_24, %c0_25] : memref<1x1024xf32, #tpu.memory_space<vmem>>, vector<1x1024xf32>
      %c0_26 = arith.constant 0 : index
      %c0_27 = arith.constant 0 : index
      %34 = vector.load %arg8[%c0_26, %c0_27] : memref<1x1024xf32, #tpu.memory_space<vmem>>, vector<1x1024xf32>
      %35 = arith.addf %33, %34 : vector<1x1024xf32>
      %cst_28 = arith.constant 0.000000e+00 : f32
      %36 = vector.broadcast %cst_28 : f32 to vector<1x1024xf32>
      %37 = arith.maximumf %35, %36 : vector<1x1024xf32>
      %c0_29 = arith.constant 0 : index
      %c0_30 = arith.constant 0 : index
      %c0_31 = arith.constant 0 : index
      %38 = vector.load %arg9[%c0_29, %c0_30, %c0_31] : memref<1x1x1024xf32, #tpu.memory_space<vmem>>, vector<1x1x1024xf32>
      %39 = vector.shape_cast %38 : vector<1x1x1024xf32> to vector<1x1024xf32>
      %40 = vector.shape_cast %37 : vector<1x1024xf32> to vector<1x1x1024xf32>
      tpu.vector_store %arg9[%c0_29, %c0_30, %c0_31], %40 {strides = array<i32>} : memref<1x1x1024xf32, #tpu.memory_space<vmem>>, vector<1x1x1024xf32>,
    } else {
    }
    return
  }
  func.func @transform_0(%arg0: i32, %arg1: i32) -> (i32, i32, i32) {
    %c0_i32 = arith.constant 0 : i32
    %c0_i32_0 = arith.constant 0 : i32
    return %arg0, %c0_i32, %arg1 : i32, i32, i32
  }
  func.func @transform_1(%arg0: i32, %arg1: i32) -> (i32, i32) {
    %c0_i32 = arith.constant 0 : i32
    %c0_i32_0 = arith.constant 0 : i32
    %c0_i32_1 = arith.constant 0 : i32
    return %c0_i32, %c0_i32_0 : i32, i32
  }
  func.func @transform_2(%arg0: i32, %arg1: i32) -> (i32, i32) {
    %c0_i32 = arith.constant 0 : i32
    %c0_i32_0 = arith.constant 0 : i32
    %c0_i32_1 = arith.constant 0 : i32
    return %c0_i32, %c0_i32_0 : i32, i32
  }
  func.func @transform_3(%arg0: i32, %arg1: i32) -> (i32, i32) {
    %c0_i32 = arith.constant 0 : i32
    %c0_i32_0 = arith.constant 0 : i32
    %c0_i32_1 = arith.constant 0 : i32
    return %c0_i32, %c0_i32_0 : i32, i32
  }
  func.func @transform_4(%arg0: i32, %arg1: i32) -> (i32, i32) {
    %c0_i32 = arith.constant 0 : i32
    %c0_i32_0 = arith.constant 0 : i32
    %c0_i32_1 = arith.constant 0 : i32
    return %c0_i32, %c0_i32_0 : i32, i32
  }
  func.func @transform_5(%arg0: i32, %arg1: i32) -> (i32, i32) {
    %c0_i32 = arith.constant 0 : i32
    %c0_i32_0 = arith.constant 0 : i32
    %c0_i32_1 = arith.constant 0 : i32
    return %c0_i32, %c0_i32_0 : i32, i32
  }
  func.func @transform_6(%arg0: i32, %arg1: i32) -> (i32, i32) {
    %c0_i32 = arith.constant 0 : i32
    %c0_i32_0 = arith.constant 0 : i32
    %c0_i32_1 = arith.constant 0 : i32
    return %c0_i32, %c0_i32_0 : i32, i32
  }
  func.func @transform_7(%arg0: i32, %arg1: i32) -> (i32, i32, i32) {
    %c0_i32 = arith.constant 0 : i32
    %c0_i32_0 = arith.constant 0 : i32
    %c0_i32_1 = arith.constant 0 : i32
    return %arg0, %c0_i32, %c0_i32_0 : i32, i32, i32
  }
}

module attributes {stable_mosaic.version = 11 : i64} {
  func.func @_stnkd_head_kernel(%arg0: i32, %arg1: memref<2x1024xf32, #tpu.memory_space<vmem>>, %arg2: memref<1024x512xbf16, #tpu.memory_space<vmem>>, %arg3: memref<1x512xf32, #tpu.memory_space<vmem>>, %arg4: memref<512x256xbf16, #tpu.memory_space<vmem>>, %arg5: memref<1x256xf32, #tpu.memory_space<vmem>>, %arg6: memref<256x256xbf16, #tpu.memory_space<vmem>>, %arg7: memref<1x256xf32, #tpu.memory_space<vmem>>, %arg8: memref<1x256xf32, #tpu.memory_space<vmem>>, %arg9: memref<2x256xf32, #tpu.memory_space<vmem>>) attributes {dimension_semantics = [#tpu.dimension_semantics<arbitrary>], iteration_bounds = array<i64: 1>, scalar_prefetch = 0 : i64, scratch_operands = 0 : i64, tpu.core_type = #tpu.core_type<tc>, window_params = [{pipeline_mode = #tpu.pipeline_mode<synchronous>, transform_indices = @transform_0, window_bounds = array<i64: 2, 1024>}, {pipeline_mode = #tpu.pipeline_mode<synchronous>, transform_indices = @transform_1, window_bounds = array<i64: 1024, 512>}, {pipeline_mode = #tpu.pipeline_mode<synchronous>, transform_indices = @transform_2, window_bounds = array<i64: 1, 512>}, {pipeline_mode = #tpu.pipeline_mode<synchronous>, transform_indices = @transform_3, window_bounds = array<i64: 512, 256>}, {pipeline_mode = #tpu.pipeline_mode<synchronous>, transform_indices = @transform_4, window_bounds = array<i64: 1, 256>}, {pipeline_mode = #tpu.pipeline_mode<synchronous>, transform_indices = @transform_5, window_bounds = array<i64: 256, 256>}, {pipeline_mode = #tpu.pipeline_mode<synchronous>, transform_indices = @transform_6, window_bounds = array<i64: 1, 256>}, {pipeline_mode = #tpu.pipeline_mode<synchronous>, transform_indices = @transform_7, window_bounds = array<i64: 1, 256>}, {pipeline_mode = #tpu.pipeline_mode<synchronous>, transform_indices = @transform_8, window_bounds = array<i64: 2, 256>}]} {
    %c0 = arith.constant 0 : index
    %c0_0 = arith.constant 0 : index
    %0 = vector.load %arg1[%c0, %c0_0] : memref<2x1024xf32, #tpu.memory_space<vmem>>, vector<2x1024xf32>
    %1 = arith.truncf %0 : vector<2x1024xf32> to vector<2x1024xbf16>
    %c0_1 = arith.constant 0 : index
    %c0_2 = arith.constant 0 : index
    %2 = vector.load %arg2[%c0_1, %c0_2] : memref<1024x512xbf16, #tpu.memory_space<vmem>>, vector<1024x512xbf16>
    %cst = arith.constant dense<0.000000e+00> : vector<2x512xf32>
    %3 = tpu.matmul %1, %2, %cst {dimension_numbers = #tpu.dot_dimension_numbers<[1], [0], [0], [1], [0, 0, 1, 1], [], []>} : vector<2x1024xbf16>, vector<1024x512xbf16>, vector<2x512xf32> -> vector<2x512xf32>
    %c0_3 = arith.constant 0 : index
    %c0_4 = arith.constant 0 : index
    %4 = vector.load %arg3[%c0_3, %c0_4] : memref<1x512xf32, #tpu.memory_space<vmem>>, vector<1x512xf32>
    %5 = vector.broadcast %4 : vector<1x512xf32> to vector<2x512xf32>
    %6 = arith.addf %3, %5 : vector<2x512xf32>
    %cst_5 = arith.constant 0.000000e+00 : f32
    %7 = vector.broadcast %cst_5 : f32 to vector<2x512xf32>
    %8 = arith.maximumf %6, %7 : vector<2x512xf32>
    %9 = arith.truncf %8 : vector<2x512xf32> to vector<2x512xbf16>
    %c0_6 = arith.constant 0 : index
    %c0_7 = arith.constant 0 : index
    %10 = vector.load %arg4[%c0_6, %c0_7] : memref<512x256xbf16, #tpu.memory_space<vmem>>, vector<512x256xbf16>
    %cst_8 = arith.constant dense<0.000000e+00> : vector<2x256xf32>
    %11 = tpu.matmul %9, %10, %cst_8 {dimension_numbers = #tpu.dot_dimension_numbers<[1], [0], [0], [1], [0, 0, 1, 1], [], []>} : vector<2x512xbf16>, vector<512x256xbf16>, vector<2x256xf32> -> vector<2x256xf32>
    %c0_9 = arith.constant 0 : index
    %c0_10 = arith.constant 0 : index
    %12 = vector.load %arg5[%c0_9, %c0_10] : memref<1x256xf32, #tpu.memory_space<vmem>>, vector<1x256xf32>
    %13 = vector.broadcast %12 : vector<1x256xf32> to vector<2x256xf32>
    %14 = arith.addf %11, %13 : vector<2x256xf32>
    %cst_11 = arith.constant 0.000000e+00 : f32
    %15 = vector.broadcast %cst_11 : f32 to vector<2x256xf32>
    %16 = arith.maximumf %14, %15 : vector<2x256xf32>
    %17 = arith.truncf %16 : vector<2x256xf32> to vector<2x256xbf16>
    %c0_12 = arith.constant 0 : index
    %c0_13 = arith.constant 0 : index
    %18 = vector.load %arg6[%c0_12, %c0_13] : memref<256x256xbf16, #tpu.memory_space<vmem>>, vector<256x256xbf16>
    %cst_14 = arith.constant dense<0.000000e+00> : vector<2x256xf32>
    %19 = tpu.matmul %17, %18, %cst_14 {dimension_numbers = #tpu.dot_dimension_numbers<[1], [0], [0], [1], [0, 0, 1, 1], [], []>} : vector<2x256xbf16>, vector<256x256xbf16>, vector<2x256xf32> -> vector<2x256xf32>
    %c0_15 = arith.constant 0 : index
    %c0_16 = arith.constant 0 : index
    %20 = vector.load %arg7[%c0_15, %c0_16] : memref<1x256xf32, #tpu.memory_space<vmem>>, vector<1x256xf32>
    %21 = vector.broadcast %20 : vector<1x256xf32> to vector<2x256xf32>
    %22 = arith.addf %19, %21 : vector<2x256xf32>
    %c0_17 = arith.constant 0 : index
    %c0_18 = arith.constant 0 : index
    %23 = vector.load %arg8[%c0_17, %c0_18] : memref<1x256xf32, #tpu.memory_space<vmem>>, vector<1x256xf32>
    %24 = vector.broadcast %23 : vector<1x256xf32> to vector<2x256xf32>
    %25 = arith.addf %22, %24 : vector<2x256xf32>
    %c0_19 = arith.constant 0 : index
    %c0_20 = arith.constant 0 : index
    %26 = vector.load %arg9[%c0_19, %c0_20] : memref<2x256xf32, #tpu.memory_space<vmem>>, vector<2x256xf32>
    tpu.vector_store %arg9[%c0_19, %c0_20], %25 {strides = array<i32>} : memref<2x256xf32, #tpu.memory_space<vmem>>, vector<2x256xf32>,
    return
  }
  func.func @transform_0(%arg0: i32) -> (i32, i32) {
    %c0_i32 = arith.constant 0 : i32
    %c0_i32_0 = arith.constant 0 : i32
    %c0_i32_1 = arith.constant 0 : i32
    return %c0_i32, %c0_i32_0 : i32, i32
  }
  func.func @transform_1(%arg0: i32) -> (i32, i32) {
    %c0_i32 = arith.constant 0 : i32
    %c0_i32_0 = arith.constant 0 : i32
    %c0_i32_1 = arith.constant 0 : i32
    return %c0_i32, %c0_i32_0 : i32, i32
  }
  func.func @transform_2(%arg0: i32) -> (i32, i32) {
    %c0_i32 = arith.constant 0 : i32
    %c0_i32_0 = arith.constant 0 : i32
    %c0_i32_1 = arith.constant 0 : i32
    return %c0_i32, %c0_i32_0 : i32, i32
  }
  func.func @transform_3(%arg0: i32) -> (i32, i32) {
    %c0_i32 = arith.constant 0 : i32
    %c0_i32_0 = arith.constant 0 : i32
    %c0_i32_1 = arith.constant 0 : i32
    return %c0_i32, %c0_i32_0 : i32, i32
  }
  func.func @transform_4(%arg0: i32) -> (i32, i32) {
    %c0_i32 = arith.constant 0 : i32
    %c0_i32_0 = arith.constant 0 : i32
    %c0_i32_1 = arith.constant 0 : i32
    return %c0_i32, %c0_i32_0 : i32, i32
  }
  func.func @transform_5(%arg0: i32) -> (i32, i32) {
    %c0_i32 = arith.constant 0 : i32
    %c0_i32_0 = arith.constant 0 : i32
    %c0_i32_1 = arith.constant 0 : i32
    return %c0_i32, %c0_i32_0 : i32, i32
  }
  func.func @transform_6(%arg0: i32) -> (i32, i32) {
    %c0_i32 = arith.constant 0 : i32
    %c0_i32_0 = arith.constant 0 : i32
    %c0_i32_1 = arith.constant 0 : i32
    return %c0_i32, %c0_i32_0 : i32, i32
  }
  func.func @transform_7(%arg0: i32) -> (i32, i32) {
    %c0_i32 = arith.constant 0 : i32
    %c0_i32_0 = arith.constant 0 : i32
    %c0_i32_1 = arith.constant 0 : i32
    return %c0_i32, %c0_i32_0 : i32, i32
  }
  func.func @transform_8(%arg0: i32) -> (i32, i32) {
    %c0_i32 = arith.constant 0 : i32
    %c0_i32_0 = arith.constant 0 : i32
    %c0_i32_1 = arith.constant 0 : i32
    return %c0_i32, %c0_i32_0 : i32, i32
  }
}

</mosaic_0001>

<bundles_post_ra>
// kernel: stnkd_forward.2
= control target key start
LH: loop header
LB: loop body
LE: loop exit
PB: predicated region body
PF: predicated region fallthrough
CT: control target
= control target key end

     0   :  { %s2093_s24 = smov 0   ;;  %s2095_s25 = smov 0   ;;  %s2471_s0 = inlined_call_operand.vmem [shape: f32[2,16,128], index: 0, kind: input, shape index: {}]   ;;  %s2472_s1 = inlined_call_operand.vmem [shape: bf16[16,64], index: 1, kind: input, shape index: {}]   ;;  %s2473_s2 = inlined_call_operand.vmem [shape: f32[1,64], index: 2, kind: input, shape index: {}]   ;;  %s2474_s3 = inlined_call_operand.vmem [shape: bf16[64,128], index: 3, kind: input, shape index: {}]   ;;  %s2475_s4 = inlined_call_operand.vmem [shape: f32[1,128], index: 4, kind: input, shape index: {}]   ;;  %s2476_s5 = inlined_call_operand.vmem [shape: bf16[128,1024], index: 5, kind: input, shape index: {}]   ;;  %s2477_s6 = inlined_call_operand.vmem [shape: f32[1,1024], index: 6, kind: input, shape index: {}]   ;;  %s2478_s7 = inlined_call_operand.vmem [shape: f32[2,1,1024], index: 7, kind: output, shape index: {}]  }
   0x1   :  { %s2097_s26 = smov 0  }
   0x2 LB: > { %s29_s27 = sadd.s32 1, %s2045_s25  ;;  %p1838_p0 = scmp.ge.s32.totalorder %s2049_s26, 1  ;;  %s2049_s26 = sphi %s2097_s26, %s17_s26   ;;  %s2045_s25 = sphi %s2095_s25, %s2480_s25   ;;  %s2041_s24 = sphi %s2093_s24, %s2479_s24  }
   0x3   : > { %p31_p1 = scmp.ge.s32.totalorder %s29_s27, 2  ;;  %p254_p2 = scmp.lt.s32.totalorder %s2049_s26, 3 }
   0x5   : > { %s2482_s27 = smov (%p31_p1, %s29_s27), 0  ;;  %p255_p3 = pnand %p1838_p0, %p254_p2 }
   0x6   : > { %p288_p4 = scmp.lt.s32.totalorder (!%p255_p3), %s2041_s24, 1  ;;  %v2022_v2 = vld [vmem:[%s2472_s1] sm:$0xff] (!%p255_p3)   ;;  %v2024_v4 = vld [vmem:[%s2474_s3 + $0x8] sm:$0xff] (!%p255_p3)   ;;  %vm363_vm0 = vcmask (!%p255_p3), 130048   ;;  %v2025_v29 = vld [vmem:[%s2474_s3 + $0x10] sm:$0xff] (!%p255_p3)   ;;  %vm548_vm1 = vcmask (!%p255_p3), 523264  }
   0x7   : > { %258 = sbr.rel (%p255_p3) target bundleno = 968 (0x3c8), region = 48  ;;  %1953 = vmatprep.subr.bf16.mxu0 (!%p255_p3), %v2022_v2  ;;  %v2023_v3 = vld [vmem:[%s2474_s3] sm:$0xff] (!%p255_p3)   ;;  %v2026_v30 = vld [vmem:[%s2474_s3 + $0x18] sm:$0xff] (!%p255_p3)   ;;  %v695_v33 = vld [vmem:[%s2476_s5 + $0x8] sm:$0xff] (!%p255_p3) }
   0x8   : > { %1954 = vmatpush3.bf16.msra.mxu0 (!%p255_p3), %v2022_v2  ;;  %1971 = vmatprep.subr.bf16.mxu1 (!%p255_p3), %v2023_v3  ;;  %v694_v31 = vld [vmem:[%s2476_s5] sm:$0xff] (!%p255_p3)  ;;  %v699_v36 = vld [vmem:[%s2476_s5 + $0x28] sm:$0xff] (!%p255_p3) }
   0x9   : > { %1972 = vmatpush3.bf16.msra.mxu1 (!%p255_p3), %v2023_v3  ;;  %v698_v32 = vld [vmem:[%s2476_s5 + $0x20] sm:$0xff] (!%p255_p3)  ;;  %v1867_v39 = vcombine.low (!%p255_p3), %v695_v33, %v699_v36  ;;  %v1868_v40 = vcombine.high (!%p255_p3), %v695_v33, %v699_v36 }
   0xa   : > { %1973 = vmatprep.subr.bf16.mxu1 (!%p255_p3), %v2024_v4  ;;  %v1865_v34 = vcombine.low (!%p255_p3), %v694_v31, %v698_v32  ;;  %v1866_v35 = vcombine.high (!%p255_p3), %v694_v31, %v698_v32  ;;  %v702_v37 = vld [vmem:[%s2476_s5 + $0x40] sm:$0xff] (!%p255_p3) }
   0xb   : > { %v706_v38 = vld [vmem:[%s2476_s5 + $0x60] sm:$0xff] (!%p255_p3) }
   0xc   : > { %v1874_v41 = vcombine.high (!%p255_p3), %v702_v37, %v706_v38  ;;  %v710_v42 = vld [vmem:[%s2476_s5 + $0x80] sm:$0xff] (!%p255_p3)  ;;  %1078 = vmatprep.subr.bf16.mxu0 (!%p255_p3), %v1866_v35  ;;  %v1873_v44 = vcombine.low (!%p255_p3), %v702_v37, %v706_v38  ;;  %v735_v37 = vld [vmem:[%s2476_s5 + $0x148] sm:$0xff] (!%p255_p3) }
   0xd   : > { %1974 = vmatpush3.bf16.msra.mxu1 (!%p255_p3), %v2024_v4  ;;  %v714_v43 = vld [vmem:[%s2476_s5 + $0xa0] sm:$0xff] (!%p255_p3)  ;;  %v739_v38 = vld [vmem:[%s2476_s5 + $0x168] sm:$0xff] (!%p255_p3) }
   0xe   : > { %s2484_s24 = smov (!%p288_p4, %s2041_s24), 1  ;;  %1975 = vmatprep.subr.bf16.mxu1 %v2025_v29  ;;  %v1882_v45 = vcombine.high %v710_v42, %v714_v43  ;;  %v718_v46 = vld [vmem:[%s2476_s5 + $0xc0] sm:$0xff]  ;;  %v1881_v48 = vcombine.low %v710_v42, %v714_v43  ;;  %v1908_v42 = vcombine.high %v735_v37, %v739_v38  ;;  %v1907_v43 = vcombine.low %v735_v37, %v739_v38 }
   0xf   : > { %s1931_s28 = sshll.u32 %s2484_s24, 4  ;;  %v722_v47 = vld [vmem:[%s2476_s5 + $0xe0] sm:$0xff]  ;;  %s1841_s20 = sshll.u32 %s2484_s24, 3 }
  0x10   : > { %s295_s8 = scalar_lea.vmem %s2471_s0, %s1931_s28  ;;  %v1890_v49 = vcombine.high %v718_v46, %v722_v47  ;;  %v726_v50 = vld [vmem:[%s2476_s5 + $0x100] sm:$0xff]  ;;  %v1889_v52 = vcombine.low %v718_v46, %v722_v47  ;;  %s299_s23 = scalar_lea.vmem %s2478_s7, %s1841_s20 }
  0x11   : > { %v306_v0 = vld [vmem:[%s295_s8] sm:$0xff]  ;;  %v307_v1 = vld [vmem:[%s295_s8 + $0x8] sm:$0xff]  ;;  %1976 = vmatpush3.bf16.msra.mxu1 %v2025_v29 }
  0x12   : > { %308 = vxpose.xlu0.b32.start [1/2] (short) %v306_v0, 128  ;;  %1977 = vmatprep.subr.bf16.mxu1 %v2026_v30  ;;  %v730_v51 = vld [vmem:[%s2476_s5 + $0x120] sm:$0xff] }
  0x13   : > { %v1898_v53 = vcombine.high %v726_v50, %v730_v51  ;;  %v734_v54 = vld [vmem:[%s2476_s5 + $0x140] sm:$0xff]  ;;  %v1897_v56 = vcombine.low %v726_v50, %v730_v51 }
  0x14   : > { %v738_v55 = vld [vmem:[%s2476_s5 + $0x160] sm:$0xff] }
  0x15   : > { %1978 = vmatpush3.bf16.msra.mxu1 %v2026_v30  ;;  %v1906_v57 = vcombine.high %v734_v54, %v738_v55  ;;  %v1905_v58 = vcombine.low %v734_v54, %v738_v55  ;;  %v2185_v59 = vld [vmem:[%s2473_s2] ss:$0 sm:$0xff] }
  0x16   : > { %309 = vxpose.xlu0.b32.end [2/2] (short) %v307_v1, 128  ;;  %1191 = vmatprep.subr.bf16.mxu1 %v1868_v40 }
  0x92   : > { %v324_v5 = vpop.trf.xlu0 }
  0x96   : > { %v325_v6 = vpop.trf.xlu0 }
  0x97   : > { %v340_v7 = vpack.c.bf16 %v325_v6, %v324_v5 }
  0x99   : > { %1955 = vmatprep.mubr.msk.bf16.mxu0 %vm363_vm0, %v340_v7 }
  0x9a   : > { %v326_v8 = vpop.trf.xlu0 }
  0x9e   : > { %v327_v9 = vpop.trf.xlu0 }
  0x9f   : > { %v341_v10 = vpack.c.bf16 %v327_v9, %v326_v8  ;;  %v703_v8 = vld [vmem:[%s2476_s5 + $0x48] sm:$0xff] }
  0xa0   : > { %v707_v9 = vld [vmem:[%s2476_s5 + $0x68] sm:$0xff] }
  0xa1   : > { %1956 = vmatmul.mubr.msk.bf16.vlgmr.msra.gmra.mrb[0].mxu0 %vm363_vm0, %v341_v10 }
  0xa2   : > { %v328_v11 = vpop.trf.xlu0  ;;  %1079 = vmatpush1.bf16.msra.mxu0 %v1865_v34 }
  0xa3   : > { %1080 = vmatprep.subr.bf16.mxu0 %v1874_v41 }
  0xa6   : > { %v329_v12 = vpop.trf.xlu0  ;;  %1081 = vmatpush1.bf16.msra.mxu0 %v1873_v44 }
  0xa7   : > { %v342_v13 = vpack.c.bf16 %v329_v12, %v328_v11  ;;  %1082 = vmatprep.subr.bf16.mxu0 %v1882_v45  ;;  %v1876_v12 = vcombine.high %v703_v8, %v707_v9 }
  0xa9   : > { %1959 = vmatprep.mubr.msk.bf16.mxu0 %vm363_vm0, %v342_v13  ;;  %v711_v13 = vld [vmem:[%s2476_s5 + $0x88] sm:$0xff] }
  0xaa   : > { %v330_v14 = vpop.trf.xlu0  ;;  %1083 = vmatpush1.bf16.msra.mxu0 %v1881_v48 }
  0xab   : > { %1084 = vmatprep.subr.bf16.mxu0 %v1890_v49 }
  0xae   : > { %v331_v15 = vpop.trf.xlu0  ;;  %1085 = vmatpush1.bf16.msra.mxu0 %v1889_v52 }
  0xaf   : > { %v343_v16 = vpack.c.bf16 %v331_v15, %v330_v14  ;;  %1086 = vmatprep.subr.bf16.mxu0 %v1898_v53  ;;  %v715_v14 = vld [vmem:[%s2476_s5 + $0xa8] sm:$0xff]  ;;  %v1875_v15 = vcombine.low %v703_v8, %v707_v9  ;;  %v742_v9 = vld [vmem:[%s2476_s5 + $0x180] sm:$0xff] }
  0xb1   : > { %1960 = vmatmul.mubr.msk.bf16.gmra.mrb[4].mxu0 %vm363_vm0, %v343_v16  ;;  %v1884_v16 = vcombine.high %v711_v13, %v715_v14 }
  0xb2   : > { %v332_v17 = vpop.trf.xlu0  ;;  %1087 = vmatpush1.bf16.msra.mxu0 %v1897_v56 }
  0xb3   : > { %1088 = vmatprep.subr.bf16.mxu0 %v1906_v57 }
  0xb6   : > { %v333_v18 = vpop.trf.xlu0  ;;  %1089 = vmatpush1.bf16.msra.mxu0 %v1905_v58 }
  0xb7   : > { %v344_v19 = vpack.c.bf16 %v333_v18, %v332_v17  ;;  %v719_v17 = vld [vmem:[%s2476_s5 + $0xc8] sm:$0xff] }
  0xb8   : > { %v723_v18 = vld [vmem:[%s2476_s5 + $0xe8] sm:$0xff] }
  0xb9   : > { %1963 = vmatprep.mubr.msk.bf16.mxu0 %vm363_vm0, %v344_v19  ;;  %v1891_v31 = vcombine.low %v719_v17, %v723_v18 }
  0xba   : > { %v334_v20 = vpop.trf.xlu0 }
  0xbe   : > { %v335_v21 = vpop.trf.xlu0 }
  0xbf   : > { %v345_v22 = vpack.c.bf16 %v335_v21, %v334_v20  ;;  %v1883_v20 = vcombine.low %v711_v13, %v715_v14 }
  0xc1   : > { %1964 = vmatmul.mubr.msk.bf16.gmra.mrb[8].mxu0 %vm363_vm0, %v345_v22 }
  0xc2   : > { %v336_v23 = vpop.trf.xlu0 }
  0xc6   : > { %v337_v24 = vpop.trf.xlu0 }
  0xc7   : > { %v346_v25 = vpack.c.bf16 %v337_v24, %v336_v23  ;;  %v1892_v23 = vcombine.high %v719_v17, %v723_v18  ;;  %v754_v17 = vld [vmem:[%s2476_s5 + $0x1e0] sm:$0xff]  ;;  %v751_v18 = vld [vmem:[%s2476_s5 + $0x1c8] sm:$0xff] }
  0xc9   : > { %1967 = vmatprep.mubr.msk.bf16.mxu0 %vm363_vm0, %v346_v25 }
  0xca   : > { %v338_v26 = vpop.trf.xlu0 }
  0xce   : > { %v339_v27 = vpop.trf.xlu0 }
  0xcf   : > { %v347_v28 = vpack.c.bf16 %v339_v27, %v338_v26  ;;  %v727_v26 = vld [vmem:[%s2476_s5 + $0x108] sm:$0xff] }
  0xd0   : > { %v731_v27 = vld [vmem:[%s2476_s5 + $0x128] sm:$0xff] }
  0xd1   : > { %1968 = vmatmul.mubr.msk.bf16.gmra.mrb[12].mxu0 %vm363_vm0, %v347_v28  ;;  %v1900_v34 = vcombine.high %v727_v26, %v731_v27  ;;  %v1899_v41 = vcombine.low %v727_v26, %v731_v27  ;;  %v697_v26 = vld [vmem:[%s2476_s5 + $0x18] sm:$0xff]  ;;  %v2051_v27 = vmov 0  }
  0xd2   : > { %1110 = vmatprep.mubr.bf16.mxu0 %v2051_v27 }
 0x174   : > { %v1957_v60 = vpop.f32.mrb[0].mxu0 }
 0x175   : > { %v431_v61 = vadd.f32 %v1957_v60, %v2185_v59  ;;  %v422_v62 = vpop.f32.mrb[1].mxu0 }
 0x176   : > { %v423_v63 = vadd.f32 %v2185_v59, %v422_v62  ;;  %v1958_v0 = vpop.f32.mrb[2].mxu0 }
 0x177   : > { %v434_v1 = vadd.f32 %v1958_v0, %v2185_v59  ;;  %v425_v2 = vpop.f32.mrb[3].mxu0  ;;  %v487_v4 = vmax.f32 %v431_v61, 0.0 }
 0x178   : > { %v426_v3 = vadd.f32 %v2185_v59, %v425_v2  ;;  %v485_v6 = vmax.f32 %v423_v63, 0.0 }
 0x179   : > { %v488_v5 = vmax.f32 %v434_v1, 0.0 }
 0x17a   : > { %v486_v7 = vmax.f32 %v426_v3, 0.0 }
 0x17b   : > { %v502_v10 = vpack.c.bf16 %v488_v5, %v487_v4 }
 0x17c   : > { %v501_v11 = vpack.c.bf16 %v486_v7, %v485_v6 }
 0x17e   : > { %1979 = vmatprep.mubr.msk.bf16.mxu1 %vm548_vm1, %v501_v11 }
 0x17f   : > { %1980 = vmatmul.mubr.msk.bf16.vlgmr.msra.gmra.mrb[0].mxu1 %vm548_vm1, %v502_v10  ;;  %v746_v10 = vld [vmem:[%s2476_s5 + $0x1a0] sm:$0xff] }
 0x180   : > { %1192 = vmatpush1.bf16.msra.mxu1 %v1867_v39  ;;  %v1914_v11 = vcombine.high %v742_v9, %v746_v10  ;;  %v1913_v13 = vcombine.low %v742_v9, %v746_v10  ;;  %v728_v10 = vld [vmem:[%s2476_s5 + $0x110] sm:$0xff] }
 0x181   : > { %1193 = vmatprep.subr.bf16.mxu1 %v1876_v12  ;;  %v747_v12 = vld [vmem:[%s2476_s5 + $0x1a8] sm:$0xff] }
 0x182   : > { %1090 = vmatprep.subr.bf16.mxu0 %v1914_v11 }
 0x183   : > { %1091 = vmatpush1.bf16.msra.mxu0 %v1913_v13  ;;  %v729_v13 = vld [vmem:[%s2476_s5 + $0x118] sm:$0xff] }
 0x184   : > { %v1961_v19 = vpop.f32.mrb[4].mxu0  ;;  %1194 = vmatpush1.bf16.msra.mxu1 %v1875_v15 }
 0x185   : > { %v447_v21 = vadd.f32 %v1961_v19, %v2185_v59  ;;  %v438_v22 = vpop.f32.mrb[5].mxu0  ;;  %1195 = vmatprep.subr.bf16.mxu1 %v1884_v16  ;;  %v750_v16 = vld [vmem:[%s2476_s5 + $0x1c0] sm:$0xff] }
 0x186   : > { %v439_v24 = vadd.f32 %v2185_v59, %v438_v22  ;;  %v1962_v25 = vpop.f32.mrb[6].mxu0  ;;  %v1922_v19 = vcombine.high %v750_v16, %v754_v17 }
 0x187   : > { %v450_v28 = vadd.f32 %v1962_v25, %v2185_v59  ;;  %v441_v29 = vpop.f32.mrb[7].mxu0  ;;  %v491_v32 = vmax.f32 %v447_v21, 0.0  ;;  %v1921_v21 = vcombine.low %v750_v16, %v754_v17  ;;  %v700_v25 = vld [vmem:[%s2476_s5 + $0x30] sm:$0xff] }
 0x188   : > { %v442_v30 = vadd.f32 %v2185_v59, %v441_v29  ;;  %1196 = vmatpush1.bf16.msra.mxu1 %v1883_v20  ;;  %v489_v35 = vmax.f32 %v439_v24, 0.0  ;;  %v755_v20 = vld [vmem:[%s2476_s5 + $0x1e8] sm:$0xff]  ;;  %1092 = vmatprep.subr.bf16.mxu0 %v1922_v19  ;;  %v696_v24 = vld [vmem:[%s2476_s5 + $0x10] sm:$0xff] }
 0x189   : > { %v492_v33 = vmax.f32 %v450_v28, 0.0  ;;  %1197 = vmatprep.subr.bf16.mxu1 %v1892_v23  ;;  %v1923_v22 = vcombine.low %v751_v18, %v755_v20  ;;  %v1924_v23 = vcombine.high %v751_v18, %v755_v20  ;;  %1093 = vmatpush1.bf16.msra.mxu0 %v1921_v21  ;;  %v1869_v28 = vcombine.low %v696_v24, %v700_v25 }
 0x18a   : > { %v490_v36 = vmax.f32 %v442_v30, 0.0  ;;  %v1870_v29 = vcombine.high %v696_v24, %v700_v25  ;;  %v701_v30 = vld [vmem:[%s2476_s5 + $0x38] sm:$0xff]  ;;  %v736_v24 = vld [vmem:[%s2476_s5 + $0x150] sm:$0xff] }
 0x18b   : > { %v504_v39 = vpack.c.bf16 %v492_v33, %v491_v32  ;;  %v1872_v32 = vcombine.high %v697_v26, %v701_v30  ;;  %v2282_v33 = vld [vmem:[%s2475_s4] ss:$0 sm:$0xff] }
 0x18c   : > { %v503_v40 = vpack.c.bf16 %v490_v36, %v489_v35  ;;  %1198 = vmatpush1.bf16.msra.mxu1 %v1891_v31  ;;  %v1871_v31 = vcombine.low %v697_v26, %v701_v30  ;;  %1304 = vmatprep.subr.bf16.mxu0 %v1870_v29  ;;  %v737_v29 = vld [vmem:[%s2476_s5 + $0x158] sm:$0xff] }
 0x18d   : > { %1199 = vmatprep.subr.bf16.mxu1 %v1900_v34  ;;  %v741_v30 = vld [vmem:[%s2476_s5 + $0x178] sm:$0xff] }
 0x18e   : > { %1983 = vmatprep.mubr.msk.bf16.mxu1 %vm548_vm1, %v503_v40 }
 0x18f   : > { %1984 = vmatmul.mubr.msk.bf16.gmra.mrb[4].mxu1 %vm548_vm1, %v504_v39 }
 0x190   : > { %1200 = vmatpush1.bf16.msra.mxu1 %v1899_v41 }
 0x191   : > { %1201 = vmatprep.subr.bf16.mxu1 %v1908_v42 }
 0x194   : > { %v1965_v44 = vpop.f32.mrb[8].mxu0  ;;  %1202 = vmatpush1.bf16.msra.mxu1 %v1907_v43 }
 0x195   : > { %v463_v45 = vadd.f32 %v1965_v44, %v2185_v59  ;;  %v454_v46 = vpop.f32.mrb[9].mxu0  ;;  %v704_v44 = vld [vmem:[%s2476_s5 + $0x50] sm:$0xff] }
 0x196   : > { %v455_v47 = vadd.f32 %v2185_v59, %v454_v46  ;;  %v1966_v48 = vpop.f32.mrb[10].mxu0 }
 0x197   : > { %v466_v49 = vadd.f32 %v1966_v48, %v2185_v59  ;;  %v457_v50 = vpop.f32.mrb[11].mxu0  ;;  %v495_v52 = vmax.f32 %v463_v45, 0.0  ;;  %v705_v48 = vld [vmem:[%s2476_s5 + $0x58] sm:$0xff] }
 0x198   : > { %v458_v51 = vadd.f32 %v2185_v59, %v457_v50  ;;  %v493_v54 = vmax.f32 %v455_v47, 0.0  ;;  %v708_v47 = vld [vmem:[%s2476_s5 + $0x70] sm:$0xff] }
 0x199   : > { %v496_v53 = vmax.f32 %v466_v49, 0.0  ;;  %v709_v49 = vld [vmem:[%s2476_s5 + $0x78] sm:$0xff] }
 0x19a   : > { %v494_v55 = vmax.f32 %v458_v51, 0.0 }
 0x19b   : > { %v506_v56 = vpack.c.bf16 %v496_v53, %v495_v52  ;;  %v712_v52 = vld [vmem:[%s2476_s5 + $0x90] sm:$0xff]  ;;  %v1878_v53 = vcombine.high %v704_v44, %v708_v47 }
 0x19c   : > { %v505_v57 = vpack.c.bf16 %v494_v55, %v493_v54  ;;  %v1880_v54 = vcombine.high %v705_v48, %v709_v49  ;;  %v716_v55 = vld [vmem:[%s2476_s5 + $0xb0] sm:$0xff] }
 0x19e   : > { %1987 = vmatprep.mubr.msk.bf16.mxu1 %vm548_vm1, %v505_v57  ;;  %v717_v57 = vld [vmem:[%s2476_s5 + $0xb8] sm:$0xff] }
 0x19f   : > { %1988 = vmatmul.mubr.msk.bf16.gmra.mrb[8].mxu1 %vm548_vm1, %v506_v56  ;;  %v713_v56 = vld [vmem:[%s2476_s5 + $0x98] sm:$0xff] }
 0x1a4   : > { %v1969_v58 = vpop.f32.mrb[12].mxu0 }
 0x1a5   : > { %v479_v60 = vadd.f32 %v1969_v58, %v2185_v59  ;;  %v470_v61 = vpop.f32.mrb[13].mxu0  ;;  %v1877_v58 = vcombine.low %v704_v44, %v708_v47  ;;  %v756_v47 = vld [vmem:[%s2476_s5 + $0x1f0] sm:$0xff] }
 0x1a6   : > { %v471_v62 = vadd.f32 %v2185_v59, %v470_v61  ;;  %v1970_v63 = vpop.f32.mrb[14].mxu0  ;;  %v1886_v61 = vcombine.high %v712_v52, %v716_v55 }
 0x1a7   : > { %v482_v0 = vadd.f32 %v1970_v63, %v2185_v59  ;;  %v473_v1 = vpop.f32.mrb[15].mxu0  ;;  %v499_v3 = vmax.f32 %v479_v60, 0.0  ;;  %v1879_v60 = vcombine.low %v705_v48, %v709_v49  ;;  %v720_v63 = vld [vmem:[%s2476_s5 + $0xd0] sm:$0xff]  ;;  %v753_v48 = vld [vmem:[%s2476_s5 + $0x1d8] sm:$0xff] }
 0x1a8   : > { %v474_v2 = vadd.f32 %v2185_v59, %v473_v1  ;;  %v497_v5 = vmax.f32 %v471_v62, 0.0  ;;  %v743_v59 = vld [vmem:[%s2476_s5 + $0x188] sm:$0xff]  ;;  %v1888_v62 = vcombine.high %v713_v56, %v717_v57  ;;  %v721_v1 = vld [vmem:[%s2476_s5 + $0xd8] sm:$0xff] }
 0x1a9   : > { %v500_v4 = vmax.f32 %v482_v0, 0.0  ;;  %v1915_v14 = vcombine.low %v743_v59, %v747_v12  ;;  %v1916_v15 = vcombine.high %v743_v59, %v747_v12  ;;  %v724_v0 = vld [vmem:[%s2476_s5 + $0xf0] sm:$0xff]  ;;  %v757_v49 = vld [vmem:[%s2476_s5 + $0x1f8] sm:$0xff] }
 0x1aa   : > { %v498_v6 = vmax.f32 %v474_v2, 0.0  ;;  %v725_v2 = vld [vmem:[%s2476_s5 + $0xf8] sm:$0xff]  ;;  %v732_v12 = vld [vmem:[%s2476_s5 + $0x130] sm:$0xff]  ;;  %v1893_v18 = vcombine.low %v720_v63, %v724_v0 }
 0x1ab   : > { %v508_v7 = vpack.c.bf16 %v500_v4, %v499_v3  ;;  %1203 = vmatprep.subr.bf16.mxu1 %v1916_v15  ;;  %v1885_v4 = vcombine.low %v712_v52, %v716_v55  ;;  %v1896_v9 = vcombine.high %v721_v1, %v725_v2  ;;  %v1895_v19 = vcombine.low %v721_v1, %v725_v2 }
 0x1ac   : > { %v507_v8 = vpack.c.bf16 %v498_v6, %v497_v5  ;;  %1204 = vmatpush1.bf16.msra.mxu1 %v1915_v14  ;;  %v1887_v5 = vcombine.low %v713_v56, %v717_v57  ;;  %v733_v14 = vld [vmem:[%s2476_s5 + $0x138] sm:$0xff]  ;;  %v1927_v2 = vcombine.low %v753_v48, %v757_v49 }
 0x1ad   : > { %1205 = vmatprep.subr.bf16.mxu1 %v1924_v23  ;;  %v1904_v23 = vcombine.high %v729_v13, %v733_v14 }
 0x1ae   : > { %1991 = vmatprep.mubr.msk.bf16.mxu1 %vm548_vm1, %v507_v8  ;;  %v1894_v8 = vcombine.high %v720_v63, %v724_v0 }
 0x1af   : > { %1992 = vmatmul.mubr.msk.bf16.gmra.mrb[12].mxu1 %vm548_vm1, %v508_v7 }
 0x1b0   : > { %1206 = vmatpush1.bf16.msra.mxu1 %v1923_v22  ;;  %1223 = vmatprep.mubr.bf16.mxu1 %v2051_v27  ;;  %v1902_v22 = vcombine.high %v728_v10, %v732_v12 }
 0x1b1   : > { %1417 = vmatprep.subr.bf16.mxu1 %v1872_v32 }
 0x252   : > { %v1981_v34 = vpop.f32.mrb[0].mxu1 }
 0x253   : > { %v616_v35 = vadd.f32 %v1981_v34, %v2282_v33  ;;  %v607_v36 = vpop.f32.mrb[1].mxu1  ;;  %v1901_v34 = vcombine.low %v728_v10, %v732_v12 }
 0x254   : > { %v608_v37 = vadd.f32 %v2282_v33, %v607_v36  ;;  %v1982_v38 = vpop.f32.mrb[2].mxu1 }
 0x255   : > { %v619_v39 = vadd.f32 %v1982_v38, %v2282_v33  ;;  %v610_v40 = vpop.f32.mrb[3].mxu1  ;;  %v672_v42 = vmax.f32 %v616_v35, 0.0  ;;  %v1903_v35 = vcombine.low %v729_v13, %v733_v14  ;;  %v744_v38 = vld [vmem:[%s2476_s5 + $0x190] sm:$0xff] }
 0x256   : > { %v611_v41 = vadd.f32 %v2282_v33, %v610_v40  ;;  %v670_v45 = vmax.f32 %v608_v37, 0.0  ;;  %v1912_v37 = vcombine.high %v737_v29, %v741_v30  ;;  %v745_v40 = vld [vmem:[%s2476_s5 + $0x198] sm:$0xff] }
 0x257   : > { %v673_v43 = vmax.f32 %v619_v39, 0.0  ;;  %v748_v39 = vld [vmem:[%s2476_s5 + $0x1b0] sm:$0xff] }
 0x258   : > { %v671_v46 = vmax.f32 %v611_v41, 0.0  ;;  %v749_v41 = vld [vmem:[%s2476_s5 + $0x1b8] sm:$0xff]  ;;  %v1918_v44 = vcombine.high %v744_v38, %v748_v39 }
 0x259   : > { %v2300_v50 = vpack.c.bf16 %v673_v43, %v672_v42  ;;  %v1911_v43 = vcombine.low %v737_v29, %v741_v30 }
 0x25a   : > { %v2302_v51 = vpack.c.bf16 %v671_v46, %v670_v45  ;;  %v1920_v45 = vcombine.high %v745_v40, %v749_v41  ;;  %v752_v46 = vld [vmem:[%s2476_s5 + $0x1d0] sm:$0xff] }
 0x25b   : > { %v1926_v57 = vcombine.high %v752_v46, %v756_v47  ;;  %v1925_v1 = vcombine.low %v752_v46, %v756_v47 }
 0x25c   : > { %1111 = vmatmul.mubr.bf16.vlgmr.msra.gmra.mrb[16].mxu0 %v2302_v51  ;;  %1224 = vmatmul.mubr.bf16.vlgmr.msra.gmra.mrb[16].mxu1 %v2302_v51 }
 0x25d   : > { %1305 = vmatpush1.bf16.msra.mxu0 %v1869_v28  ;;  %1418 = vmatpush1.bf16.msra.mxu1 %v1871_v31  ;;  %v740_v28 = vld [vmem:[%s2476_s5 + $0x170] sm:$0xff] }
 0x25e   : > { %1120 = vmatprep.mubr.bf16.mxu0 %v2051_v27  ;;  %1233 = vmatprep.mubr.bf16.mxu1 %v2051_v27  ;;  %v1910_v36 = vcombine.high %v736_v24, %v740_v28  ;;  %v1909_v42 = vcombine.low %v736_v24, %v740_v28 }
 0x25f   : > { %1306 = vmatprep.subr.bf16.mxu0 %v1878_v53  ;;  %1419 = vmatprep.subr.bf16.mxu1 %v1880_v54  ;;  %v1917_v53 = vcombine.low %v744_v38, %v748_v39  ;;  %v1919_v54 = vcombine.low %v745_v40, %v749_v41 }
 0x261   : > { %1307 = vmatpush1.bf16.msra.mxu0 %v1877_v58  ;;  %1420 = vmatpush1.bf16.msra.mxu1 %v1879_v60  ;;  %v1928_v58 = vcombine.high %v753_v48, %v757_v49 }
 0x262   : > { %v1985_v3 = vpop.f32.mrb[4].mxu1  ;;  %1308 = vmatprep.subr.bf16.mxu0 %v1886_v61  ;;  %1421 = vmatprep.subr.bf16.mxu1 %v1888_v62 }
 0x263   : > { %v632_v6 = vadd.f32 %v1985_v3, %v2282_v33  ;;  %v623_v7 = vpop.f32.mrb[5].mxu1 }
 0x264   : > { %v624_v59 = vadd.f32 %v2282_v33, %v623_v7  ;;  %v1986_v11 = vpop.f32.mrb[6].mxu1  ;;  %1121 = vmatmul.mubr.bf16.gmra.mrb[20].mxu0 %v2300_v50  ;;  %1234 = vmatmul.mubr.bf16.gmra.mrb[20].mxu1 %v2300_v50 }
 0x265   : > { %v635_v15 = vadd.f32 %v1986_v11, %v2282_v33  ;;  %v626_v16 = vpop.f32.mrb[7].mxu1  ;;  %1130 = vmatprep.mubr.bf16.mxu0 %v2051_v27  ;;  %1243 = vmatprep.mubr.bf16.mxu1 %v2051_v27  ;;  %v676_v20 = vmax.f32 %v632_v6, 0.0 }
 0x266   : > { %v627_v17 = vadd.f32 %v2282_v33, %v626_v16  ;;  %1309 = vmatpush1.bf16.msra.mxu0 %v1885_v4  ;;  %1422 = vmatpush1.bf16.msra.mxu1 %v1887_v5  ;;  %v674_v25 = vmax.f32 %v624_v59, 0.0 }
 0x267   : > { %v677_v21 = vmax.f32 %v635_v15, 0.0  ;;  %1310 = vmatprep.subr.bf16.mxu0 %v1894_v8  ;;  %1423 = vmatprep.subr.bf16.mxu1 %v1896_v9 }
 0x268   : > { %v675_v26 = vmax.f32 %v627_v17, 0.0 }
 0x269   : > { %v2364_v31 = vpack.c.bf16 %v677_v21, %v676_v20 }
 0x26a   : > { %v2366_v32 = vpack.c.bf16 %v675_v26, %v674_v25  ;;  %1311 = vmatpush1.bf16.msra.mxu0 %v1893_v18  ;;  %1424 = vmatpush1.bf16.msra.mxu1 %v1895_v19 }
 0x26b   : > { %1312 = vmatprep.subr.bf16.mxu0 %v1902_v22  ;;  %1425 = vmatprep.subr.bf16.mxu1 %v1904_v23 }
 0x26c   : > { %1131 = vmatmul.mubr.bf16.gmra.mrb[24].mxu0 %v2366_v32  ;;  %1244 = vmatmul.mubr.bf16.gmra.mrb[24].mxu1 %v2366_v32 }
 0x26d   : > { %1140 = vmatprep.mubr.bf16.mxu0 %v2051_v27  ;;  %1253 = vmatprep.mubr.bf16.mxu1 %v2051_v27 }
 0x26e   : > { %1313 = vmatpush1.bf16.msra.mxu0 %v1901_v34  ;;  %1426 = vmatpush1.bf16.msra.mxu1 %v1903_v35 }
 0x26f   : > { %1314 = vmatprep.subr.bf16.mxu0 %v1910_v36  ;;  %1427 = vmatprep.subr.bf16.mxu1 %v1912_v37 }
 0x272   : > { %v1989_v52 = vpop.f32.mrb[8].mxu1  ;;  %1315 = vmatpush1.bf16.msra.mxu0 %v1909_v42  ;;  %1428 = vmatpush1.bf16.msra.mxu1 %v1911_v43 }
 0x273   : > { %v648_v55 = vadd.f32 %v1989_v52, %v2282_v33  ;;  %v639_v56 = vpop.f32.mrb[9].mxu1  ;;  %1316 = vmatprep.subr.bf16.mxu0 %v1918_v44  ;;  %1429 = vmatprep.subr.bf16.mxu1 %v1920_v45 }
 0x274   : > { %v640_v60 = vadd.f32 %v2282_v33, %v639_v56  ;;  %v1990_v61 = vpop.f32.mrb[10].mxu1  ;;  %1141 = vmatmul.mubr.bf16.gmra.mrb[28].mxu0 %v2364_v31  ;;  %1254 = vmatmul.mubr.bf16.gmra.mrb[28].mxu1 %v2364_v31 }
 0x275   : > { %v651_v62 = vadd.f32 %v1990_v61, %v2282_v33  ;;  %v642_v63 = vpop.f32.mrb[11].mxu1  ;;  %1150 = vmatprep.mubr.bf16.mxu0 %v2051_v27  ;;  %1263 = vmatprep.mubr.bf16.mxu1 %v2051_v27  ;;  %v680_v3 = vmax.f32 %v648_v55, 0.0 }
 0x276   : > { %v643_v0 = vadd.f32 %v2282_v33, %v642_v63  ;;  %1317 = vmatpush1.bf16.msra.mxu0 %v1917_v53  ;;  %1430 = vmatpush1.bf16.msra.mxu1 %v1919_v54  ;;  %v678_v5 = vmax.f32 %v640_v60, 0.0 }
 0x277   : > { %v681_v4 = vmax.f32 %v651_v62, 0.0  ;;  %1318 = vmatprep.subr.bf16.mxu0 %v1926_v57  ;;  %1431 = vmatprep.subr.bf16.mxu1 %v1928_v58 }
 0x278   : > { %v679_v6 = vmax.f32 %v643_v0, 0.0 }
 0x279   : > { %v691_v7 = vpack.c.bf16 %v681_v4, %v680_v3 }
 0x27a   : > { %v690_v8 = vpack.c.bf16 %v679_v6, %v678_v5  ;;  %1319 = vmatpush1.bf16.msra.mxu0 %v1925_v1  ;;  %1432 = vmatpush1.bf16.msra.mxu1 %v1927_v2 }
 0x27c   : > { %1151 = vmatmul.mubr.bf16.gmra.mrb[32].mxu0 %v690_v8  ;;  %1264 = vmatmul.mubr.bf16.gmra.mrb[32].mxu1 %v690_v8 }
 0x27d   : > { %1160 = vmatprep.mubr.bf16.mxu0 %v2051_v27  ;;  %1273 = vmatprep.mubr.bf16.mxu1 %v2051_v27 }
 0x282   : > { %v1993_v9 = vpop.f32.mrb[12].mxu1 }
 0x283   : > { %v664_v10 = vadd.f32 %v1993_v9, %v2282_v33  ;;  %v655_v59 = vpop.f32.mrb[13].mxu1 }
 0x284   : > { %v656_v11 = vadd.f32 %v2282_v33, %v655_v59  ;;  %v1994_v12 = vpop.f32.mrb[14].mxu1  ;;  %1161 = vmatmul.mubr.bf16.gmra.mrb[36].mxu0 %v691_v7  ;;  %1274 = vmatmul.mubr.bf16.gmra.mrb[36].mxu1 %v691_v7 }
 0x285   : > { %v667_v13 = vadd.f32 %v1994_v12, %v2282_v33  ;;  %v658_v14 = vpop.f32.mrb[15].mxu1  ;;  %1170 = vmatprep.mubr.bf16.mxu0 %v2051_v27  ;;  %1283 = vmatprep.mubr.bf16.mxu1 %v2051_v27  ;;  %v684_v16 = vmax.f32 %v664_v10, 0.0 }
 0x286   : > { %v659_v15 = vadd.f32 %v2282_v33, %v658_v14  ;;  %v682_v18 = vmax.f32 %v656_v11, 0.0 }
 0x287   : > { %v685_v17 = vmax.f32 %v667_v13, 0.0 }
 0x288   : > { %v683_v19 = vmax.f32 %v659_v15, 0.0 }
 0x289   : > { %v693_v20 = vpack.c.bf16 %v685_v17, %v684_v16 }
 0x28a   : > { %v692_v21 = vpack.c.bf16 %v683_v19, %v682_v18 }
 0x28c   : > { %1171 = vmatmul.mubr.bf16.gmra.mrb[40].mxu0 %v692_v21  ;;  %1284 = vmatmul.mubr.bf16.gmra.mrb[40].mxu1 %v692_v21 }
 0x28d   : > { %1180 = vmatprep.mubr.bf16.mxu0 %v2051_v27  ;;  %1293 = vmatprep.mubr.bf16.mxu1 %v2051_v27 }
 0x294   : > { %1181 = vmatmul.mubr.bf16.gmra.mrb[44].mxu0 %v693_v20  ;;  %1294 = vmatmul.mubr.bf16.gmra.mrb[44].mxu1 %v693_v20 }
 0x295   : > { %1336 = vmatprep.mubr.bf16.mxu0 %v2051_v27  ;;  %1449 = vmatprep.mubr.bf16.mxu1 %v2051_v27 }
 0x29c   : > { %1337 = vmatmul.mubr.bf16.vlgmr.msra.gmra.mrb[48].mxu0 %v2302_v51  ;;  %1450 = vmatmul.mubr.bf16.vlgmr.msra.gmra.mrb[48].mxu1 %v2302_v51 }
 0x29d   : > { %1346 = vmatprep.mubr.bf16.mxu0 %v2051_v27  ;;  %1459 = vmatprep.mubr.bf16.mxu1 %v2051_v27 }
 0x2a4   : > { %1347 = vmatmul.mubr.bf16.gmra.mrb[52].mxu0 %v2300_v50  ;;  %1460 = vmatmul.mubr.bf16.gmra.mrb[52].mxu1 %v2300_v50 }
 0x2a5   : > { %1356 = vmatprep.mubr.bf16.mxu0 %v2051_v27  ;;  %1469 = vmatprep.mubr.bf16.mxu1 %v2051_v27 }
 0x2ac   : > { %1357 = vmatmul.mubr.bf16.gmra.mrb[56].mxu0 %v2366_v32  ;;  %1470 = vmatmul.mubr.bf16.gmra.mrb[56].mxu1 %v2366_v32 }
 0x2ad   : > { %1366 = vmatprep.mubr.bf16.mxu0 %v2051_v27  ;;  %1479 = vmatprep.mubr.bf16.mxu1 %v2051_v27 }
 0x2b4   : > { %1367 = vmatmul.mubr.bf16.gmra.mrb[60].mxu0 %v2364_v31  ;;  %1480 = vmatmul.mubr.bf16.gmra.mrb[60].mxu1 %v2364_v31 }
 0x2b5   : > { %1376 = vmatprep.mubr.bf16.mxu0 %v2051_v27  ;;  %1489 = vmatprep.mubr.bf16.mxu1 %v2051_v27 }
 0x2bc   : > { %1377 = vmatmul.mubr.bf16.gmra.mrb[64].mxu0 %v690_v8  ;;  %1490 = vmatmul.mubr.bf16.gmra.mrb[64].mxu1 %v690_v8 }
 0x2bd   : > { %1386 = vmatprep.mubr.bf16.mxu0 %v2051_v27  ;;  %1499 = vmatprep.mubr.bf16.mxu1 %v2051_v27 }
 0x2c4   : > { %1387 = vmatmul.mubr.bf16.gmra.mrb[68].mxu0 %v691_v7  ;;  %1500 = vmatmul.mubr.bf16.gmra.mrb[68].mxu1 %v691_v7 }
 0x2c5   : > { %1396 = vmatprep.mubr.bf16.mxu0 %v2051_v27  ;;  %1509 = vmatprep.mubr.bf16.mxu1 %v2051_v27 }
 0x2cc   : > { %1397 = vmatmul.mubr.bf16.gmra.mrb[72].mxu0 %v692_v21  ;;  %1510 = vmatmul.mubr.bf16.gmra.mrb[72].mxu1 %v692_v21 }
 0x2cd   : > { %1406 = vmatprep.mubr.bf16.mxu0 %v2051_v27  ;;  %1519 = vmatprep.mubr.bf16.mxu1 %v2051_v27 }
 0x2d4   : > { %1407 = vmatmul.mubr.bf16.gmra.mrb[76].mxu0 %v693_v20  ;;  %1520 = vmatmul.mubr.bf16.gmra.mrb[76].mxu1 %v693_v20 }
 0x32f   : > { %v1112_v33 = vpop.f32.mrb[16].mxu0  ;;  %v1225_v50 = vpop.f32.mrb[16].mxu1 }
 0x330   : > { %v1114_v51 = vpop.f32.mrb[17].mxu0  ;;  %v1227_v22 = vpop.f32.mrb[17].mxu1 }
 0x331   : > { %v1116_v23 = vpop.f32.mrb[18].mxu0  ;;  %v1229_v24 = vpop.f32.mrb[18].mxu1 }
 0x332   : > { %v1531_v25 = vmax.f32 %v1112_v33, %v1116_v23  ;;  %v1573_v26 = vmax.f32 %v1225_v50, %v1229_v24  ;;  %v1118_v28 = vpop.f32.mrb[19].mxu0  ;;  %v1231_v29 = vpop.f32.mrb[19].mxu1 }
 0x333   : > { %v1552_v30 = vmax.f32 %v1114_v51, %v1118_v28  ;;  %v1594_v31 = vmax.f32 %v1227_v22, %v1231_v29 }
 0x337   : > { %v1122_v32 = vpop.f32.mrb[20].mxu0  ;;  %v1235_v34 = vpop.f32.mrb[20].mxu1 }
 0x338   : > { %v1532_v35 = vmax.f32 %v1531_v25, %v1122_v32  ;;  %v1574_v36 = vmax.f32 %v1573_v26, %v1235_v34  ;;  %v1124_v37 = vpop.f32.mrb[21].mxu0  ;;  %v1237_v27 = vpop.f32.mrb[21].mxu1 }
 0x339   : > { %v1553_v38 = vmax.f32 %v1552_v30, %v1124_v37  ;;  %v1595_v39 = vmax.f32 %v1594_v31, %v1237_v27  ;;  %v1126_v40 = vpop.f32.mrb[22].mxu0  ;;  %v1239_v41 = vpop.f32.mrb[22].mxu1 }
 0x33a   : > { %v1533_v42 = vmax.f32 %v1532_v35, %v1126_v40  ;;  %v1575_v43 = vmax.f32 %v1574_v36, %v1239_v41  ;;  %v1128_v44 = vpop.f32.mrb[23].mxu0  ;;  %v1241_v45 = vpop.f32.mrb[23].mxu1 }
 0x33b   : > { %v1554_v46 = vmax.f32 %v1553_v38, %v1128_v44  ;;  %v1596_v47 = vmax.f32 %v1595_v39, %v1241_v45 }
 0x33f   : > { %v1132_v48 = vpop.f32.mrb[24].mxu0  ;;  %v1245_v49 = vpop.f32.mrb[24].mxu1 }
 0x340   : > { %v1534_v52 = vmax.f32 %v1533_v42, %v1132_v48  ;;  %v1576_v53 = vmax.f32 %v1575_v43, %v1245_v49  ;;  %v1134_v54 = vpop.f32.mrb[25].mxu0  ;;  %v1247_v55 = vpop.f32.mrb[25].mxu1 }
 0x341   : > { %v1555_v56 = vmax.f32 %v1554_v46, %v1134_v54  ;;  %v1597_v57 = vmax.f32 %v1596_v47, %v1247_v55  ;;  %v1136_v58 = vpop.f32.mrb[26].mxu0  ;;  %v1249_v60 = vpop.f32.mrb[26].mxu1 }
 0x342   : > { %v1535_v61 = vmax.f32 %v1534_v52, %v1136_v58  ;;  %v1577_v62 = vmax.f32 %v1576_v53, %v1249_v60  ;;  %v1138_v63 = vpop.f32.mrb[27].mxu0  ;;  %v1251_v0 = vpop.f32.mrb[27].mxu1 }
 0x343   : > { %v1556_v1 = vmax.f32 %v1555_v56, %v1138_v63  ;;  %v1598_v2 = vmax.f32 %v1597_v57, %v1251_v0 }
 0x347   : > { %v1142_v3 = vpop.f32.mrb[28].mxu0  ;;  %v1255_v4 = vpop.f32.mrb[28].mxu1 }
 0x348   : > { %v1536_v5 = vmax.f32 %v1535_v61, %v1142_v3  ;;  %v1578_v6 = vmax.f32 %v1577_v62, %v1255_v4  ;;  %v1144_v7 = vpop.f32.mrb[29].mxu0  ;;  %v1257_v8 = vpop.f32.mrb[29].mxu1 }
 0x349   : > { %v1557_v9 = vmax.f32 %v1556_v1, %v1144_v7  ;;  %v1599_v10 = vmax.f32 %v1598_v2, %v1257_v8  ;;  %v1146_v59 = vpop.f32.mrb[30].mxu0  ;;  %v1259_v11 = vpop.f32.mrb[30].mxu1 }
 0x34a   : > { %v1537_v12 = vmax.f32 %v1536_v5, %v1146_v59  ;;  %v1579_v13 = vmax.f32 %v1578_v6, %v1259_v11  ;;  %v1148_v14 = vpop.f32.mrb[31].mxu0  ;;  %v1261_v15 = vpop.f32.mrb[31].mxu1 }
 0x34b   : > { %v1558_v16 = vmax.f32 %v1557_v9, %v1148_v14  ;;  %v1600_v17 = vmax.f32 %v1599_v10, %v1261_v15 }
 0x34f   : > { %v1152_v18 = vpop.f32.mrb[32].mxu0  ;;  %v1265_v19 = vpop.f32.mrb[32].mxu1 }
 0x350   : > { %v1538_v20 = vmax.f32 %v1537_v12, %v1152_v18  ;;  %v1580_v21 = vmax.f32 %v1579_v13, %v1265_v19  ;;  %v1154_v33 = vpop.f32.mrb[33].mxu0  ;;  %v1267_v50 = vpop.f32.mrb[33].mxu1 }
 0x351   : > { %v1559_v51 = vmax.f32 %v1558_v16, %v1154_v33  ;;  %v1601_v22 = vmax.f32 %v1600_v17, %v1267_v50  ;;  %v1156_v23 = vpop.f32.mrb[34].mxu0  ;;  %v1269_v24 = vpop.f32.mrb[34].mxu1  ;;  %v1714_v50 = vlaneseq }
 0x352   : > { %v1539_v25 = vmax.f32 %v1538_v20, %v1156_v23  ;;  %v1581_v26 = vmax.f32 %v1580_v21, %v1269_v24  ;;  %v1158_v28 = vpop.f32.mrb[35].mxu0  ;;  %v1271_v29 = vpop.f32.mrb[35].mxu1  ;;  %v2052_v21 = vmov 1966171168  }
 0x353   : > { %v1560_v30 = vmax.f32 %v1559_v51, %v1158_v28  ;;  %v1602_v31 = vmax.f32 %v1601_v22, %v1271_v29  ;;  %v1712_v33 = vunpack.c.l.s4 %v2052_v21 }
 0x357   : > { %v1162_v32 = vpop.f32.mrb[36].mxu0  ;;  %v1275_v34 = vpop.f32.mrb[36].mxu1 }
 0x358   : > { %v1540_v35 = vmax.f32 %v1539_v25, %v1162_v32  ;;  %v1582_v36 = vmax.f32 %v1581_v26, %v1275_v34  ;;  %v1164_v37 = vpop.f32.mrb[37].mxu0  ;;  %v1277_v27 = vpop.f32.mrb[37].mxu1 }
 0x359   : > { %v1561_v38 = vmax.f32 %v1560_v30, %v1164_v37  ;;  %v1603_v39 = vmax.f32 %v1602_v31, %v1277_v27  ;;  %v1166_v40 = vpop.f32.mrb[38].mxu0  ;;  %v1279_v41 = vpop.f32.mrb[38].mxu1 }
 0x35a   : > { %v1541_v42 = vmax.f32 %v1540_v35, %v1166_v40  ;;  %v1583_v43 = vmax.f32 %v1582_v36, %v1279_v41  ;;  %v1168_v44 = vpop.f32.mrb[39].mxu0  ;;  %v1281_v45 = vpop.f32.mrb[39].mxu1  ;;  %v1713_v35 = vunpack.c.0.s8 %v1712_v33  ;;  %v1715_v36 = vshrl.u32 %v1714_v50, 7 }
 0x35b   : > { %v1562_v46 = vmax.f32 %v1561_v38, %v1168_v44  ;;  %v1604_v47 = vmax.f32 %v1603_v39, %v1281_v45 }
 0x35f   : > { %v1172_v48 = vpop.f32.mrb[40].mxu0  ;;  %v1285_v49 = vpop.f32.mrb[40].mxu1 }
 0x360   : > { %v1542_v52 = vmax.f32 %v1541_v42, %v1172_v48  ;;  %v1584_v53 = vmax.f32 %v1583_v43, %v1285_v49  ;;  %v1174_v54 = vpop.f32.mrb[41].mxu0  ;;  %v1287_v55 = vpop.f32.mrb[41].mxu1 }
 0x361   : > { %v1563_v56 = vmax.f32 %v1562_v46, %v1174_v54  ;;  %v1605_v57 = vmax.f32 %v1604_v47, %v1287_v55  ;;  %v1176_v58 = vpop.f32.mrb[42].mxu0  ;;  %v1289_v60 = vpop.f32.mrb[42].mxu1 }
 0x362   : > { %v1543_v61 = vmax.f32 %v1542_v52, %v1176_v58  ;;  %v1585_v62 = vmax.f32 %v1584_v53, %v1289_v60  ;;  %v1178_v63 = vpop.f32.mrb[43].mxu0  ;;  %v1291_v0 = vpop.f32.mrb[43].mxu1  ;;  %v2438_v58 = vsub.s32 %v1713_v35, %v1715_v36 }
 0x363   : > { %v1564_v1 = vmax.f32 %v1563_v56, %v1178_v63  ;;  %v1606_v2 = vmax.f32 %v1605_v57, %v1291_v0 }
 0x367   : > { %v1182_v3 = vpop.f32.mrb[44].mxu0  ;;  %v1295_v4 = vpop.f32.mrb[44].mxu1 }
 0x368   : > { %v1544_v5 = vmax.f32 %v1543_v61, %v1182_v3  ;;  %v1586_v6 = vmax.f32 %v1585_v62, %v1295_v4  ;;  %v1184_v7 = vpop.f32.mrb[45].mxu0  ;;  %v1297_v8 = vpop.f32.mrb[45].mxu1 }
 0x369   : > { %v1565_v9 = vmax.f32 %v1564_v1, %v1184_v7  ;;  %v1607_v10 = vmax.f32 %v1606_v2, %v1297_v8  ;;  %v1186_v59 = vpop.f32.mrb[46].mxu0  ;;  %v1299_v11 = vpop.f32.mrb[46].mxu1 }
 0x36a   : > { %v1545_v12 = vmax.f32 %v1544_v5, %v1186_v59  ;;  %v1587_v13 = vmax.f32 %v1586_v6, %v1299_v11  ;;  %v1188_v14 = vpop.f32.mrb[47].mxu0  ;;  %v1301_v15 = vpop.f32.mrb[47].mxu1 }
 0x36b   : > { %v1566_v16 = vmax.f32 %v1565_v9, %v1188_v14  ;;  %v1608_v17 = vmax.f32 %v1607_v10, %v1301_v15 }
 0x36c   : > { %v1546_v18 = vrot.slane %v1545_v12, 4  ;;  %v1588_v19 = vrot.slane %v1587_v13, 4 }
 0x36d   : > { %v1567_v20 = vrot.slane %v1566_v16, 4  ;;  %v1609_v51 = vrot.slane %v1608_v17, 4 }
 0x36e   : > { %v1547_v22 = vmax.f32 %v1545_v12, %v1546_v18  ;;  %v1589_v23 = vmax.f32 %v1587_v13, %v1588_v19 }
 0x36f   : > { %v1568_v24 = vmax.f32 %v1566_v16, %v1567_v20  ;;  %v1610_v25 = vmax.f32 %v1608_v17, %v1609_v51  ;;  %v1338_v26 = vpop.f32.mrb[48].mxu0  ;;  %v1451_v28 = vpop.f32.mrb[48].mxu1 }
 0x370   : > { %v1548_v29 = vrot.slane %v1547_v22, 2  ;;  %v1590_v30 = vrot.slane %v1589_v23, 2  ;;  %v1340_v31 = vpop.f32.mrb[49].mxu0  ;;  %v1453_v32 = vpop.f32.mrb[49].mxu1 }
 0x371   : > { %v1569_v34 = vrot.slane %v1568_v24, 2  ;;  %v1611_v37 = vrot.slane %v1610_v25, 2  ;;  %v1342_v27 = vpop.f32.mrb[50].mxu0  ;;  %v1455_v38 = vpop.f32.mrb[50].mxu1 }
 0x372   : > { %v1549_v39 = vmax.f32 %v1547_v22, %v1548_v29  ;;  %v1591_v40 = vmax.f32 %v1589_v23, %v1590_v30  ;;  %v1615_v41 = vmax.f32 %v1338_v26, %v1342_v27  ;;  %v1657_v42 = vmax.f32 %v1451_v28, %v1455_v38  ;;  %v1344_v43 = vpop.f32.mrb[51].mxu0  ;;  %v1457_v44 = vpop.f32.mrb[51].mxu1 }
 0x373   : > { %v1570_v45 = vmax.f32 %v1568_v24, %v1569_v34  ;;  %v1612_v46 = vmax.f32 %v1610_v25, %v1611_v37  ;;  %v1636_v47 = vmax.f32 %v1340_v31, %v1344_v43  ;;  %v1678_v48 = vmax.f32 %v1453_v32, %v1457_v44 }
 0x374   : > { %v1550_v49 = vrot.slane %v1549_v39, 1  ;;  %v1592_v52 = vrot.slane %v1591_v40, 1 }
 0x375   : > { %v1571_v53 = vrot.slane %v1570_v45, 1  ;;  %v1613_v54 = vrot.slane %v1612_v46, 1 }
 0x376   : > { %v1551_v55 = vmax.f32 %v1549_v39, %v1550_v49  ;;  %v1593_v56 = vmax.f32 %v1591_v40, %v1592_v52 }
 0x377   : > { %v1572_v57 = vmax.f32 %v1570_v45, %v1571_v53  ;;  %v1614_v60 = vmax.f32 %v1612_v46, %v1613_v54  ;;  %v1348_v61 = vpop.f32.mrb[52].mxu0  ;;  %v1461_v62 = vpop.f32.mrb[52].mxu1 }
 0x378   : > { %v1616_v63 = vmax.f32 %v1615_v41, %v1348_v61  ;;  %v1658_v0 = vmax.f32 %v1657_v42, %v1461_v62  ;;  %v1350_v1 = vpop.f32.mrb[53].mxu0  ;;  %v1463_v2 = vpop.f32.mrb[53].mxu1 }
 0x379   : > { %v1707_v3 = vcombine.low %v1551_v55, %v1572_v57  ;;  %v1708_v4 = vcombine.low %v1593_v56, %v1614_v60  ;;  %v1637_v5 = vmax.f32 %v1636_v47, %v1350_v1  ;;  %v1679_v6 = vmax.f32 %v1678_v48, %v1463_v2  ;;  %v1352_v7 = vpop.f32.mrb[54].mxu0  ;;  %v1465_v8 = vpop.f32.mrb[54].mxu1 }
 0x37a   : > { %v1617_v9 = vmax.f32 %v1616_v63, %v1352_v7  ;;  %v1659_v10 = vmax.f32 %v1658_v0, %v1465_v8  ;;  %v1354_v59 = vpop.f32.mrb[55].mxu0  ;;  %v1467_v11 = vpop.f32.mrb[55].mxu1 }
 0x37b   : > { %v2441_v12 = vrot.slane %v1707_v3, %v2438_v58  ;;  %v2444_v13 = vrot.slane %v1708_v4, %v2438_v58  ;;  %v1638_v14 = vmax.f32 %v1637_v5, %v1354_v59  ;;  %v1680_v15 = vmax.f32 %v1679_v6, %v1467_v11 }
 0x37d   : > { %v1739_v16 = vcombine.low %v2441_v12, %v2444_v13 }
 0x37f   : > { %v1358_v17 = vpop.f32.mrb[56].mxu0  ;;  %v1471_v18 = vpop.f32.mrb[56].mxu1 }
 0x380   : > { %v1618_v19 = vmax.f32 %v1617_v9, %v1358_v17  ;;  %v1660_v20 = vmax.f32 %v1659_v10, %v1471_v18  ;;  %v1360_v21 = vpop.f32.mrb[57].mxu0  ;;  %v1473_v33 = vpop.f32.mrb[57].mxu1 }
 0x381   : > { %v1639_v50 = vmax.f32 %v1638_v14, %v1360_v21  ;;  %v1681_v51 = vmax.f32 %v1680_v15, %v1473_v33  ;;  %v1362_v22 = vpop.f32.mrb[58].mxu0  ;;  %v1475_v23 = vpop.f32.mrb[58].mxu1 }
 0x382   : > { %v1619_v24 = vmax.f32 %v1618_v19, %v1362_v22  ;;  %v1661_v25 = vmax.f32 %v1660_v20, %v1475_v23  ;;  %v1364_v26 = vpop.f32.mrb[59].mxu0  ;;  %v1477_v28 = vpop.f32.mrb[59].mxu1 }
 0x383   : > { %v1640_v29 = vmax.f32 %v1639_v50, %v1364_v26  ;;  %v1682_v30 = vmax.f32 %v1681_v51, %v1477_v28 }
 0x387   : > { %v1368_v31 = vpop.f32.mrb[60].mxu0  ;;  %v1481_v32 = vpop.f32.mrb[60].mxu1 }
 0x388   : > { %v1620_v34 = vmax.f32 %v1619_v24, %v1368_v31  ;;  %v1662_v35 = vmax.f32 %v1661_v25, %v1481_v32  ;;  %v1370_v36 = vpop.f32.mrb[61].mxu0  ;;  %v1483_v37 = vpop.f32.mrb[61].mxu1 }
 0x389   : > { %v1641_v27 = vmax.f32 %v1640_v29, %v1370_v36  ;;  %v1683_v38 = vmax.f32 %v1682_v30, %v1483_v37  ;;  %v1372_v39 = vpop.f32.mrb[62].mxu0  ;;  %v1485_v40 = vpop.f32.mrb[62].mxu1 }
 0x38a   : > { %v1621_v41 = vmax.f32 %v1620_v34, %v1372_v39  ;;  %v1663_v42 = vmax.f32 %v1662_v35, %v1485_v40  ;;  %v1374_v43 = vpop.f32.mrb[63].mxu0  ;;  %v1487_v44 = vpop.f32.mrb[63].mxu1 }
 0x38b   : > { %v1642_v45 = vmax.f32 %v1641_v27, %v1374_v43  ;;  %v1684_v46 = vmax.f32 %v1683_v38, %v1487_v44 }
 0x38f   : > { %v1378_v47 = vpop.f32.mrb[64].mxu0  ;;  %v1491_v48 = vpop.f32.mrb[64].mxu1 }
 0x390   : > { %v1622_v49 = vmax.f32 %v1621_v41, %v1378_v47  ;;  %v1664_v52 = vmax.f32 %v1663_v42, %v1491_v48  ;;  %v1380_v53 = vpop.f32.mrb[65].mxu0  ;;  %v1493_v54 = vpop.f32.mrb[65].mxu1 }
 0x391   : > { %v1643_v55 = vmax.f32 %v1642_v45, %v1380_v53  ;;  %v1685_v56 = vmax.f32 %v1684_v46, %v1493_v54  ;;  %v1382_v57 = vpop.f32.mrb[66].mxu0  ;;  %v1495_v60 = vpop.f32.mrb[66].mxu1 }
 0x392   : > { %v1623_v61 = vmax.f32 %v1622_v49, %v1382_v57  ;;  %v1665_v62 = vmax.f32 %v1664_v52, %v1495_v60  ;;  %v1384_v63 = vpop.f32.mrb[67].mxu0  ;;  %v1497_v0 = vpop.f32.mrb[67].mxu1 }
 0x393   : > { %v1644_v1 = vmax.f32 %v1643_v55, %v1384_v63  ;;  %v1686_v2 = vmax.f32 %v1685_v56, %v1497_v0 }
 0x397   : > { %v1388_v3 = vpop.f32.mrb[68].mxu0  ;;  %v1501_v4 = vpop.f32.mrb[68].mxu1 }
 0x398   : > { %v1624_v5 = vmax.f32 %v1623_v61, %v1388_v3  ;;  %v1666_v6 = vmax.f32 %v1665_v62, %v1501_v4  ;;  %v1390_v7 = vpop.f32.mrb[69].mxu0  ;;  %v1503_v8 = vpop.f32.mrb[69].mxu1 }
 0x399   : > { %v1645_v9 = vmax.f32 %v1644_v1, %v1390_v7  ;;  %v1687_v10 = vmax.f32 %v1686_v2, %v1503_v8  ;;  %v1392_v59 = vpop.f32.mrb[70].mxu0  ;;  %v1505_v11 = vpop.f32.mrb[70].mxu1 }
 0x39a   : > { %v1625_v14 = vmax.f32 %v1624_v5, %v1392_v59  ;;  %v1667_v15 = vmax.f32 %v1666_v6, %v1505_v11  ;;  %v1394_v17 = vpop.f32.mrb[71].mxu0  ;;  %v1507_v18 = vpop.f32.mrb[71].mxu1 }
 0x39b   : > { %v1646_v19 = vmax.f32 %v1645_v9, %v1394_v17  ;;  %v1688_v20 = vmax.f32 %v1687_v10, %v1507_v18 }
 0x39f   : > { %v1398_v21 = vpop.f32.mrb[72].mxu0  ;;  %v1511_v33 = vpop.f32.mrb[72].mxu1 }
 0x3a0   : > { %v1626_v50 = vmax.f32 %v1625_v14, %v1398_v21  ;;  %v1668_v51 = vmax.f32 %v1667_v15, %v1511_v33  ;;  %v1400_v22 = vpop.f32.mrb[73].mxu0  ;;  %v1513_v23 = vpop.f32.mrb[73].mxu1  ;;  %v1747_v33 = vrot.slane %v1739_v16, %v2438_v58 }
 0x3a1   : > { %v1647_v24 = vmax.f32 %v1646_v19, %v1400_v22  ;;  %v1689_v25 = vmax.f32 %v1688_v20, %v1513_v23  ;;  %v1402_v26 = vpop.f32.mrb[74].mxu0  ;;  %v1515_v28 = vpop.f32.mrb[74].mxu1 }
 0x3a2   : > { %v1627_v29 = vmax.f32 %v1626_v50, %v1402_v26  ;;  %v1669_v30 = vmax.f32 %v1668_v51, %v1515_v28  ;;  %v1404_v31 = vpop.f32.mrb[75].mxu0  ;;  %v1517_v32 = vpop.f32.mrb[75].mxu1  ;;  %v1763_v51 = vld [vmem:[%s2477_s6] sm:$0xff] }
 0x3a3   : > { %v1648_v34 = vmax.f32 %v1647_v24, %v1404_v31  ;;  %v1690_v35 = vmax.f32 %v1689_v25, %v1517_v32 }
 0x3a7   : > { %v1408_v36 = vpop.f32.mrb[76].mxu0  ;;  %v1521_v37 = vpop.f32.mrb[76].mxu1 }
 0x3a8   : > { %v1628_v27 = vmax.f32 %v1627_v29, %v1408_v36  ;;  %v1670_v38 = vmax.f32 %v1669_v30, %v1521_v37  ;;  %v1410_v39 = vpop.f32.mrb[77].mxu0  ;;  %v1523_v40 = vpop.f32.mrb[77].mxu1 }
 0x3a9   : > { %v1649_v41 = vmax.f32 %v1648_v34, %v1410_v39  ;;  %v1691_v42 = vmax.f32 %v1690_v35, %v1523_v40  ;;  %v1412_v43 = vpop.f32.mrb[78].mxu0  ;;  %v1525_v44 = vpop.f32.mrb[78].mxu1 }
 0x3aa   : > { %v1629_v45 = vmax.f32 %v1628_v27, %v1412_v43  ;;  %v1671_v46 = vmax.f32 %v1670_v38, %v1525_v44  ;;  %v1414_v47 = vpop.f32.mrb[79].mxu0  ;;  %v1527_v48 = vpop.f32.mrb[79].mxu1 }
 0x3ab   : > { %v1650_v49 = vmax.f32 %v1649_v41, %v1414_v47  ;;  %v1692_v52 = vmax.f32 %v1691_v42, %v1527_v48 }
 0x3ac   : > { %v1630_v53 = vrot.slane %v1629_v45, 4  ;;  %v1672_v54 = vrot.slane %v1671_v46, 4 }
 0x3ad   : > { %v1651_v55 = vrot.slane %v1650_v49, 4  ;;  %v1693_v56 = vrot.slane %v1692_v52, 4 }
 0x3ae   : > { %v1631_v57 = vmax.f32 %v1629_v45, %v1630_v53  ;;  %v1673_v60 = vmax.f32 %v1671_v46, %v1672_v54 }
 0x3af   : > { %v1652_v61 = vmax.f32 %v1650_v49, %v1651_v55  ;;  %v1694_v62 = vmax.f32 %v1692_v52, %v1693_v56 }
 0x3b0   : > { %v1632_v63 = vrot.slane %v1631_v57, 2  ;;  %v1674_v0 = vrot.slane %v1673_v60, 2 }
 0x3b1   : > { %v1653_v1 = vrot.slane %v1652_v61, 2  ;;  %v1695_v2 = vrot.slane %v1694_v62, 2 }
 0x3b2   : > { %v1633_v3 = vmax.f32 %v1631_v57, %v1632_v63  ;;  %v1675_v4 = vmax.f32 %v1673_v60, %v1674_v0 }
 0x3b3   : > { %v1654_v5 = vmax.f32 %v1652_v61, %v1653_v1  ;;  %v1696_v6 = vmax.f32 %v1694_v62, %v1695_v2 }
 0x3b4   : > { %v1634_v7 = vrot.slane %v1633_v3, 1  ;;  %v1676_v8 = vrot.slane %v1675_v4, 1 }
 0x3b5   : > { %v1655_v9 = vrot.slane %v1654_v5, 1  ;;  %v1697_v10 = vrot.slane %v1696_v6, 1 }
 0x3b6   : > { %v1635_v59 = vmax.f32 %v1633_v3, %v1634_v7  ;;  %v1677_v11 = vmax.f32 %v1675_v4, %v1676_v8 }
 0x3b7   : > { %v1656_v14 = vmax.f32 %v1654_v5, %v1655_v9  ;;  %v1698_v15 = vmax.f32 %v1696_v6, %v1697_v10 }
 0x3b9   : > { %v1709_v17 = vcombine.low %v1635_v59, %v1656_v14  ;;  %v1710_v18 = vcombine.low %v1677_v11, %v1698_v15 }
 0x3bb   : > { %v1731_v19 = vrot.slane %v1709_v17, %v2438_v58  ;;  %v1738_v20 = vrot.slane %v1710_v18, %v2438_v58 }
 0x3bd   : > { %v1740_v21 = vcombine.low %v1731_v19, %v1738_v20 }
 0x3bf   : > { %v1754_v50 = vrot.slane %v1740_v21, %v2438_v58 }
 0x3c1   : > { %v1755_v22 = vcombine.low %v1747_v33, %v1754_v50 }
 0x3c3   : > { %v1764_v23 = vadd.f32 %v1763_v51, %v1755_v22 }
 0x3c5   : > { %v1765_v24 = vmax.f32 %v1764_v23, 0.0 }
 0x3c7   : > { %1766 = vst [vmem:[%s299_s23] sm:$0xff] %v1765_v24 }
 0x3c8 PF: > { %s17_s26 = sadd.s32 1, %s2049_s26   ;;  %s2479_s24 = smov %s2045_s25 }
 0x3c9   : > { %p14_p5 = scmp.ge.s32.totalorder %s17_s26, 4   ;;  %s2480_s25 = smov %s2482_s27 }
 0x3cb   :  { %16 = sbr.rel (!%p14_p5) target bundleno = 2 (0x2), region = 86 }

// kernel: stnkd_forward.3
= control target key start
LH: loop header
LB: loop body
LE: loop exit
PB: predicated region body
PF: predicated region fallthrough
CT: control target
= control target key end

     0   :  { %v3652_v36 = vmov 1983009808   ;;  %v37_v38 = vlaneseq  ;;  %s4832_s1 = inlined_call_operand.vmem [shape: bf16[1024,512], index: 1, kind: input, shape index: {}]   ;;  %s4833_s0 = inlined_call_operand.vmem [shape: f32[2,1024], index: 0, kind: input, shape index: {}]   ;;  %s4834_s3 = inlined_call_operand.vmem [shape: bf16[512,256], index: 3, kind: input, shape index: {}]   ;;  %s4835_s5 = inlined_call_operand.vmem [shape: bf16[256,256], index: 5, kind: input, shape index: {}]   ;;  %s4836_s2 = inlined_call_operand.vmem [shape: f32[1,512], index: 2, kind: input, shape index: {}]   ;;  %s4837_s4 = inlined_call_operand.vmem [shape: f32[1,256], index: 4, kind: input, shape index: {}]   ;;  %s4838_s6 = inlined_call_operand.vmem [shape: f32[1,256], index: 6, kind: input, shape index: {}]   ;;  %s4839_s7 = inlined_call_operand.vmem [shape: f32[1,256], index: 7, kind: input, shape index: {}]   ;;  %s4840_s8 = inlined_call_operand.vmem [shape: f32[2,256], index: 8, kind: output, shape index: {}]  }
   0x1   :  { %v3122_v0 = vld [vmem:[%s4832_s1 + $0x4] ss:$16 sps:$4 sm:$0xff]   ;;  %v3124_v1 = vld [vmem:[%s4832_s1 + $0xc] ss:$16 sps:$4 sm:$0xff]   ;;  %v3126_v2 = vld [vmem:[%s4832_s1] ss:$16 sps:$4 sm:$0xff]   ;;  %v35_v37 = vunpack.c.l.s4 %v3652_v36 }
   0x2   :  { %1641 = vmatprep.subr.bf16.mxu0 %v3122_v0  ;;  %v3127_v3 = vld [vmem:[%s4832_s1 + $0x8] ss:$16 sps:$4 sm:$0xff]   ;;  %1805 = vmatprep.subr.bf16.mxu1 %v3124_v1  ;;  %v3128_v4 = vld [vmem:[%s4832_s1 + $0x24] ss:$16 sps:$4 sm:$0xff]   ;;  %v3130_v5 = vld [vmem:[%s4832_s1 + $0x2c] ss:$16 sps:$4 sm:$0xff]  }
   0x3   :  { %1642 = vmatpush1.bf16.msra.mxu0 %v3126_v2  ;;  %1806 = vmatpush1.bf16.msra.mxu1 %v3127_v3  ;;  %v3132_v6 = vld [vmem:[%s4832_s1 + $0x20] ss:$16 sps:$4 sm:$0xff]   ;;  %v3133_v7 = vld [vmem:[%s4832_s1 + $0x28] ss:$16 sps:$4 sm:$0xff]   ;;  %v3134_v8 = vld [vmem:[%s4832_s1 + $0x44] ss:$16 sps:$4 sm:$0xff]   ;;  %v36_v42 = vunpack.c.0.s8 %v35_v37 }
   0x4   :  { %1643 = vmatprep.subr.bf16.mxu0 %v3128_v4  ;;  %1807 = vmatprep.subr.bf16.mxu1 %v3130_v5  ;;  %v3136_v9 = vld [vmem:[%s4832_s1 + $0x4c] ss:$16 sps:$4 sm:$0xff]   ;;  %v3138_v10 = vld [vmem:[%s4832_s1 + $0x40] ss:$16 sps:$4 sm:$0xff]   ;;  %v3139_v11 = vld [vmem:[%s4832_s1 + $0x48] ss:$16 sps:$4 sm:$0xff]  }
   0x5   :  { %v3140_v12 = vld [vmem:[%s4832_s1 + $0x64] ss:$16 sps:$4 sm:$0xff]   ;;  %v3142_v13 = vld [vmem:[%s4832_s1 + $0x6c] ss:$16 sps:$4 sm:$0xff]   ;;  %v3144_v14 = vld [vmem:[%s4832_s1 + $0x60] ss:$16 sps:$4 sm:$0xff]  }
   0x6   :  { %v3145_v15 = vld [vmem:[%s4832_s1 + $0x68] ss:$16 sps:$4 sm:$0xff]   ;;  %v3146_v16 = vld [vmem:[%s4832_s1 + $0x84] ss:$16 sps:$4 sm:$0xff]   ;;  %v3148_v17 = vld [vmem:[%s4832_s1 + $0x8c] ss:$16 sps:$4 sm:$0xff]  }
   0x7   :  { %1644 = vmatpush1.bf16.msra.mxu0 %v3132_v6  ;;  %1808 = vmatpush1.bf16.msra.mxu1 %v3133_v7  ;;  %v3150_v18 = vld [vmem:[%s4832_s1 + $0x80] ss:$16 sps:$4 sm:$0xff]   ;;  %v3151_v19 = vld [vmem:[%s4832_s1 + $0x88] ss:$16 sps:$4 sm:$0xff]   ;;  %v3152_v20 = vld [vmem:[%s4832_s1 + $0xa4] ss:$16 sps:$4 sm:$0xff]  }
   0x8   :  { %1645 = vmatprep.subr.bf16.mxu0 %v3134_v8  ;;  %1809 = vmatprep.subr.bf16.mxu1 %v3136_v9  ;;  %v3154_v21 = vld [vmem:[%s4832_s1 + $0xac] ss:$16 sps:$4 sm:$0xff]   ;;  %v3156_v22 = vld [vmem:[%s4832_s1 + $0xa0] ss:$16 sps:$4 sm:$0xff]   ;;  %v3157_v23 = vld [vmem:[%s4832_s1 + $0xa8] ss:$16 sps:$4 sm:$0xff]  }
   0x9   :  { %v3158_v24 = vld [vmem:[%s4832_s1 + $0xc4] ss:$16 sps:$4 sm:$0xff]   ;;  %v3160_v25 = vld [vmem:[%s4832_s1 + $0xcc] ss:$16 sps:$4 sm:$0xff]   ;;  %v3162_v26 = vld [vmem:[%s4832_s1 + $0xc0] ss:$16 sps:$4 sm:$0xff]  }
   0xa   :  { %v3163_v27 = vld [vmem:[%s4832_s1 + $0xc8] ss:$16 sps:$4 sm:$0xff]   ;;  %v3164_v28 = vld [vmem:[%s4832_s1 + $0xe4] ss:$16 sps:$4 sm:$0xff]   ;;  %v3166_v29 = vld [vmem:[%s4832_s1 + $0xec] ss:$16 sps:$4 sm:$0xff]  }
   0xb   :  { %1646 = vmatpush1.bf16.msra.mxu0 %v3138_v10  ;;  %1810 = vmatpush1.bf16.msra.mxu1 %v3139_v11  ;;  %v3168_v30 = vld [vmem:[%s4832_s1 + $0xe0] ss:$16 sps:$4 sm:$0xff]   ;;  %v3169_v31 = vld [vmem:[%s4832_s1 + $0xe8] ss:$16 sps:$4 sm:$0xff]   ;;  %v3170_v32 = vld [vmem:[%s4832_s1 + $0x104] ss:$16 sps:$4 sm:$0xff]  }
   0xc   :  { %1647 = vmatprep.subr.bf16.mxu0 %v3140_v12  ;;  %1811 = vmatprep.subr.bf16.mxu1 %v3142_v13  ;;  %v3172_v33 = vld [vmem:[%s4832_s1 + $0x10c] ss:$16 sps:$4 sm:$0xff]   ;;  %v3174_v34 = vld [vmem:[%s4832_s1 + $0x100] ss:$16 sps:$4 sm:$0xff]   ;;  %v3175_v35 = vld [vmem:[%s4832_s1 + $0x108] ss:$16 sps:$4 sm:$0xff]  }
   0xd   :  { %v3176_v39 = vld [vmem:[%s4832_s1 + $0x124] ss:$16 sps:$4 sm:$0xff]   ;;  %v3178_v40 = vld [vmem:[%s4832_s1 + $0x12c] ss:$16 sps:$4 sm:$0xff]   ;;  %v3180_v41 = vld [vmem:[%s4832_s1 + $0x120] ss:$16 sps:$4 sm:$0xff]  }
   0xe   :  { %v3815_v43 = vshrl.u32 %v37_v38, 7  ;;  %v3181_v44 = vld [vmem:[%s4832_s1 + $0x128] ss:$16 sps:$4 sm:$0xff]   ;;  %v3182_v45 = vld [vmem:[%s4832_s1 + $0x144] ss:$16 sps:$4 sm:$0xff]  }
   0xf   :  { %1648 = vmatpush1.bf16.msra.mxu0 %v3144_v14  ;;  %1812 = vmatpush1.bf16.msra.mxu1 %v3145_v15  ;;  %v3184_v46 = vld [vmem:[%s4832_s1 + $0x14c] ss:$16 sps:$4 sm:$0xff]   ;;  %v3186_v47 = vld [vmem:[%s4832_s1 + $0x140] ss:$16 sps:$4 sm:$0xff]   ;;  %v3187_v48 = vld [vmem:[%s4832_s1 + $0x148] ss:$16 sps:$4 sm:$0xff]  }
  0x10   :  { %1649 = vmatprep.subr.bf16.mxu0 %v3146_v16  ;;  %1813 = vmatprep.subr.bf16.mxu1 %v3148_v17  ;;  %v3833_v49 = vsub.s32 %v36_v42, %v3815_v43  ;;  %v3188_v50 = vld [vmem:[%s4832_s1 + $0x164] ss:$16 sps:$4 sm:$0xff]   ;;  %v3190_v51 = vld [vmem:[%s4832_s1 + $0x16c] ss:$16 sps:$4 sm:$0xff]   ;;  %v3192_v54 = vld [vmem:[%s4832_s1 + $0x160] ss:$16 sps:$4 sm:$0xff]  }
  0x11   :  { %v29_v52 = vld [vmem:[%s4833_s0] sm:$0xff]  ;;  %v3193_v55 = vld [vmem:[%s4832_s1 + $0x168] ss:$16 sps:$4 sm:$0xff]   ;;  %v3196_v57 = vld [vmem:[%s4832_s1 + $0x18c] ss:$16 sps:$4 sm:$0xff]  }
  0x12   :  { %v40_v53 = vrot.slane %v29_v52, %v3833_v49  ;;  %v3194_v56 = vld [vmem:[%s4832_s1 + $0x184] ss:$16 sps:$4 sm:$0xff]   ;;  %v3198_v60 = vld [vmem:[%s4832_s1 + $0x180] ss:$16 sps:$4 sm:$0xff]   ;;  %v3199_v61 = vld [vmem:[%s4832_s1 + $0x188] ss:$16 sps:$4 sm:$0xff]   ;;  %v33_v4 = vcombine.high %v29_v52, %v29_v52 }
  0x13   :  { %1650 = vmatpush1.bf16.msra.mxu0 %v3150_v18  ;;  %1814 = vmatpush1.bf16.msra.mxu1 %v3151_v19  ;;  %v3200_v62 = vld [vmem:[%s4832_s1 + $0x1a4] ss:$16 sps:$4 sm:$0xff]   ;;  %v3202_v63 = vld [vmem:[%s4832_s1 + $0x1ac] ss:$16 sps:$4 sm:$0xff]   ;;  %v3204_v0 = vld [vmem:[%s4832_s1 + $0x1a0] ss:$16 sps:$4 sm:$0xff]  }
  0x14   :  { %1651 = vmatprep.subr.bf16.mxu0 %v3152_v20  ;;  %1815 = vmatprep.subr.bf16.mxu1 %v3154_v21  ;;  %v48_v58 = vcombine.high %v40_v53, %v40_v53  ;;  %v3205_v1 = vld [vmem:[%s4832_s1 + $0x1a8] ss:$16 sps:$4 sm:$0xff]   ;;  %v3206_v2 = vld [vmem:[%s4832_s1 + $0x1c4] ss:$16 sps:$4 sm:$0xff]   ;;  %v3208_v3 = vld [vmem:[%s4832_s1 + $0x1cc] ss:$16 sps:$4 sm:$0xff]   ;;  %v3894_v9 = vrot.slane %v33_v4, %v3833_v49  ;;  %v75_v15 = vpack.c.bf16 %v40_v53, %v40_v53 }
  0x15   :  { %v3210_v5 = vld [vmem:[%s4832_s1 + $0x1c0] ss:$16 sps:$4 sm:$0xff]   ;;  %v3211_v6 = vld [vmem:[%s4832_s1 + $0x1c8] ss:$16 sps:$4 sm:$0xff]   ;;  %v3212_v7 = vld [vmem:[%s4832_s1 + $0x1e4] ss:$16 sps:$4 sm:$0xff]  }
  0x16   :  { %v76_v59 = vpack.c.bf16 %v48_v58, %v48_v58  ;;  %v3214_v8 = vld [vmem:[%s4832_s1 + $0x1ec] ss:$16 sps:$4 sm:$0xff]   ;;  %v3216_v10 = vld [vmem:[%s4832_s1 + $0x1e0] ss:$16 sps:$4 sm:$0xff]   ;;  %v3217_v11 = vld [vmem:[%s4832_s1 + $0x1e8] ss:$16 sps:$4 sm:$0xff]   ;;  %v49_v14 = vcombine.high %v3894_v9, %v3894_v9 }
  0x17   :  { %1652 = vmatpush1.bf16.msra.mxu0 %v3156_v22  ;;  %1816 = vmatpush1.bf16.msra.mxu1 %v3157_v23  ;;  %v3222_v12 = vld [vmem:[%s4832_s1 + $0x204] ss:$16 sps:$4 sm:$0xff]   ;;  %v3225_v13 = vld [vmem:[%s4832_s1 + $0x20c] ss:$16 sps:$4 sm:$0xff]   ;;  %v3220_v16 = vld [vmem:[%s4832_s1 + $0x200] ss:$16 sps:$4 sm:$0xff]  }
  0x18   :  { %1653 = vmatprep.subr.bf16.mxu0 %v3158_v24  ;;  %1817 = vmatprep.subr.bf16.mxu1 %v3160_v25  ;;  %v3223_v17 = vld [vmem:[%s4832_s1 + $0x208] ss:$16 sps:$4 sm:$0xff]   ;;  %v3228_v18 = vld [vmem:[%s4832_s1 + $0x224] ss:$16 sps:$4 sm:$0xff]   ;;  %v3231_v19 = vld [vmem:[%s4832_s1 + $0x22c] ss:$16 sps:$4 sm:$0xff]   ;;  %v78_v20 = vpack.c.bf16 %v49_v14, %v49_v14 }
  0x19   :  { %1673 = vmatprep.mubr.bf16.mxu0 %v76_v59  ;;  %1837 = vmatprep.mubr.bf16.mxu1 %v76_v59  ;;  %v3226_v21 = vld [vmem:[%s4832_s1 + $0x220] ss:$16 sps:$4 sm:$0xff]   ;;  %v3229_v22 = vld [vmem:[%s4832_s1 + $0x228] ss:$16 sps:$4 sm:$0xff]   ;;  %v3234_v23 = vld [vmem:[%s4832_s1 + $0x244] ss:$16 sps:$4 sm:$0xff]  }
  0x1a   :  { %v3237_v24 = vld [vmem:[%s4832_s1 + $0x24c] ss:$16 sps:$4 sm:$0xff]   ;;  %v3232_v25 = vld [vmem:[%s4832_s1 + $0x240] ss:$16 sps:$4 sm:$0xff]   ;;  %v3253_v38 = vld [vmem:[%s4832_s1 + $0x2a8] ss:$16 sps:$4 sm:$0xff]  }
  0x1b   :  { %1654 = vmatpush1.bf16.msra.mxu0 %v3162_v26  ;;  %1818 = vmatpush1.bf16.msra.mxu1 %v3163_v27  ;;  %v3235_v26 = vld [vmem:[%s4832_s1 + $0x248] ss:$16 sps:$4 sm:$0xff]   ;;  %v3240_v27 = vld [vmem:[%s4832_s1 + $0x264] ss:$16 sps:$4 sm:$0xff]   ;;  %v3255_v36 = vld [vmem:[%s4832_s1 + $0x2ac] ss:$16 sps:$4 sm:$0xff]  }
  0x1c   :  { %1655 = vmatprep.subr.bf16.mxu0 %v3164_v28  ;;  %1819 = vmatprep.subr.bf16.mxu1 %v3166_v29  ;;  %v3243_v28 = vld [vmem:[%s4832_s1 + $0x26c] ss:$16 sps:$4 sm:$0xff]   ;;  %v3238_v29 = vld [vmem:[%s4832_s1 + $0x260] ss:$16 sps:$4 sm:$0xff]   ;;  %v3259_v42 = vld [vmem:[%s4832_s1 + $0x2c8] ss:$16 sps:$4 sm:$0xff]  }
  0x1d   :  { %v3250_v37 = vld [vmem:[%s4832_s1 + $0x2a0] ss:$16 sps:$4 sm:$0xff]   ;;  %v3271_v52 = vld [vmem:[%s4832_s1 + $0x308] ss:$16 sps:$4 sm:$0xff]   ;;  %v3276_v53 = vld [vmem:[%s4832_s1 + $0x324] ss:$16 sps:$4 sm:$0xff]  }
  0x1e   :  { %v3285_v58 = vld [vmem:[%s4832_s1 + $0x34c] ss:$16 sps:$4 sm:$0xff]   ;;  %v3280_v59 = vld [vmem:[%s4832_s1 + $0x340] ss:$16 sps:$4 sm:$0xff]   ;;  %v3295_v4 = vld [vmem:[%s4832_s1 + $0x388] ss:$16 sps:$4 sm:$0xff]  }
  0x1f   :  { %1656 = vmatpush1.bf16.msra.mxu0 %v3168_v30  ;;  %1820 = vmatpush1.bf16.msra.mxu1 %v3169_v31  ;;  %v3241_v30 = vld [vmem:[%s4832_s1 + $0x268] ss:$16 sps:$4 sm:$0xff]   ;;  %v3246_v31 = vld [vmem:[%s4832_s1 + $0x284] ss:$16 sps:$4 sm:$0xff]  }
  0x20   :  { %1657 = vmatprep.subr.bf16.mxu0 %v3170_v32  ;;  %1821 = vmatprep.subr.bf16.mxu1 %v3172_v33  ;;  %v3249_v32 = vld [vmem:[%s4832_s1 + $0x28c] ss:$16 sps:$4 sm:$0xff]   ;;  %v3244_v33 = vld [vmem:[%s4832_s1 + $0x280] ss:$16 sps:$4 sm:$0xff]   ;;  %v3307_v14 = vld [vmem:[%s4832_s1 + $0x3c8] ss:$16 sps:$4 sm:$0xff]  }
  0x23   :  { %1658 = vmatpush1.bf16.msra.mxu0 %v3174_v34  ;;  %1822 = vmatpush1.bf16.msra.mxu1 %v3175_v35  ;;  %v3247_v34 = vld [vmem:[%s4832_s1 + $0x288] ss:$16 sps:$4 sm:$0xff]   ;;  %v3252_v35 = vld [vmem:[%s4832_s1 + $0x2a4] ss:$16 sps:$4 sm:$0xff]  }
  0x24   :  { %1659 = vmatprep.subr.bf16.mxu0 %v3176_v39  ;;  %1823 = vmatprep.subr.bf16.mxu1 %v3178_v40  ;;  %v3258_v39 = vld [vmem:[%s4832_s1 + $0x2c4] ss:$16 sps:$4 sm:$0xff]   ;;  %v3261_v40 = vld [vmem:[%s4832_s1 + $0x2cc] ss:$16 sps:$4 sm:$0xff]  }
  0x27   :  { %1660 = vmatpush1.bf16.msra.mxu0 %v3180_v41  ;;  %1824 = vmatpush1.bf16.msra.mxu1 %v3181_v44  ;;  %v3256_v41 = vld [vmem:[%s4832_s1 + $0x2c0] ss:$16 sps:$4 sm:$0xff]   ;;  %v3264_v44 = vld [vmem:[%s4832_s1 + $0x2e4] ss:$16 sps:$4 sm:$0xff]  }
  0x28   :  { %1661 = vmatprep.subr.bf16.mxu0 %v3182_v45  ;;  %1825 = vmatprep.subr.bf16.mxu1 %v3184_v46  ;;  %v3267_v45 = vld [vmem:[%s4832_s1 + $0x2ec] ss:$16 sps:$4 sm:$0xff]   ;;  %v3262_v46 = vld [vmem:[%s4832_s1 + $0x2e0] ss:$16 sps:$4 sm:$0xff]  }
  0x2b   :  { %1662 = vmatpush1.bf16.msra.mxu0 %v3186_v47  ;;  %1826 = vmatpush1.bf16.msra.mxu1 %v3187_v48  ;;  %v3265_v47 = vld [vmem:[%s4832_s1 + $0x2e8] ss:$16 sps:$4 sm:$0xff]   ;;  %v3270_v48 = vld [vmem:[%s4832_s1 + $0x304] ss:$16 sps:$4 sm:$0xff]  }
  0x2c   :  { %1663 = vmatprep.subr.bf16.mxu0 %v3188_v50  ;;  %1827 = vmatprep.subr.bf16.mxu1 %v3190_v51  ;;  %v3273_v50 = vld [vmem:[%s4832_s1 + $0x30c] ss:$16 sps:$4 sm:$0xff]   ;;  %v3268_v51 = vld [vmem:[%s4832_s1 + $0x300] ss:$16 sps:$4 sm:$0xff]  }
  0x2f   :  { %1664 = vmatpush1.bf16.msra.mxu0 %v3192_v54  ;;  %1828 = vmatpush1.bf16.msra.mxu1 %v3193_v55  ;;  %v3279_v54 = vld [vmem:[%s4832_s1 + $0x32c] ss:$16 sps:$4 sm:$0xff]   ;;  %v3274_v55 = vld [vmem:[%s4832_s1 + $0x320] ss:$16 sps:$4 sm:$0xff]  }
  0x30   :  { %1665 = vmatprep.subr.bf16.mxu0 %v3194_v56  ;;  %1829 = vmatprep.subr.bf16.mxu1 %v3196_v57  ;;  %v3277_v56 = vld [vmem:[%s4832_s1 + $0x328] ss:$16 sps:$4 sm:$0xff]   ;;  %v3282_v57 = vld [vmem:[%s4832_s1 + $0x344] ss:$16 sps:$4 sm:$0xff]  }
  0x33   :  { %1666 = vmatpush1.bf16.msra.mxu0 %v3198_v60  ;;  %1830 = vmatpush1.bf16.msra.mxu1 %v3199_v61  ;;  %v3283_v60 = vld [vmem:[%s4832_s1 + $0x348] ss:$16 sps:$4 sm:$0xff]   ;;  %v3288_v61 = vld [vmem:[%s4832_s1 + $0x364] ss:$16 sps:$4 sm:$0xff]  }
  0x34   :  { %1667 = vmatprep.subr.bf16.mxu0 %v3200_v62  ;;  %1831 = vmatprep.subr.bf16.mxu1 %v3202_v63  ;;  %v3291_v62 = vld [vmem:[%s4832_s1 + $0x36c] ss:$16 sps:$4 sm:$0xff]   ;;  %v3286_v63 = vld [vmem:[%s4832_s1 + $0x360] ss:$16 sps:$4 sm:$0xff]  }
  0x37   :  { %1668 = vmatpush1.bf16.msra.mxu0 %v3204_v0  ;;  %1832 = vmatpush1.bf16.msra.mxu1 %v3205_v1  ;;  %v3289_v0 = vld [vmem:[%s4832_s1 + $0x368] ss:$16 sps:$4 sm:$0xff]   ;;  %v3294_v1 = vld [vmem:[%s4832_s1 + $0x384] ss:$16 sps:$4 sm:$0xff]  }
  0x38   :  { %1669 = vmatprep.subr.bf16.mxu0 %v3206_v2  ;;  %1833 = vmatprep.subr.bf16.mxu1 %v3208_v3  ;;  %v3297_v2 = vld [vmem:[%s4832_s1 + $0x38c] ss:$16 sps:$4 sm:$0xff]   ;;  %v3292_v3 = vld [vmem:[%s4832_s1 + $0x380] ss:$16 sps:$4 sm:$0xff]  }
  0x3b   :  { %1670 = vmatpush1.bf16.msra.mxu0 %v3210_v5  ;;  %1834 = vmatpush1.bf16.msra.mxu1 %v3211_v6  ;;  %v3300_v5 = vld [vmem:[%s4832_s1 + $0x3a4] ss:$16 sps:$4 sm:$0xff]   ;;  %v3303_v6 = vld [vmem:[%s4832_s1 + $0x3ac] ss:$16 sps:$4 sm:$0xff]  }
  0x3c   :  { %1671 = vmatprep.subr.bf16.mxu0 %v3212_v7  ;;  %1835 = vmatprep.subr.bf16.mxu1 %v3214_v8  ;;  %v3298_v7 = vld [vmem:[%s4832_s1 + $0x3a0] ss:$16 sps:$4 sm:$0xff]   ;;  %v3301_v8 = vld [vmem:[%s4832_s1 + $0x3a8] ss:$16 sps:$4 sm:$0xff]  }
  0x3f   :  { %1672 = vmatpush1.bf16.msra.mxu0 %v3216_v10  ;;  %1836 = vmatpush1.bf16.msra.mxu1 %v3217_v11  ;;  %v3306_v10 = vld [vmem:[%s4832_s1 + $0x3c4] ss:$16 sps:$4 sm:$0xff]   ;;  %v3309_v11 = vld [vmem:[%s4832_s1 + $0x3cc] ss:$16 sps:$4 sm:$0xff]  }
  0x40   :  { %1682 = vmatprep.subr.bf16.mxu0 %v3222_v12  ;;  %1846 = vmatprep.subr.bf16.mxu1 %v3225_v13  ;;  %v4081_v12 = vld [vmem:[%s4833_s0 + $0x8] sm:$0xff]  ;;  %v3304_v13 = vld [vmem:[%s4832_s1 + $0x3c0] ss:$16 sps:$4 sm:$0xff]  }
  0x42   :  { %1674 = vmatmul.mubr.bf16.vlgmr.msra.gmra.mrb[0].mxu0 %v75_v15  ;;  %1838 = vmatmul.mubr.bf16.vlgmr.msra.gmra.mrb[0].mxu1 %v75_v15  ;;  %v3312_v15 = vld [vmem:[%s4832_s1 + $0x3e4] ss:$16 sps:$4 sm:$0xff]  }
  0x43   :  { %1683 = vmatpush1.bf16.msra.mxu0 %v3220_v16  ;;  %1847 = vmatpush1.bf16.msra.mxu1 %v3223_v17  ;;  %v3315_v16 = vld [vmem:[%s4832_s1 + $0x3ec] ss:$16 sps:$4 sm:$0xff]   ;;  %v4097_v17 = vrot.slane %v4081_v12, %v3833_v49 }
  0x44   :  { %1684 = vmatprep.subr.bf16.mxu0 %v3228_v18  ;;  %1848 = vmatprep.subr.bf16.mxu1 %v3231_v19  ;;  %v3310_v18 = vld [vmem:[%s4832_s1 + $0x3e0] ss:$16 sps:$4 sm:$0xff]   ;;  %v3313_v19 = vld [vmem:[%s4832_s1 + $0x3e8] ss:$16 sps:$4 sm:$0xff]  }
  0x45   :  { %1714 = vmatprep.mubr.bf16.mxu0 %v78_v20  ;;  %1878 = vmatprep.mubr.bf16.mxu1 %v78_v20  ;;  %v3318_v20 = vld [vmem:[%s4832_s1 + $0x404] ss:$16 sps:$4 sm:$0xff]  }
  0x47   :  { %1685 = vmatpush1.bf16.msra.mxu0 %v3226_v21  ;;  %1849 = vmatpush1.bf16.msra.mxu1 %v3229_v22  ;;  %v3321_v21 = vld [vmem:[%s4832_s1 + $0x40c] ss:$16 sps:$4 sm:$0xff]   ;;  %v65_v22 = vcombine.high %v4097_v17, %v4097_v17 }
  0x48   :  { %1686 = vmatprep.subr.bf16.mxu0 %v3234_v23  ;;  %1850 = vmatprep.subr.bf16.mxu1 %v3237_v24  ;;  %v77_v23 = vpack.c.bf16 %v3894_v9, %v3894_v9  ;;  %v3316_v24 = vld [vmem:[%s4832_s1 + $0x400] ss:$16 sps:$4 sm:$0xff]   ;;  %v3327_v9 = vld [vmem:[%s4832_s1 + $0x42c] ss:$16 sps:$4 sm:$0xff]  }
  0x4b   :  { %1687 = vmatpush1.bf16.msra.mxu0 %v3232_v25  ;;  %1851 = vmatpush1.bf16.msra.mxu1 %v3235_v26  ;;  %v3319_v25 = vld [vmem:[%s4832_s1 + $0x408] ss:$16 sps:$4 sm:$0xff]   ;;  %v3324_v26 = vld [vmem:[%s4832_s1 + $0x424] ss:$16 sps:$4 sm:$0xff]  }
  0x4c   :  { %1688 = vmatprep.subr.bf16.mxu0 %v3240_v27  ;;  %1852 = vmatprep.subr.bf16.mxu1 %v3243_v28  ;;  %v80_v27 = vpack.c.bf16 %v65_v22, %v65_v22  ;;  %v3322_v28 = vld [vmem:[%s4832_s1 + $0x420] ss:$16 sps:$4 sm:$0xff]  }
  0x4d   :  { %v3400_v22 = vld [vmem:[%s4832_s1 + $0x5c0] ss:$16 sps:$4 sm:$0xff]  }
  0x4f   :  { %1689 = vmatpush1.bf16.msra.mxu0 %v3238_v29  ;;  %1853 = vmatpush1.bf16.msra.mxu1 %v3241_v30  ;;  %v3325_v29 = vld [vmem:[%s4832_s1 + $0x428] ss:$16 sps:$4 sm:$0xff]   ;;  %v3330_v30 = vld [vmem:[%s4832_s1 + $0x444] ss:$16 sps:$4 sm:$0xff]  }
  0x50   :  { %1690 = vmatprep.subr.bf16.mxu0 %v3246_v31  ;;  %1854 = vmatprep.subr.bf16.mxu1 %v3249_v32  ;;  %v3333_v31 = vld [vmem:[%s4832_s1 + $0x44c] ss:$16 sps:$4 sm:$0xff]   ;;  %v3328_v32 = vld [vmem:[%s4832_s1 + $0x440] ss:$16 sps:$4 sm:$0xff]  }
  0x53   :  { %1691 = vmatpush1.bf16.msra.mxu0 %v3244_v33  ;;  %1855 = vmatpush1.bf16.msra.mxu1 %v3247_v34  ;;  %v3331_v33 = vld [vmem:[%s4832_s1 + $0x448] ss:$16 sps:$4 sm:$0xff]   ;;  %v3336_v34 = vld [vmem:[%s4832_s1 + $0x464] ss:$16 sps:$4 sm:$0xff]  }
  0x54   :  { %1692 = vmatprep.subr.bf16.mxu0 %v3252_v35  ;;  %1856 = vmatprep.subr.bf16.mxu1 %v3255_v36  ;;  %v3339_v35 = vld [vmem:[%s4832_s1 + $0x46c] ss:$16 sps:$4 sm:$0xff]   ;;  %v3334_v36 = vld [vmem:[%s4832_s1 + $0x460] ss:$16 sps:$4 sm:$0xff]  }
  0x57   :  { %1693 = vmatpush1.bf16.msra.mxu0 %v3250_v37  ;;  %1857 = vmatpush1.bf16.msra.mxu1 %v3253_v38  ;;  %v3337_v37 = vld [vmem:[%s4832_s1 + $0x468] ss:$16 sps:$4 sm:$0xff]   ;;  %v3342_v38 = vld [vmem:[%s4832_s1 + $0x484] ss:$16 sps:$4 sm:$0xff]  }
  0x58   :  { %1694 = vmatprep.subr.bf16.mxu0 %v3258_v39  ;;  %1858 = vmatprep.subr.bf16.mxu1 %v3261_v40  ;;  %v3345_v39 = vld [vmem:[%s4832_s1 + $0x48c] ss:$16 sps:$4 sm:$0xff]   ;;  %v3340_v40 = vld [vmem:[%s4832_s1 + $0x480] ss:$16 sps:$4 sm:$0xff]  }
  0x5b   :  { %1695 = vmatpush1.bf16.msra.mxu0 %v3256_v41  ;;  %1859 = vmatpush1.bf16.msra.mxu1 %v3259_v42  ;;  %v3343_v41 = vld [vmem:[%s4832_s1 + $0x488] ss:$16 sps:$4 sm:$0xff]   ;;  %v3348_v42 = vld [vmem:[%s4832_s1 + $0x4a4] ss:$16 sps:$4 sm:$0xff]  }
  0x5c   :  { %1696 = vmatprep.subr.bf16.mxu0 %v3264_v44  ;;  %1860 = vmatprep.subr.bf16.mxu1 %v3267_v45  ;;  %v3351_v44 = vld [vmem:[%s4832_s1 + $0x4ac] ss:$16 sps:$4 sm:$0xff]   ;;  %v3346_v45 = vld [vmem:[%s4832_s1 + $0x4a0] ss:$16 sps:$4 sm:$0xff]  }
  0x5f   :  { %1697 = vmatpush1.bf16.msra.mxu0 %v3262_v46  ;;  %1861 = vmatpush1.bf16.msra.mxu1 %v3265_v47  ;;  %v3349_v46 = vld [vmem:[%s4832_s1 + $0x4a8] ss:$16 sps:$4 sm:$0xff]   ;;  %v3354_v47 = vld [vmem:[%s4832_s1 + $0x4c4] ss:$16 sps:$4 sm:$0xff]  }
  0x60   :  { %1698 = vmatprep.subr.bf16.mxu0 %v3270_v48  ;;  %1862 = vmatprep.subr.bf16.mxu1 %v3273_v50  ;;  %v3357_v48 = vld [vmem:[%s4832_s1 + $0x4cc] ss:$16 sps:$4 sm:$0xff]   ;;  %v3352_v50 = vld [vmem:[%s4832_s1 + $0x4c0] ss:$16 sps:$4 sm:$0xff]  }
  0x63   :  { %1699 = vmatpush1.bf16.msra.mxu0 %v3268_v51  ;;  %1863 = vmatpush1.bf16.msra.mxu1 %v3271_v52  ;;  %v3355_v51 = vld [vmem:[%s4832_s1 + $0x4c8] ss:$16 sps:$4 sm:$0xff]   ;;  %v3360_v52 = vld [vmem:[%s4832_s1 + $0x4e4] ss:$16 sps:$4 sm:$0xff]  }
  0x64   :  { %1700 = vmatprep.subr.bf16.mxu0 %v3276_v53  ;;  %1864 = vmatprep.subr.bf16.mxu1 %v3279_v54  ;;  %v3363_v53 = vld [vmem:[%s4832_s1 + $0x4ec] ss:$16 sps:$4 sm:$0xff]   ;;  %v3358_v54 = vld [vmem:[%s4832_s1 + $0x4e0] ss:$16 sps:$4 sm:$0xff]  }
  0x67   :  { %1701 = vmatpush1.bf16.msra.mxu0 %v3274_v55  ;;  %1865 = vmatpush1.bf16.msra.mxu1 %v3277_v56  ;;  %v3361_v55 = vld [vmem:[%s4832_s1 + $0x4e8] ss:$16 sps:$4 sm:$0xff]   ;;  %v3366_v56 = vld [vmem:[%s4832_s1 + $0x504] ss:$16 sps:$4 sm:$0xff]  }
  0x68   :  { %1702 = vmatprep.subr.bf16.mxu0 %v3282_v57  ;;  %1866 = vmatprep.subr.bf16.mxu1 %v3285_v58  ;;  %v3369_v57 = vld [vmem:[%s4832_s1 + $0x50c] ss:$16 sps:$4 sm:$0xff]   ;;  %v3364_v58 = vld [vmem:[%s4832_s1 + $0x500] ss:$16 sps:$4 sm:$0xff]  }
  0x6b   :  { %1703 = vmatpush1.bf16.msra.mxu0 %v3280_v59  ;;  %1867 = vmatpush1.bf16.msra.mxu1 %v3283_v60  ;;  %v3367_v59 = vld [vmem:[%s4832_s1 + $0x508] ss:$16 sps:$4 sm:$0xff]   ;;  %v3372_v60 = vld [vmem:[%s4832_s1 + $0x524] ss:$16 sps:$4 sm:$0xff]  }
  0x6c   :  { %1704 = vmatprep.subr.bf16.mxu0 %v3288_v61  ;;  %1868 = vmatprep.subr.bf16.mxu1 %v3291_v62  ;;  %v3375_v61 = vld [vmem:[%s4832_s1 + $0x52c] ss:$16 sps:$4 sm:$0xff]   ;;  %v3370_v62 = vld [vmem:[%s4832_s1 + $0x520] ss:$16 sps:$4 sm:$0xff]  }
  0x6f   :  { %1705 = vmatpush1.bf16.msra.mxu0 %v3286_v63  ;;  %1869 = vmatpush1.bf16.msra.mxu1 %v3289_v0  ;;  %v3373_v63 = vld [vmem:[%s4832_s1 + $0x528] ss:$16 sps:$4 sm:$0xff]   ;;  %v3378_v0 = vld [vmem:[%s4832_s1 + $0x544] ss:$16 sps:$4 sm:$0xff]  }
  0x70   :  { %1706 = vmatprep.subr.bf16.mxu0 %v3294_v1  ;;  %1870 = vmatprep.subr.bf16.mxu1 %v3297_v2  ;;  %v3381_v1 = vld [vmem:[%s4832_s1 + $0x54c] ss:$16 sps:$4 sm:$0xff]   ;;  %v3376_v2 = vld [vmem:[%s4832_s1 + $0x540] ss:$16 sps:$4 sm:$0xff]  }
  0x73   :  { %1707 = vmatpush1.bf16.msra.mxu0 %v3292_v3  ;;  %1871 = vmatpush1.bf16.msra.mxu1 %v3295_v4  ;;  %v3379_v3 = vld [vmem:[%s4832_s1 + $0x548] ss:$16 sps:$4 sm:$0xff]   ;;  %v3384_v4 = vld [vmem:[%s4832_s1 + $0x564] ss:$16 sps:$4 sm:$0xff]  }
  0x74   :  { %1708 = vmatprep.subr.bf16.mxu0 %v3300_v5  ;;  %1872 = vmatprep.subr.bf16.mxu1 %v3303_v6  ;;  %v3387_v5 = vld [vmem:[%s4832_s1 + $0x56c] ss:$16 sps:$4 sm:$0xff]   ;;  %v3382_v6 = vld [vmem:[%s4832_s1 + $0x560] ss:$16 sps:$4 sm:$0xff]  }
  0x77   :  { %1709 = vmatpush1.bf16.msra.mxu0 %v3298_v7  ;;  %1873 = vmatpush1.bf16.msra.mxu1 %v3301_v8  ;;  %v3385_v7 = vld [vmem:[%s4832_s1 + $0x568] ss:$16 sps:$4 sm:$0xff]   ;;  %v3390_v8 = vld [vmem:[%s4832_s1 + $0x584] ss:$16 sps:$4 sm:$0xff]  }
  0x78   :  { %1710 = vmatprep.subr.bf16.mxu0 %v3306_v10  ;;  %1874 = vmatprep.subr.bf16.mxu1 %v3309_v11  ;;  %v3393_v10 = vld [vmem:[%s4832_s1 + $0x58c] ss:$16 sps:$4 sm:$0xff]   ;;  %v3388_v11 = vld [vmem:[%s4832_s1 + $0x580] ss:$16 sps:$4 sm:$0xff]  }
  0x7b   :  { %1711 = vmatpush1.bf16.msra.mxu0 %v3304_v13  ;;  %1875 = vmatpush1.bf16.msra.mxu1 %v3307_v14  ;;  %v3391_v13 = vld [vmem:[%s4832_s1 + $0x588] ss:$16 sps:$4 sm:$0xff]   ;;  %v3396_v14 = vld [vmem:[%s4832_s1 + $0x5a4] ss:$16 sps:$4 sm:$0xff]  }
  0x7c   :  { %1712 = vmatprep.subr.bf16.mxu0 %v3312_v15  ;;  %1876 = vmatprep.subr.bf16.mxu1 %v3315_v16  ;;  %v3399_v15 = vld [vmem:[%s4832_s1 + $0x5ac] ss:$16 sps:$4 sm:$0xff]   ;;  %v3394_v16 = vld [vmem:[%s4832_s1 + $0x5a0] ss:$16 sps:$4 sm:$0xff]  }
  0x7f   :  { %1713 = vmatpush1.bf16.msra.mxu0 %v3310_v18  ;;  %1877 = vmatpush1.bf16.msra.mxu1 %v3313_v19  ;;  %v3397_v18 = vld [vmem:[%s4832_s1 + $0x5a8] ss:$16 sps:$4 sm:$0xff]   ;;  %v3402_v19 = vld [vmem:[%s4832_s1 + $0x5c4] ss:$16 sps:$4 sm:$0xff]  }
  0x80   :  { %1723 = vmatprep.subr.bf16.mxu0 %v3318_v20  ;;  %1887 = vmatprep.subr.bf16.mxu1 %v3321_v21  ;;  %v3405_v20 = vld [vmem:[%s4832_s1 + $0x5cc] ss:$16 sps:$4 sm:$0xff]   ;;  %v50_v21 = vcombine.high %v4081_v12, %v4081_v12 }
  0x81   :  { %v3411_v12 = vld [vmem:[%s4832_s1 + $0x5ec] ss:$16 sps:$4 sm:$0xff]  }
  0x82   :  { %1715 = vmatmul.mubr.bf16.vlgmr.msra.gmra.mrb[0].mxu0 %v77_v23  ;;  %1879 = vmatmul.mubr.bf16.vlgmr.msra.gmra.mrb[0].mxu1 %v77_v23  ;;  %v3403_v23 = vld [vmem:[%s4832_s1 + $0x5c8] ss:$16 sps:$4 sm:$0xff]  }
  0x83   :  { %1724 = vmatpush1.bf16.msra.mxu0 %v3316_v24  ;;  %1888 = vmatpush1.bf16.msra.mxu1 %v3319_v25  ;;  %v3408_v24 = vld [vmem:[%s4832_s1 + $0x5e4] ss:$16 sps:$4 sm:$0xff]   ;;  %v4298_v25 = vrot.slane %v50_v21, %v3833_v49  ;;  %v3417_v49 = vld [vmem:[%s4832_s1 + $0x60c] ss:$16 sps:$4 sm:$0xff]  }
  0x84   :  { %1725 = vmatprep.subr.bf16.mxu0 %v3324_v26  ;;  %1889 = vmatprep.subr.bf16.mxu1 %v3327_v9  ;;  %v3406_v26 = vld [vmem:[%s4832_s1 + $0x5e0] ss:$16 sps:$4 sm:$0xff]   ;;  %v3409_v9 = vld [vmem:[%s4832_s1 + $0x5e8] ss:$16 sps:$4 sm:$0xff]   ;;  %v3492_v21 = vld [vmem:[%s4832_s1 + $0x7a4] ss:$16 sps:$4 sm:$0xff]  }
  0x85   :  { %1755 = vmatprep.mubr.bf16.mxu0 %v80_v27  ;;  %1919 = vmatprep.mubr.bf16.mxu1 %v80_v27  ;;  %v3414_v27 = vld [vmem:[%s4832_s1 + $0x604] ss:$16 sps:$4 sm:$0xff]  }
  0x87   :  { %1726 = vmatpush1.bf16.msra.mxu0 %v3322_v28  ;;  %1890 = vmatpush1.bf16.msra.mxu1 %v3325_v29  ;;  %v3412_v28 = vld [vmem:[%s4832_s1 + $0x600] ss:$16 sps:$4 sm:$0xff]   ;;  %v3415_v29 = vld [vmem:[%s4832_s1 + $0x608] ss:$16 sps:$4 sm:$0xff]  }
  0x88   :  { %1727 = vmatprep.subr.bf16.mxu0 %v3330_v30  ;;  %1891 = vmatprep.subr.bf16.mxu1 %v3333_v31  ;;  %v66_v30 = vcombine.high %v4298_v25, %v4298_v25  ;;  %v79_v31 = vpack.c.bf16 %v4097_v17, %v4097_v17  ;;  %v3421_v17 = vld [vmem:[%s4832_s1 + $0x628] ss:$16 sps:$4 sm:$0xff]  }
  0x8b   :  { %1728 = vmatpush1.bf16.msra.mxu0 %v3328_v32  ;;  %1892 = vmatpush1.bf16.msra.mxu1 %v3331_v33  ;;  %v3420_v32 = vld [vmem:[%s4832_s1 + $0x624] ss:$16 sps:$4 sm:$0xff]   ;;  %v3423_v33 = vld [vmem:[%s4832_s1 + $0x62c] ss:$16 sps:$4 sm:$0xff]  }
  0x8c   :  { %1729 = vmatprep.subr.bf16.mxu0 %v3336_v34  ;;  %1893 = vmatprep.subr.bf16.mxu1 %v3339_v35  ;;  %v3418_v34 = vld [vmem:[%s4832_s1 + $0x620] ss:$16 sps:$4 sm:$0xff]   ;;  %v82_v35 = vpack.c.bf16 %v66_v30, %v66_v30  ;;  %v3505_v30 = vld [vmem:[%s4832_s1 + $0x7e8] ss:$16 sps:$4 sm:$0xff]  }
  0x8f   :  { %1730 = vmatpush1.bf16.msra.mxu0 %v3334_v36  ;;  %1894 = vmatpush1.bf16.msra.mxu1 %v3337_v37  ;;  %v3426_v36 = vld [vmem:[%s4832_s1 + $0x644] ss:$16 sps:$4 sm:$0xff]   ;;  %v3429_v37 = vld [vmem:[%s4832_s1 + $0x64c] ss:$16 sps:$4 sm:$0xff]  }
  0x90   :  { %1731 = vmatprep.subr.bf16.mxu0 %v3342_v38  ;;  %1895 = vmatprep.subr.bf16.mxu1 %v3345_v39  ;;  %v3424_v38 = vld [vmem:[%s4832_s1 + $0x640] ss:$16 sps:$4 sm:$0xff]   ;;  %v3427_v39 = vld [vmem:[%s4832_s1 + $0x648] ss:$16 sps:$4 sm:$0xff]  }
  0x93   :  { %1732 = vmatpush1.bf16.msra.mxu0 %v3340_v40  ;;  %1896 = vmatpush1.bf16.msra.mxu1 %v3343_v41  ;;  %v3432_v40 = vld [vmem:[%s4832_s1 + $0x664] ss:$16 sps:$4 sm:$0xff]   ;;  %v3435_v41 = vld [vmem:[%s4832_s1 + $0x66c] ss:$16 sps:$4 sm:$0xff]  }
  0x94   :  { %1733 = vmatprep.subr.bf16.mxu0 %v3348_v42  ;;  %1897 = vmatprep.subr.bf16.mxu1 %v3351_v44  ;;  %v3430_v42 = vld [vmem:[%s4832_s1 + $0x660] ss:$16 sps:$4 sm:$0xff]   ;;  %v3433_v44 = vld [vmem:[%s4832_s1 + $0x668] ss:$16 sps:$4 sm:$0xff]  }
  0x97   :  { %1734 = vmatpush1.bf16.msra.mxu0 %v3346_v45  ;;  %1898 = vmatpush1.bf16.msra.mxu1 %v3349_v46  ;;  %v3438_v45 = vld [vmem:[%s4832_s1 + $0x684] ss:$16 sps:$4 sm:$0xff]   ;;  %v3441_v46 = vld [vmem:[%s4832_s1 + $0x68c] ss:$16 sps:$4 sm:$0xff]  }
  0x98   :  { %1735 = vmatprep.subr.bf16.mxu0 %v3354_v47  ;;  %1899 = vmatprep.subr.bf16.mxu1 %v3357_v48  ;;  %v3436_v47 = vld [vmem:[%s4832_s1 + $0x680] ss:$16 sps:$4 sm:$0xff]   ;;  %v3439_v48 = vld [vmem:[%s4832_s1 + $0x688] ss:$16 sps:$4 sm:$0xff]  }
  0x9b   :  { %1736 = vmatpush1.bf16.msra.mxu0 %v3352_v50  ;;  %1900 = vmatpush1.bf16.msra.mxu1 %v3355_v51  ;;  %v3444_v50 = vld [vmem:[%s4832_s1 + $0x6a4] ss:$16 sps:$4 sm:$0xff]   ;;  %v3447_v51 = vld [vmem:[%s4832_s1 + $0x6ac] ss:$16 sps:$4 sm:$0xff]  }
  0x9c   :  { %1737 = vmatprep.subr.bf16.mxu0 %v3360_v52  ;;  %1901 = vmatprep.subr.bf16.mxu1 %v3363_v53  ;;  %v3442_v52 = vld [vmem:[%s4832_s1 + $0x6a0] ss:$16 sps:$4 sm:$0xff]   ;;  %v3445_v53 = vld [vmem:[%s4832_s1 + $0x6a8] ss:$16 sps:$4 sm:$0xff]  }
  0x9f   :  { %1738 = vmatpush1.bf16.msra.mxu0 %v3358_v54  ;;  %1902 = vmatpush1.bf16.msra.mxu1 %v3361_v55  ;;  %v3450_v54 = vld [vmem:[%s4832_s1 + $0x6c4] ss:$16 sps:$4 sm:$0xff]   ;;  %v3453_v55 = vld [vmem:[%s4832_s1 + $0x6cc] ss:$16 sps:$4 sm:$0xff]  }
  0xa0   :  { %1739 = vmatprep.subr.bf16.mxu0 %v3366_v56  ;;  %1903 = vmatprep.subr.bf16.mxu1 %v3369_v57  ;;  %v3448_v56 = vld [vmem:[%s4832_s1 + $0x6c0] ss:$16 sps:$4 sm:$0xff]   ;;  %v3451_v57 = vld [vmem:[%s4832_s1 + $0x6c8] ss:$16 sps:$4 sm:$0xff]  }
  0xa3   :  { %1740 = vmatpush1.bf16.msra.mxu0 %v3364_v58  ;;  %1904 = vmatpush1.bf16.msra.mxu1 %v3367_v59  ;;  %v3456_v58 = vld [vmem:[%s4832_s1 + $0x6e4] ss:$16 sps:$4 sm:$0xff]   ;;  %v3459_v59 = vld [vmem:[%s4832_s1 + $0x6ec] ss:$16 sps:$4 sm:$0xff]  }
  0xa4   :  { %1741 = vmatprep.subr.bf16.mxu0 %v3372_v60  ;;  %1905 = vmatprep.subr.bf16.mxu1 %v3375_v61  ;;  %v3454_v60 = vld [vmem:[%s4832_s1 + $0x6e0] ss:$16 sps:$4 sm:$0xff]   ;;  %v3457_v61 = vld [vmem:[%s4832_s1 + $0x6e8] ss:$16 sps:$4 sm:$0xff]  }
  0xa7   :  { %1742 = vmatpush1.bf16.msra.mxu0 %v3370_v62  ;;  %1906 = vmatpush1.bf16.msra.mxu1 %v3373_v63  ;;  %v3462_v62 = vld [vmem:[%s4832_s1 + $0x704] ss:$16 sps:$4 sm:$0xff]   ;;  %v3465_v63 = vld [vmem:[%s4832_s1 + $0x70c] ss:$16 sps:$4 sm:$0xff]  }
  0xa8   :  { %1743 = vmatprep.subr.bf16.mxu0 %v3378_v0  ;;  %1907 = vmatprep.subr.bf16.mxu1 %v3381_v1  ;;  %v3460_v0 = vld [vmem:[%s4832_s1 + $0x700] ss:$16 sps:$4 sm:$0xff]   ;;  %v3463_v1 = vld [vmem:[%s4832_s1 + $0x708] ss:$16 sps:$4 sm:$0xff]  }
  0xab   :  { %1744 = vmatpush1.bf16.msra.mxu0 %v3376_v2  ;;  %1908 = vmatpush1.bf16.msra.mxu1 %v3379_v3  ;;  %v3468_v2 = vld [vmem:[%s4832_s1 + $0x724] ss:$16 sps:$4 sm:$0xff]   ;;  %v3471_v3 = vld [vmem:[%s4832_s1 + $0x72c] ss:$16 sps:$4 sm:$0xff]  }
  0xac   :  { %1745 = vmatprep.subr.bf16.mxu0 %v3384_v4  ;;  %1909 = vmatprep.subr.bf16.mxu1 %v3387_v5  ;;  %v3466_v4 = vld [vmem:[%s4832_s1 + $0x720] ss:$16 sps:$4 sm:$0xff]   ;;  %v3469_v5 = vld [vmem:[%s4832_s1 + $0x728] ss:$16 sps:$4 sm:$0xff]  }
  0xaf   :  { %1746 = vmatpush1.bf16.msra.mxu0 %v3382_v6  ;;  %1910 = vmatpush1.bf16.msra.mxu1 %v3385_v7  ;;  %v3474_v6 = vld [vmem:[%s4832_s1 + $0x744] ss:$16 sps:$4 sm:$0xff]   ;;  %v3477_v7 = vld [vmem:[%s4832_s1 + $0x74c] ss:$16 sps:$4 sm:$0xff]  }
  0xb0   :  { %1747 = vmatprep.subr.bf16.mxu0 %v3390_v8  ;;  %1911 = vmatprep.subr.bf16.mxu1 %v3393_v10  ;;  %v3472_v8 = vld [vmem:[%s4832_s1 + $0x740] ss:$16 sps:$4 sm:$0xff]   ;;  %v3475_v10 = vld [vmem:[%s4832_s1 + $0x748] ss:$16 sps:$4 sm:$0xff]  }
  0xb3   :  { %1748 = vmatpush1.bf16.msra.mxu0 %v3388_v11  ;;  %1912 = vmatpush1.bf16.msra.mxu1 %v3391_v13  ;;  %v3480_v11 = vld [vmem:[%s4832_s1 + $0x764] ss:$16 sps:$4 sm:$0xff]   ;;  %v3483_v13 = vld [vmem:[%s4832_s1 + $0x76c] ss:$16 sps:$4 sm:$0xff]  }
  0xb4   :  { %1749 = vmatprep.subr.bf16.mxu0 %v3396_v14  ;;  %1913 = vmatprep.subr.bf16.mxu1 %v3399_v15  ;;  %v3478_v14 = vld [vmem:[%s4832_s1 + $0x760] ss:$16 sps:$4 sm:$0xff]   ;;  %v3481_v15 = vld [vmem:[%s4832_s1 + $0x768] ss:$16 sps:$4 sm:$0xff]  }
  0xb7   :  { %1750 = vmatpush1.bf16.msra.mxu0 %v3394_v16  ;;  %1914 = vmatpush1.bf16.msra.mxu1 %v3397_v18  ;;  %v3486_v16 = vld [vmem:[%s4832_s1 + $0x784] ss:$16 sps:$4 sm:$0xff]   ;;  %v3489_v18 = vld [vmem:[%s4832_s1 + $0x78c] ss:$16 sps:$4 sm:$0xff]  }
  0xb8   :  { %1751 = vmatprep.subr.bf16.mxu0 %v3402_v19  ;;  %1915 = vmatprep.subr.bf16.mxu1 %v3405_v20  ;;  %v3484_v19 = vld [vmem:[%s4832_s1 + $0x780] ss:$16 sps:$4 sm:$0xff]   ;;  %v3487_v20 = vld [vmem:[%s4832_s1 + $0x788] ss:$16 sps:$4 sm:$0xff]  }
  0xbb   :  { %1752 = vmatpush1.bf16.msra.mxu0 %v3400_v22  ;;  %1916 = vmatpush1.bf16.msra.mxu1 %v3403_v23  ;;  %v3495_v22 = vld [vmem:[%s4832_s1 + $0x7ac] ss:$16 sps:$4 sm:$0xff]   ;;  %v3490_v23 = vld [vmem:[%s4832_s1 + $0x7a0] ss:$16 sps:$4 sm:$0xff]  }
  0xbc   :  { %1753 = vmatprep.subr.bf16.mxu0 %v3408_v24  ;;  %1917 = vmatprep.subr.bf16.mxu1 %v3411_v12  ;;  %v3493_v24 = vld [vmem:[%s4832_s1 + $0x7a8] ss:$16 sps:$4 sm:$0xff]   ;;  %v3498_v12 = vld [vmem:[%s4832_s1 + $0x7c4] ss:$16 sps:$4 sm:$0xff]  }
  0xbf   :  { %1754 = vmatpush1.bf16.msra.mxu0 %v3406_v26  ;;  %1918 = vmatpush1.bf16.msra.mxu1 %v3409_v9  ;;  %v3501_v26 = vld [vmem:[%s4832_s1 + $0x7cc] ss:$16 sps:$4 sm:$0xff]   ;;  %v3496_v9 = vld [vmem:[%s4832_s1 + $0x7c0] ss:$16 sps:$4 sm:$0xff]  }
  0xc0   :  { %1764 = vmatprep.subr.bf16.mxu0 %v3414_v27  ;;  %1928 = vmatprep.subr.bf16.mxu1 %v3417_v49  ;;  %v3499_v27 = vld [vmem:[%s4832_s1 + $0x7c8] ss:$16 sps:$4 sm:$0xff]   ;;  %v3504_v49 = vld [vmem:[%s4832_s1 + $0x7e4] ss:$16 sps:$4 sm:$0xff]  }
  0xc2   :  { %1756 = vmatmul.mubr.bf16.vlgmr.msra.gmra.mrb[0].mxu0 %v79_v31  ;;  %1920 = vmatmul.mubr.bf16.vlgmr.msra.gmra.mrb[0].mxu1 %v79_v31  ;;  %v3510_v31 = vld [vmem:[%s4834_s3 + $0x4] ss:$8 sps:$4 sm:$0xff]  }
  0xc3   :  { %1765 = vmatpush1.bf16.msra.mxu0 %v3412_v28  ;;  %1929 = vmatpush1.bf16.msra.mxu1 %v3415_v29  ;;  %v3507_v28 = vld [vmem:[%s4832_s1 + $0x7ec] ss:$16 sps:$4 sm:$0xff]   ;;  %v3502_v29 = vld [vmem:[%s4832_s1 + $0x7e0] ss:$16 sps:$4 sm:$0xff]  }
  0xc4   :  { %1766 = vmatprep.subr.bf16.mxu0 %v3420_v32  ;;  %1930 = vmatprep.subr.bf16.mxu1 %v3423_v33  ;;  %v81_v32 = vpack.c.bf16 %v4298_v25, %v4298_v25  ;;  %v3508_v33 = vld [vmem:[%s4834_s3] ss:$8 sps:$4 sm:$0xff]   ;;  %v3516_v25 = vld [vmem:[%s4834_s3 + $0x24] ss:$8 sps:$4 sm:$0xff]  }
  0xc5   :  { %1796 = vmatprep.mubr.bf16.mxu0 %v82_v35  ;;  %1960 = vmatprep.mubr.bf16.mxu1 %v82_v35  ;;  %v3514_v35 = vld [vmem:[%s4834_s3 + $0x20] ss:$8 sps:$4 sm:$0xff]  }
  0xc7   :  { %1767 = vmatpush1.bf16.msra.mxu0 %v3418_v34  ;;  %1931 = vmatpush1.bf16.msra.mxu1 %v3421_v17  ;;  %v3513_v34 = vld [vmem:[%s4834_s3 + $0x14] ss:$8 sps:$4 sm:$0xff]   ;;  %v3511_v17 = vld [vmem:[%s4834_s3 + $0x10] ss:$8 sps:$4 sm:$0xff]  }
  0xc8   :  { %1768 = vmatprep.subr.bf16.mxu0 %v3426_v36  ;;  %1932 = vmatprep.subr.bf16.mxu1 %v3429_v37  ;;  %v3519_v36 = vld [vmem:[%s4834_s3 + $0x34] ss:$8 sps:$4 sm:$0xff]   ;;  %v3517_v37 = vld [vmem:[%s4834_s3 + $0x30] ss:$8 sps:$4 sm:$0xff]  }
  0xcb   :  { %1769 = vmatpush1.bf16.msra.mxu0 %v3424_v38  ;;  %1933 = vmatpush1.bf16.msra.mxu1 %v3427_v39  ;;  %v3522_v38 = vld [vmem:[%s4834_s3 + $0x44] ss:$8 sps:$4 sm:$0xff]   ;;  %v3520_v39 = vld [vmem:[%s4834_s3 + $0x40] ss:$8 sps:$4 sm:$0xff]  }
  0xcc   :  { %1770 = vmatprep.subr.bf16.mxu0 %v3432_v40  ;;  %1934 = vmatprep.subr.bf16.mxu1 %v3435_v41  ;;  %v3525_v40 = vld [vmem:[%s4834_s3 + $0x54] ss:$8 sps:$4 sm:$0xff]   ;;  %v3523_v41 = vld [vmem:[%s4834_s3 + $0x50] ss:$8 sps:$4 sm:$0xff]  }
  0xcf   :  { %1771 = vmatpush1.bf16.msra.mxu0 %v3430_v42  ;;  %1935 = vmatpush1.bf16.msra.mxu1 %v3433_v44  ;;  %v3528_v42 = vld [vmem:[%s4834_s3 + $0x64] ss:$8 sps:$4 sm:$0xff]   ;;  %v3526_v44 = vld [vmem:[%s4834_s3 + $0x60] ss:$8 sps:$4 sm:$0xff]  }
  0xd0   :  { %1772 = vmatprep.subr.bf16.mxu0 %v3438_v45  ;;  %1936 = vmatprep.subr.bf16.mxu1 %v3441_v46  ;;  %v3531_v45 = vld [vmem:[%s4834_s3 + $0x74] ss:$8 sps:$4 sm:$0xff]   ;;  %v3529_v46 = vld [vmem:[%s4834_s3 + $0x70] ss:$8 sps:$4 sm:$0xff]  }
  0xd3   :  { %1773 = vmatpush1.bf16.msra.mxu0 %v3436_v47  ;;  %1937 = vmatpush1.bf16.msra.mxu1 %v3439_v48  ;;  %v3534_v47 = vld [vmem:[%s4834_s3 + $0x84] ss:$8 sps:$4 sm:$0xff]   ;;  %v3532_v48 = vld [vmem:[%s4834_s3 + $0x80] ss:$8 sps:$4 sm:$0xff]  }
  0xd4   :  { %1774 = vmatprep.subr.bf16.mxu0 %v3444_v50  ;;  %1938 = vmatprep.subr.bf16.mxu1 %v3447_v51  ;;  %v3537_v50 = vld [vmem:[%s4834_s3 + $0x94] ss:$8 sps:$4 sm:$0xff]   ;;  %v3535_v51 = vld [vmem:[%s4834_s3 + $0x90] ss:$8 sps:$4 sm:$0xff]  }
  0xd7   :  { %1775 = vmatpush1.bf16.msra.mxu0 %v3442_v52  ;;  %1939 = vmatpush1.bf16.msra.mxu1 %v3445_v53  ;;  %v3540_v52 = vld [vmem:[%s4834_s3 + $0xa4] ss:$8 sps:$4 sm:$0xff]   ;;  %v3538_v53 = vld [vmem:[%s4834_s3 + $0xa0] ss:$8 sps:$4 sm:$0xff]  }
  0xd8   :  { %1776 = vmatprep.subr.bf16.mxu0 %v3450_v54  ;;  %1940 = vmatprep.subr.bf16.mxu1 %v3453_v55  ;;  %v3543_v54 = vld [vmem:[%s4834_s3 + $0xb4] ss:$8 sps:$4 sm:$0xff]   ;;  %v3541_v55 = vld [vmem:[%s4834_s3 + $0xb0] ss:$8 sps:$4 sm:$0xff]  }
  0xdb   :  { %1777 = vmatpush1.bf16.msra.mxu0 %v3448_v56  ;;  %1941 = vmatpush1.bf16.msra.mxu1 %v3451_v57  ;;  %v3546_v56 = vld [vmem:[%s4834_s3 + $0xc4] ss:$8 sps:$4 sm:$0xff]   ;;  %v3544_v57 = vld [vmem:[%s4834_s3 + $0xc0] ss:$8 sps:$4 sm:$0xff]  }
  0xdc   :  { %1778 = vmatprep.subr.bf16.mxu0 %v3456_v58  ;;  %1942 = vmatprep.subr.bf16.mxu1 %v3459_v59  ;;  %v3549_v58 = vld [vmem:[%s4834_s3 + $0xd4] ss:$8 sps:$4 sm:$0xff]   ;;  %v3547_v59 = vld [vmem:[%s4834_s3 + $0xd0] ss:$8 sps:$4 sm:$0xff]  }
  0xdf   :  { %1779 = vmatpush1.bf16.msra.mxu0 %v3454_v60  ;;  %1943 = vmatpush1.bf16.msra.mxu1 %v3457_v61  ;;  %v3552_v60 = vld [vmem:[%s4834_s3 + $0xe4] ss:$8 sps:$4 sm:$0xff]   ;;  %v3550_v61 = vld [vmem:[%s4834_s3 + $0xe0] ss:$8 sps:$4 sm:$0xff]  }
  0xe0   :  { %1780 = vmatprep.subr.bf16.mxu0 %v3462_v62  ;;  %1944 = vmatprep.subr.bf16.mxu1 %v3465_v63  ;;  %v3555_v62 = vld [vmem:[%s4834_s3 + $0xf4] ss:$8 sps:$4 sm:$0xff]   ;;  %v3553_v63 = vld [vmem:[%s4834_s3 + $0xf0] ss:$8 sps:$4 sm:$0xff]  }
  0xe3   :  { %1781 = vmatpush1.bf16.msra.mxu0 %v3460_v0  ;;  %1945 = vmatpush1.bf16.msra.mxu1 %v3463_v1  ;;  %v3558_v0 = vld [vmem:[%s4834_s3 + $0x104] ss:$8 sps:$4 sm:$0xff]   ;;  %v3604_v1 = vld [vmem:[%s4835_s5] ss:$8 sps:$4 sm:$0xff]  }
  0xe4   :  { %1782 = vmatprep.subr.bf16.mxu0 %v3468_v2  ;;  %1946 = vmatprep.subr.bf16.mxu1 %v3471_v3  ;;  %v3606_v2 = vld [vmem:[%s4835_s5 + $0x4] ss:$8 sps:$4 sm:$0xff]   ;;  %v3609_v3 = vld [vmem:[%s4835_s5 + $0x14] ss:$8 sps:$4 sm:$0xff]  }
  0xe7   :  { %1783 = vmatpush1.bf16.msra.mxu0 %v3466_v4  ;;  %1947 = vmatpush1.bf16.msra.mxu1 %v3469_v5  ;;  %v3607_v4 = vld [vmem:[%s4835_s5 + $0x10] ss:$8 sps:$4 sm:$0xff]   ;;  %v3612_v5 = vld [vmem:[%s4835_s5 + $0x24] ss:$8 sps:$4 sm:$0xff]  }
  0xe8   :  { %1784 = vmatprep.subr.bf16.mxu0 %v3474_v6  ;;  %1948 = vmatprep.subr.bf16.mxu1 %v3477_v7  ;;  %v3610_v6 = vld [vmem:[%s4835_s5 + $0x20] ss:$8 sps:$4 sm:$0xff]   ;;  %v3615_v7 = vld [vmem:[%s4835_s5 + $0x34] ss:$8 sps:$4 sm:$0xff]  }
  0xeb   :  { %1785 = vmatpush1.bf16.msra.mxu0 %v3472_v8  ;;  %1949 = vmatpush1.bf16.msra.mxu1 %v3475_v10  ;;  %v3613_v8 = vld [vmem:[%s4835_s5 + $0x30] ss:$8 sps:$4 sm:$0xff]   ;;  %v3618_v10 = vld [vmem:[%s4835_s5 + $0x44] ss:$8 sps:$4 sm:$0xff]  }
  0xec   :  { %1786 = vmatprep.subr.bf16.mxu0 %v3480_v11  ;;  %1950 = vmatprep.subr.bf16.mxu1 %v3483_v13  ;;  %v3616_v11 = vld [vmem:[%s4835_s5 + $0x40] ss:$8 sps:$4 sm:$0xff]   ;;  %v3621_v13 = vld [vmem:[%s4835_s5 + $0x54] ss:$8 sps:$4 sm:$0xff]  }
  0xef   :  { %1787 = vmatpush1.bf16.msra.mxu0 %v3478_v14  ;;  %1951 = vmatpush1.bf16.msra.mxu1 %v3481_v15  ;;  %v3619_v14 = vld [vmem:[%s4835_s5 + $0x50] ss:$8 sps:$4 sm:$0xff]   ;;  %v3624_v15 = vld [vmem:[%s4835_s5 + $0x64] ss:$8 sps:$4 sm:$0xff]  }
  0xf0   :  { %1788 = vmatprep.subr.bf16.mxu0 %v3486_v16  ;;  %1952 = vmatprep.subr.bf16.mxu1 %v3489_v18  ;;  %v3622_v16 = vld [vmem:[%s4835_s5 + $0x60] ss:$8 sps:$4 sm:$0xff]   ;;  %v3627_v18 = vld [vmem:[%s4835_s5 + $0x74] ss:$8 sps:$4 sm:$0xff]  }
  0xf3   :  { %1789 = vmatpush1.bf16.msra.mxu0 %v3484_v19  ;;  %1953 = vmatpush1.bf16.msra.mxu1 %v3487_v20  ;;  %v3625_v19 = vld [vmem:[%s4835_s5 + $0x70] ss:$8 sps:$4 sm:$0xff]   ;;  %v3630_v20 = vld [vmem:[%s4835_s5 + $0x84] ss:$8 sps:$4 sm:$0xff]  }
  0xf4   :  { %1790 = vmatprep.subr.bf16.mxu0 %v3492_v21  ;;  %1954 = vmatprep.subr.bf16.mxu1 %v3495_v22  ;;  %v3628_v21 = vld [vmem:[%s4835_s5 + $0x80] ss:$8 sps:$4 sm:$0xff]   ;;  %v3633_v22 = vld [vmem:[%s4835_s5 + $0x94] ss:$8 sps:$4 sm:$0xff]  }
  0xf7   :  { %1791 = vmatpush1.bf16.msra.mxu0 %v3490_v23  ;;  %1955 = vmatpush1.bf16.msra.mxu1 %v3493_v24  ;;  %v3631_v23 = vld [vmem:[%s4835_s5 + $0x90] ss:$8 sps:$4 sm:$0xff]   ;;  %v3636_v24 = vld [vmem:[%s4835_s5 + $0xa4] ss:$8 sps:$4 sm:$0xff]  }
  0xf8   :  { %1792 = vmatprep.subr.bf16.mxu0 %v3498_v12  ;;  %1956 = vmatprep.subr.bf16.mxu1 %v3501_v26  ;;  %v3634_v12 = vld [vmem:[%s4835_s5 + $0xa0] ss:$8 sps:$4 sm:$0xff]   ;;  %v3639_v26 = vld [vmem:[%s4835_s5 + $0xb4] ss:$8 sps:$4 sm:$0xff]  }
  0xfb   :  { %1793 = vmatpush1.bf16.msra.mxu0 %v3496_v9  ;;  %1957 = vmatpush1.bf16.msra.mxu1 %v3499_v27  ;;  %v3637_v9 = vld [vmem:[%s4835_s5 + $0xb0] ss:$8 sps:$4 sm:$0xff]   ;;  %v3642_v27 = vld [vmem:[%s4835_s5 + $0xc4] ss:$8 sps:$4 sm:$0xff]  }
  0xfc   :  { %1794 = vmatprep.subr.bf16.mxu0 %v3504_v49  ;;  %1958 = vmatprep.subr.bf16.mxu1 %v3507_v28  ;;  %v4679_v49 = vsub.s32 0, %v3815_v43  ;;  %v4684_v28 = vld [vmem:[%s4836_s2] sm:$0xf] }
  0xff   :  { %1795 = vmatpush1.bf16.msra.mxu0 %v3502_v29  ;;  %1959 = vmatpush1.bf16.msra.mxu1 %v3505_v30  ;;  %v4687_v29 = vsub.s32 1, %v3815_v43  ;;  %v355_v30 = vsub.s32 3, %v3815_v43 }
 0x100   :  { %2373 = vmatprep.subr.bf16.mxu0 %v3510_v31  ;;  %2663 = vmatprep.subr.bf16.mxu1 %v3606_v2  ;;  %v3640_v31 = vld [vmem:[%s4835_s5 + $0xc0] ss:$8 sps:$4 sm:$0xff]  }
 0x101   :  { %v3574_v2 = vld [vmem:[%s4834_s3 + $0x160] ss:$8 sps:$4 sm:$0xff]  }
 0x102   :  { %1797 = vmatmul.mubr.bf16.vlgmr.msra.gmra.mrb[0].mxu0 %v81_v32  ;;  %1961 = vmatmul.mubr.bf16.vlgmr.msra.gmra.mrb[0].mxu1 %v81_v32  ;;  %v3645_v32 = vld [vmem:[%s4835_s5 + $0xd4] ss:$8 sps:$4 sm:$0xff]  }
 0x103   :  { %2374 = vmatpush1.bf16.msra.mxu0 %v3508_v33  ;;  %2664 = vmatpush1.bf16.msra.mxu1 %v3604_v1  ;;  %v344_v33 = vrot.slane %v4684_v28, %v4679_v49  ;;  %v3576_v1 = vld [vmem:[%s4834_s3 + $0x164] ss:$8 sps:$4 sm:$0xff]  }
 0x104   :  { %2375 = vmatprep.subr.bf16.mxu0 %v3513_v34  ;;  %2665 = vmatprep.subr.bf16.mxu1 %v3609_v3  ;;  %v348_v34 = vrot.slane %v4684_v28, %v4687_v29  ;;  %v3579_v3 = vld [vmem:[%s4834_s3 + $0x174] ss:$8 sps:$4 sm:$0xff]  }
 0x107   :  { %2376 = vmatpush1.bf16.msra.mxu0 %v3511_v17  ;;  %2666 = vmatpush1.bf16.msra.mxu1 %v3607_v4  ;;  %v356_v17 = vrot.slane %v4684_v28, %v355_v30  ;;  %v3577_v4 = vld [vmem:[%s4834_s3 + $0x170] ss:$8 sps:$4 sm:$0xff]   ;;  %v3651_v30 = vld [vmem:[%s4835_s5 + $0xf4] ss:$8 sps:$4 sm:$0xff]  }
 0x108   :  { %2377 = vmatprep.subr.bf16.mxu0 %v3516_v25  ;;  %2667 = vmatprep.subr.bf16.mxu1 %v3612_v5  ;;  %v3643_v25 = vld [vmem:[%s4835_s5 + $0xd0] ss:$8 sps:$4 sm:$0xff]   ;;  %v3582_v5 = vld [vmem:[%s4834_s3 + $0x184] ss:$8 sps:$4 sm:$0xff]  }
 0x10b   :  { %2378 = vmatpush1.bf16.msra.mxu0 %v3514_v35  ;;  %2668 = vmatpush1.bf16.msra.mxu1 %v3610_v6  ;;  %v3580_v6 = vld [vmem:[%s4834_s3 + $0x180] ss:$8 sps:$4 sm:$0xff]  }
 0x10c   :  { %2379 = vmatprep.subr.bf16.mxu0 %v3519_v36  ;;  %2669 = vmatprep.subr.bf16.mxu1 %v3615_v7  ;;  %v3585_v7 = vld [vmem:[%s4834_s3 + $0x194] ss:$8 sps:$4 sm:$0xff]  }
 0x10f   :  { %2380 = vmatpush1.bf16.msra.mxu0 %v3517_v37  ;;  %2670 = vmatpush1.bf16.msra.mxu1 %v3613_v8  ;;  %v3583_v8 = vld [vmem:[%s4834_s3 + $0x190] ss:$8 sps:$4 sm:$0xff]  }
 0x110   :  { %2381 = vmatprep.subr.bf16.mxu0 %v3522_v38  ;;  %2671 = vmatprep.subr.bf16.mxu1 %v3618_v10  ;;  %v3588_v10 = vld [vmem:[%s4834_s3 + $0x1a4] ss:$8 sps:$4 sm:$0xff]  }
 0x113   :  { %2382 = vmatpush1.bf16.msra.mxu0 %v3520_v39  ;;  %2672 = vmatpush1.bf16.msra.mxu1 %v3616_v11  ;;  %v3586_v11 = vld [vmem:[%s4834_s3 + $0x1a0] ss:$8 sps:$4 sm:$0xff]  }
 0x114   :  { %2383 = vmatprep.subr.bf16.mxu0 %v3525_v40  ;;  %2673 = vmatprep.subr.bf16.mxu1 %v3621_v13  ;;  %v3591_v13 = vld [vmem:[%s4834_s3 + $0x1b4] ss:$8 sps:$4 sm:$0xff]  }
 0x117   :  { %2384 = vmatpush1.bf16.msra.mxu0 %v3523_v41  ;;  %2674 = vmatpush1.bf16.msra.mxu1 %v3619_v14  ;;  %v3589_v14 = vld [vmem:[%s4834_s3 + $0x1b0] ss:$8 sps:$4 sm:$0xff]  }
 0x118   :  { %2385 = vmatprep.subr.bf16.mxu0 %v3528_v42  ;;  %2675 = vmatprep.subr.bf16.mxu1 %v3624_v15  ;;  %v3594_v15 = vld [vmem:[%s4834_s3 + $0x1c4] ss:$8 sps:$4 sm:$0xff]  }
 0x11b   :  { %2386 = vmatpush1.bf16.msra.mxu0 %v3526_v44  ;;  %2676 = vmatpush1.bf16.msra.mxu1 %v3622_v16  ;;  %v3592_v16 = vld [vmem:[%s4834_s3 + $0x1c0] ss:$8 sps:$4 sm:$0xff]  }
 0x11c   :  { %2387 = vmatprep.subr.bf16.mxu0 %v3531_v45  ;;  %2677 = vmatprep.subr.bf16.mxu1 %v3627_v18  ;;  %v351_v18 = vsub.s32 2, %v3815_v43  ;;  %v3598_v43 = vld [vmem:[%s4834_s3 + $0x1e0] ss:$8 sps:$4 sm:$0xff]  }
 0x11f   :  { %2388 = vmatpush1.bf16.msra.mxu0 %v3529_v46  ;;  %2678 = vmatpush1.bf16.msra.mxu1 %v3625_v19  ;;  %v3597_v19 = vld [vmem:[%s4834_s3 + $0x1d4] ss:$8 sps:$4 sm:$0xff]  }
 0x120   :  { %2389 = vmatprep.subr.bf16.mxu0 %v3534_v47  ;;  %2679 = vmatprep.subr.bf16.mxu1 %v3630_v20  ;;  %v3595_v20 = vld [vmem:[%s4834_s3 + $0x1d0] ss:$8 sps:$4 sm:$0xff]  }
 0x123   :  { %2390 = vmatpush1.bf16.msra.mxu0 %v3532_v48  ;;  %2680 = vmatpush1.bf16.msra.mxu1 %v3628_v21  ;;  %v352_v21 = vrot.slane %v4684_v28, %v351_v18  ;;  %v3646_v28 = vld [vmem:[%s4835_s5 + $0xe0] ss:$8 sps:$4 sm:$0xff]  }
 0x124   :  { %2391 = vmatprep.subr.bf16.mxu0 %v3537_v50  ;;  %2681 = vmatprep.subr.bf16.mxu1 %v3633_v22  ;;  %v3600_v22 = vld [vmem:[%s4834_s3 + $0x1e4] ss:$8 sps:$4 sm:$0xff]  }
 0x127   :  { %2392 = vmatpush1.bf16.msra.mxu0 %v3535_v51  ;;  %2682 = vmatpush1.bf16.msra.mxu1 %v3631_v23 }
 0x128   :  { %2393 = vmatprep.subr.bf16.mxu0 %v3540_v52  ;;  %2683 = vmatprep.subr.bf16.mxu1 %v3636_v24  ;;  %v3556_v52 = vld [vmem:[%s4834_s3 + $0x100] ss:$8 sps:$4 sm:$0xff]   ;;  %v3603_v24 = vld [vmem:[%s4834_s3 + $0x1f4] ss:$8 sps:$4 sm:$0xff]  }
 0x12b   :  { %2394 = vmatpush1.bf16.msra.mxu0 %v3538_v53  ;;  %2684 = vmatpush1.bf16.msra.mxu1 %v3634_v12  ;;  %v3601_v12 = vld [vmem:[%s4834_s3 + $0x1f0] ss:$8 sps:$4 sm:$0xff]  }
 0x12c   :  { %2395 = vmatprep.subr.bf16.mxu0 %v3543_v54  ;;  %2685 = vmatprep.subr.bf16.mxu1 %v3639_v26  ;;  %v3561_v54 = vld [vmem:[%s4834_s3 + $0x114] ss:$8 sps:$4 sm:$0xff]  }
 0x12f   :  { %2396 = vmatpush1.bf16.msra.mxu0 %v3541_v55  ;;  %2686 = vmatpush1.bf16.msra.mxu1 %v3637_v9 }
 0x130   :  { %2397 = vmatprep.subr.bf16.mxu0 %v3546_v56  ;;  %2687 = vmatprep.subr.bf16.mxu1 %v3642_v27  ;;  %v3559_v56 = vld [vmem:[%s4834_s3 + $0x110] ss:$8 sps:$4 sm:$0xff]   ;;  %v3648_v27 = vld [vmem:[%s4835_s5 + $0xe4] ss:$8 sps:$4 sm:$0xff]  }
 0x133   :  { %2398 = vmatpush1.bf16.msra.mxu0 %v3544_v57  ;;  %2688 = vmatpush1.bf16.msra.mxu1 %v3640_v31  ;;  %v3564_v57 = vld [vmem:[%s4834_s3 + $0x124] ss:$8 sps:$4 sm:$0xff]   ;;  %v3649_v31 = vld [vmem:[%s4835_s5 + $0xf0] ss:$8 sps:$4 sm:$0xff]  }
 0x134   :  { %2399 = vmatprep.subr.bf16.mxu0 %v3549_v58  ;;  %2689 = vmatprep.subr.bf16.mxu1 %v3645_v32  ;;  %v3562_v58 = vld [vmem:[%s4834_s3 + $0x120] ss:$8 sps:$4 sm:$0xff]  }
 0x135   :  { %v2041_v32 = vld [vmem:[%s4837_s4] sm:$0x3] }
 0x137   :  { %2400 = vmatpush1.bf16.msra.mxu0 %v3547_v59  ;;  %2690 = vmatpush1.bf16.msra.mxu1 %v3643_v25  ;;  %v3567_v59 = vld [vmem:[%s4834_s3 + $0x134] ss:$8 sps:$4 sm:$0xff]  }
 0x138   :  { %2401 = vmatprep.subr.bf16.mxu0 %v3552_v60  ;;  %v3565_v60 = vld [vmem:[%s4834_s3 + $0x130] ss:$8 sps:$4 sm:$0xff]   ;;  %2691 = vmatprep.subr.bf16.mxu1 %v3648_v27 }
 0x13b   :  { %2402 = vmatpush1.bf16.msra.mxu0 %v3550_v61  ;;  %v3570_v61 = vld [vmem:[%s4834_s3 + $0x144] ss:$8 sps:$4 sm:$0xff]   ;;  %2692 = vmatpush1.bf16.msra.mxu1 %v3646_v28 }
 0x13c   :  { %2403 = vmatprep.subr.bf16.mxu0 %v3555_v62  ;;  %v3568_v62 = vld [vmem:[%s4834_s3 + $0x140] ss:$8 sps:$4 sm:$0xff]   ;;  %2693 = vmatprep.subr.bf16.mxu1 %v3651_v30 }
 0x13f   :  { %2404 = vmatpush1.bf16.msra.mxu0 %v3553_v63  ;;  %v3573_v63 = vld [vmem:[%s4834_s3 + $0x154] ss:$8 sps:$4 sm:$0xff]   ;;  %2694 = vmatpush1.bf16.msra.mxu1 %v3649_v31 }
 0x140   :  { %2414 = vmatprep.subr.bf16.mxu0 %v3558_v0  ;;  %v3571_v0 = vld [vmem:[%s4834_s3 + $0x150] ss:$8 sps:$4 sm:$0xff]  }
 0x1d5   :  { %v1798_v35 = vpop.f32.mrb[0].mxu0  ;;  %v4704_v36 = vpop.f32.mrb[0].mxu1 }
 0x1d6   :  { %v3087_v37 = vadd.f32 %v1798_v35, %v344_v33  ;;  %v1800_v38 = vpop.f32.mrb[1].mxu0  ;;  %v1964_v39 = vpop.f32.mrb[1].mxu1  ;;  %v3089_v23 = vadd.f32 %v4704_v36, %v352_v21  ;;  %v2046_v33 = vrot.slane %v2041_v32, %v4679_v49 }
 0x1d7   :  { %v3088_v40 = vadd.f32 %v1800_v38, %v348_v34  ;;  %v3090_v41 = vadd.f32 %v1964_v39, %v356_v17  ;;  %v1802_v42 = vpop.f32.mrb[2].mxu0  ;;  %v1966_v44 = vpop.f32.mrb[2].mxu1  ;;  %v2050_v34 = vrot.slane %v2041_v32, %v4687_v29 }
 0x1d8   :  { %v1969_v45 = vmax.f32 %v3087_v37, 0.0  ;;  %v1803_v46 = vpop.f32.mrb[3].mxu0  ;;  %v1967_v47 = vpop.f32.mrb[3].mxu1  ;;  %v1971_v26 = vmax.f32 %v3089_v23, 0.0  ;;  %v2491_v44 = vld [vmem:[%s4838_s6] sm:$0x3] }
 0x1d9   :  { %v1970_v48 = vmax.f32 %v3088_v40, 0.0  ;;  %v1972_v50 = vmax.f32 %v3090_v41, 0.0  ;;  %v2496_v46 = vrot.slane %v2491_v44, %v4679_v49  ;;  %v2500_v47 = vrot.slane %v2491_v44, %v4687_v29 }
 0x1da   :  { %v1973_v53 = vpack.c.bf16 %v1969_v45, %v1969_v45  ;;  %v1975_v9 = vpack.c.bf16 %v1971_v26, %v1971_v26  ;;  %v2704_v45 = vld [vmem:[%s4839_s7] sm:$0x3] }
 0x1db   :  { %v1974_v51 = vpack.c.bf16 %v1970_v48, %v1970_v48  ;;  %v1976_v55 = vpack.c.bf16 %v1972_v50, %v1972_v50  ;;  %v2709_v48 = vrot.slane %v2704_v45, %v4679_v49 }
 0x1dd   :  { %2405 = vmatprep.mubr.bf16.mxu0 %v1974_v51  ;;  %v2713_v51 = vrot.slane %v2704_v45, %v4687_v29 }
 0x1de   :  { %2406 = vmatmul.mubr.bf16.vlgmr.msra.gmra.mrb[4].mxu0 %v1973_v53 }
 0x1df   :  { %2415 = vmatpush1.bf16.msra.mxu0 %v3556_v52  ;;  %2446 = vmatprep.mubr.bf16.mxu0 %v1976_v55 }
 0x1e0   :  { %2416 = vmatprep.subr.bf16.mxu0 %v3561_v54 }
 0x1e3   :  { %2417 = vmatpush1.bf16.msra.mxu0 %v3559_v56 }
 0x1e4   :  { %2418 = vmatprep.subr.bf16.mxu0 %v3564_v57 }
 0x1e7   :  { %2419 = vmatpush1.bf16.msra.mxu0 %v3562_v58 }
 0x1e8   :  { %2420 = vmatprep.subr.bf16.mxu0 %v3567_v59 }
 0x1eb   :  { %2421 = vmatpush1.bf16.msra.mxu0 %v3565_v60 }
 0x1ec   :  { %2422 = vmatprep.subr.bf16.mxu0 %v3570_v61 }
 0x1ef   :  { %2423 = vmatpush1.bf16.msra.mxu0 %v3568_v62 }
 0x1f0   :  { %2424 = vmatprep.subr.bf16.mxu0 %v3573_v63 }
 0x1f3   :  { %2425 = vmatpush1.bf16.msra.mxu0 %v3571_v0 }
 0x1f4   :  { %2426 = vmatprep.subr.bf16.mxu0 %v3576_v1 }
 0x1f7   :  { %2427 = vmatpush1.bf16.msra.mxu0 %v3574_v2 }
 0x1f8   :  { %2428 = vmatprep.subr.bf16.mxu0 %v3579_v3 }
 0x1fb   :  { %2429 = vmatpush1.bf16.msra.mxu0 %v3577_v4 }
 0x1fc   :  { %2430 = vmatprep.subr.bf16.mxu0 %v3582_v5 }
 0x1ff   :  { %2431 = vmatpush1.bf16.msra.mxu0 %v3580_v6 }
 0x200   :  { %2432 = vmatprep.subr.bf16.mxu0 %v3585_v7 }
 0x203   :  { %2433 = vmatpush1.bf16.msra.mxu0 %v3583_v8 }
 0x204   :  { %2434 = vmatprep.subr.bf16.mxu0 %v3588_v10 }
 0x207   :  { %2435 = vmatpush1.bf16.msra.mxu0 %v3586_v11 }
 0x208   :  { %2436 = vmatprep.subr.bf16.mxu0 %v3591_v13 }
 0x20b   :  { %2437 = vmatpush1.bf16.msra.mxu0 %v3589_v14 }
 0x20c   :  { %2438 = vmatprep.subr.bf16.mxu0 %v3594_v15 }
 0x20f   :  { %2439 = vmatpush1.bf16.msra.mxu0 %v3592_v16 }
 0x210   :  { %2440 = vmatprep.subr.bf16.mxu0 %v3597_v19 }
 0x213   :  { %2441 = vmatpush1.bf16.msra.mxu0 %v3595_v20 }
 0x214   :  { %2442 = vmatprep.subr.bf16.mxu0 %v3600_v22 }
 0x217   :  { %2443 = vmatpush1.bf16.msra.mxu0 %v3598_v43 }
 0x218   :  { %2444 = vmatprep.subr.bf16.mxu0 %v3603_v24 }
 0x21b   :  { %2445 = vmatpush1.bf16.msra.mxu0 %v3601_v12 }
 0x21e   :  { %2447 = vmatmul.mubr.bf16.vlgmr.msra.gmra.mrb[4].mxu0 %v1975_v9 }
 0x2f1   :  { %v2448_v17 = vpop.f32.mrb[4].mxu0 }
 0x2f2   :  { %v3091_v25 = vadd.f32 %v2448_v17, %v2046_v33  ;;  %v2450_v35 = vpop.f32.mrb[5].mxu0 }
 0x2f3   :  { %v3092_v36 = vadd.f32 %v2450_v35, %v2050_v34  ;;  %v2452_v37 = vpop.f32.mrb[6].mxu0 }
 0x2f4   :  { %v2455_v38 = vmax.f32 %v3091_v25, 0.0  ;;  %v2453_v39 = vpop.f32.mrb[7].mxu0 }
 0x2f5   :  { %v2456_v40 = vmax.f32 %v3092_v36, 0.0 }
 0x2f6   :  { %v2457_v42 = vpack.c.bf16 %v2455_v38, %v2455_v38 }
 0x2f7   :  { %v2458_v41 = vpack.c.bf16 %v2456_v40, %v2456_v40 }
 0x2f9   :  { %2695 = vmatprep.mubr.bf16.mxu1 %v2458_v41 }
 0x2fa   :  { %2696 = vmatmul.mubr.bf16.vlgmr.msra.gmra.mrb[4].mxu1 %v2457_v42 }
 0x3cd   :  { %v2697_v50 = vpop.f32.mrb[4].mxu1 }
 0x3ce   :  { %v2698_v52 = vadd.f32 %v2697_v50, %v2496_v46  ;;  %v2699_v53 = vpop.f32.mrb[5].mxu1 }
 0x3cf   :  { %v2700_v54 = vadd.f32 %v2699_v53, %v2500_v47  ;;  %v2701_v55 = vpop.f32.mrb[6].mxu1 }
 0x3d0   :  { %v2716_v56 = vadd.f32 %v2709_v48, %v2698_v52  ;;  %v2702_v57 = vpop.f32.mrb[7].mxu1 }
 0x3d1   :  { %v2717_v58 = vadd.f32 %v2713_v51, %v2700_v54 }
 0x3d3   :  { %v2720_v59 = vcombine.low %v2716_v56, %v2717_v58 }
 0x3d5   :  { %3086 = vst.sshfl [vmem:[%s4840_s8] sm:$0x33 pattern:$0x76325410] %v2720_v59 }

</bundles_post_ra>
